<compile_context>
chip_gen: v6e
topology: v6e:2x2x1
jax: 0.10.0
libtpu: 0.0.40
codegen_flags: <defaults>
</compile_context>

<pallas_src>
import math
import functools

import jax
import jax.numpy as jnp
from jax.experimental import pallas as pl
from jax.experimental.pallas import tpu as pltpu

BN_EPS = 1e-5
BN_SCALE = 1.0 / math.sqrt(1.0 + BN_EPS)


# ------------------------------ fused kernel ----------------------------------------

def _fcnar_kernel(x_ref,
                  w1_ref, b1_ref, w2_ref, b2_ref, w3_ref, b3_ref,
                  wb4_ref, wb3_ref, wb2_ref, wb1_ref,
                  u3_ref, u2_ref, u1_ref,
                  o_ref,
                  pad_ref, col_ref, pool_ref,
                  *, L, motiflen, off):
    """One batch row: conv/pool encoder + upsample/blend decoder, all in VMEM."""
    L2, L4, L8 = L // 2, L // 4, L // 8

    def im2col(x_val, cin, ksz, lc):
        # Stage zero-padded activation at sublane-aligned offset `off`, then pack the
        # K shifted tap windows side-by-side along lanes -> (lc, ksz*cin) tile.
        p = ksz // 2
        pad_ref[...] = jnp.zeros_like(pad_ref)
        pad_ref[pl.ds(off, lc), pl.ds(0, cin)] = x_val
        for t in range(ksz):                           # static unroll, pure VMEM copies
            col_ref[pl.ds(0, lc), pl.ds(t * cin, cin)] = \
                pad_ref[pl.ds(off - p + t, lc), pl.ds(0, cin)]
        return col_ref[pl.ds(0, lc), pl.ds(0, ksz * cin)]

    def conv_same(x_val, cin, ksz, lc, w_flat_ref):
        # 'same' Conv1d as ONE bf16 MXU matmul with f32 accumulation.
        cols = im2col(x_val, cin, ksz, lc).astype(jnp.bfloat16)
        return jnp.dot(cols, w_flat_ref[...], preferred_element_type=jnp.float32)

    def conv_relu_pool(x_val, cin, ksz, lc, w_flat_ref, b_ref_):
        acc = conv_same(x_val, cin, ksz, lc, w_flat_ref)          # (lc, 64), no bias yet
        pool_ref[pl.ds(0, lc), :] = acc
        half = lc // 2
        pooled = jnp.maximum(pool_ref[pl.ds(0, half, stride=2), :],
                             pool_ref[pl.ds(1, half, stride=2), :])
        # bias + ReLU after the pool: relu(max(a,c)+b) == max(relu(a+b), relu(c+b))
        return jnp.maximum(pooled + b_ref_[...], 0.0)

    def blend(prev, u_ref_, skip, cin, lc, w_flat_ref):
        # upsample(linear, align_corners=False) as a small matmul, + skip, then
        # BN(eval)+ReLU+Conv with the BN scale already folded into w_flat_ref.
        up = jnp.dot(u_ref_[...], prev, preferred_element_type=jnp.float32) + skip
        return conv_same(jnp.maximum(up, 0.0), cin, 3, lc, w_flat_ref)

    x = x_ref[0]                                                    # (L, 4) f32

    # ----- encoder -----
    out1 = conv_relu_pool(x,    4,  motiflen, L,  w1_ref, b1_ref)   # (L/2, 64)
    out2 = conv_relu_pool(out1, 64, 5,        L2, w2_ref, b2_ref)   # (L/4, 64)
    out3 = conv_relu_pool(out2, 64, 3,        L4, w3_ref, b3_ref)   # (L/8, 64)
    # TODO(synk): Dropout(p=0.2) layers are identity here (inference mode); training
    # mode stochastic dropout / batch-statistic BatchNorm are not reproduced.

    # ----- decoder -----
    up5 = jnp.mean(out3, axis=0, keepdims=True)                     # AdaptiveAvgPool1d(1)
    up4 = up5 + out3                                                # len-1 upsample + skip4
    y4 = conv_same(jnp.maximum(up4, 0.0), 64, 3, L8, wb4_ref)       # blend4 -> (L/8, 64)
    y3 = blend(y4, u3_ref, out2, 64, L4, wb3_ref)                   # blend3 -> (L/4, 64)
    y2 = blend(y3, u2_ref, out1, 64, L2, wb2_ref)                   # blend2 -> (L/2, 4)

    # blend1 (Cout=1): lane reduction instead of an N=1 matmul.
    up1 = jnp.dot(u1_ref[...], y2, preferred_element_type=jnp.float32) + x
    cols1 = im2col(jnp.maximum(up1, 0.0), 4, 3, L)                  # (L, 12) f32
    logit = jnp.sum(cols1 * wb1_ref[...], axis=-1, keepdims=True)   # (L, 1)

    o_ref[0] = 1.0 / (1.0 + jnp.exp(-logit))                        # sigmoid


# ------------------------------ host-side helpers ------------------------------------

def upsample_matrix(lin, lout):
    """(lout, lin) matrix reproducing F.interpolate(mode='linear', align_corners=False)."""
    scale = lin / lout
    j = jnp.arange(lout, dtype=jnp.float32)
    src = jnp.maximum(scale * (j + 0.5) - 0.5, 0.0)
    x0 = jnp.clip(jnp.floor(src).astype(jnp.int32), 0, lin - 1)
    x1 = jnp.minimum(x0 + 1, lin - 1)
    w1 = src - x0.astype(jnp.float32)
    w0 = 1.0 - w1
    i = jnp.arange(lin)
    u = (w0[:, None] * (i[None, :] == x0[:, None])
         + w1[:, None] * (i[None, :] == x1[:, None]))
    return u.astype(jnp.float32)


def init_params(key, motiflen=13):
    """Deterministic xavier_uniform conv weights, zero biases, flattened for the kernel."""
    def xavier(k, cout, cin, ksz):
        bound = math.sqrt(6.0 / (cin * ksz + cout * ksz))
        w = jax.random.uniform(k, (cout, cin, ksz), jnp.float32, -bound, bound)
        return jnp.transpose(w, (2, 1, 0)).reshape(ksz * cin, cout)   # (K*Cin, Cout)

    ks = jax.random.split(key, 7)
    zeros64 = jnp.zeros((1, 64), jnp.float32)
    # TODO(synk): BN folding below assumes eval-mode fresh-init stats (mean=0, var=1,
    # gamma=1, beta=0); a trained checkpoint needs explicit per-channel scale/shift
    # applied before the ReLU instead of a weight fold.
    return {
        'w1': xavier(ks[0], 64, 4, motiflen).astype(jnp.bfloat16), 'b1': zeros64,
        'w2': xavier(ks[1], 64, 64, 5).astype(jnp.bfloat16),       'b2': zeros64,
        'w3': xavier(ks[2], 64, 64, 3).astype(jnp.bfloat16),       'b3': zeros64,
        'wb4': (xavier(ks[3], 64, 64, 3) * BN_SCALE).astype(jnp.bfloat16),
        'wb3': (xavier(ks[4], 64, 64, 3) * BN_SCALE).astype(jnp.bfloat16),
        'wb2': (xavier(ks[5], 4, 64, 3) * BN_SCALE).astype(jnp.bfloat16),
        'wb1': (xavier(ks[6], 1, 4, 3) * BN_SCALE).reshape(1, -1),   # (1, 12) f32
    }


def fcnar_forward(data_ncw, params, motiflen=13):
    """data_ncw: (B, 4, L) like the PyTorch module; returns (B, L)."""
    assert motiflen % 2 == 1, "motiflen must be odd ('same' conv)"
    x = jnp.transpose(data_ncw, (0, 2, 1)).astype(jnp.float32)       # (B, L, 4)
    B, L, _ = x.shape
    assert L % 8 == 0, "length must be divisible by 8 (three 2x max-pools)"
    L2, L4, L8 = L // 2, L // 4, L // 8
    padmax = motiflen // 2
    off = -(-padmax // 8) * 8                 # sublane-aligned offset for in-VMEM padding
    col_w = max(motiflen * 4, 5 * 64)

    u3 = upsample_matrix(L8, L4)
    u2 = upsample_matrix(L4, L2)
    u1 = upsample_matrix(L2, L)

    kern = functools.partial(_fcnar_kernel, L=L, motiflen=motiflen, off=off)

    w_names = ('w1', 'b1', 'w2', 'b2', 'w3', 'b3', 'wb4', 'wb3', 'wb2', 'wb1')
    w_specs = [pl.BlockSpec(params[n].shape, lambda i: (0, 0)) for n in w_names]
    u_specs = [pl.BlockSpec(u.shape, lambda i: (0, 0)) for u in (u3, u2, u1)]

    # TODO(synk): for very long sequences the whole-row-resident design would need a
    # length-tiled (haloed) multi-kernel path; at the sizes used here VMEM is ample.
    out = pl.pallas_call(
        kern,
        out_shape=jax.ShapeDtypeStruct((B, L, 1), jnp.float32),
        grid=(B,),
        in_specs=[pl.BlockSpec((1, L, 4), lambda i: (i, 0, 0))] + w_specs + u_specs,
        out_specs=pl.BlockSpec((1, L, 1), lambda i: (i, 0, 0)),
        scratch_shapes=[
            pltpu.VMEM((L + 2 * off, 64), jnp.float32),   # zero-padded conv input
            pltpu.VMEM((L, col_w), jnp.float32),          # im2col staging
            pltpu.VMEM((L, 64), jnp.float32),             # pre-pool conv accumulator
        ],
        compiler_params=pltpu.CompilerParams(dimension_semantics=("parallel",)),
    )(x, *(params[n] for n in w_names), u3, u2, u1)

    return out.reshape(B, L)                              # == out_dense.view(b, -1)


if __name__ == "__main__":
    key = jax.random.PRNGKey(0)
    k_data, k_params = jax.random.split(key)
    B, L = 2, 64
    data = jax.random.normal(k_data, (B, 4, L), jnp.float32)      # PyTorch NCW input
    params = init_params(k_params, motiflen=13)

    fwd = jax.jit(fcnar_forward, static_argnames=("motiflen",))
    out = fwd(data, params, motiflen=13)
    out = jax.block_until_ready(out)
    assert out.shape == (B, L), out.shape
    assert bool(jnp.all(jnp.isfinite(out)))
    print("KERNEL_OK")
</pallas_src>

<mosaic_0001>
module attributes {stable_mosaic.version = 11 : i64} {
  func.func @_fcnar_kernel(%arg0: i32, %arg1: memref<1x64x4xf32, #tpu.memory_space<vmem>>, %arg2: memref<52x64xbf16, #tpu.memory_space<vmem>>, %arg3: memref<1x64xf32, #tpu.memory_space<vmem>>, %arg4: memref<320x64xbf16, #tpu.memory_space<vmem>>, %arg5: memref<1x64xf32, #tpu.memory_space<vmem>>, %arg6: memref<192x64xbf16, #tpu.memory_space<vmem>>, %arg7: memref<1x64xf32, #tpu.memory_space<vmem>>, %arg8: memref<192x64xbf16, #tpu.memory_space<vmem>>, %arg9: memref<192x64xbf16, #tpu.memory_space<vmem>>, %arg10: memref<192x4xbf16, #tpu.memory_space<vmem>>, %arg11: memref<1x12xf32, #tpu.memory_space<vmem>>, %arg12: memref<16x8xf32, #tpu.memory_space<vmem>>, %arg13: memref<32x16xf32, #tpu.memory_space<vmem>>, %arg14: memref<64x32xf32, #tpu.memory_space<vmem>>, %arg15: memref<1x64x1xf32, #tpu.memory_space<vmem>>, %arg16: memref<80x64xf32, #tpu.memory_space<vmem>>, %arg17: memref<64x320xf32, #tpu.memory_space<vmem>>, %arg18: memref<64x64xf32, #tpu.memory_space<vmem>>) attributes {dimension_semantics = [#tpu.dimension_semantics<parallel>], iteration_bounds = array<i64: 2>, scalar_prefetch = 0 : i64, scratch_operands = 3 : i64, tpu.core_type = #tpu.core_type<tc>, window_params = [{transform_indices = @transform_0, window_bounds = array<i64: 1, 64, 4>}, {pipeline_mode = #tpu.pipeline_mode<synchronous>, transform_indices = @transform_1, window_bounds = array<i64: 52, 64>}, {pipeline_mode = #tpu.pipeline_mode<synchronous>, transform_indices = @transform_2, window_bounds = array<i64: 1, 64>}, {pipeline_mode = #tpu.pipeline_mode<synchronous>, transform_indices = @transform_3, window_bounds = array<i64: 320, 64>}, {pipeline_mode = #tpu.pipeline_mode<synchronous>, transform_indices = @transform_4, window_bounds = array<i64: 1, 64>}, {pipeline_mode = #tpu.pipeline_mode<synchronous>, transform_indices = @transform_5, window_bounds = array<i64: 192, 64>}, {pipeline_mode = #tpu.pipeline_mode<synchronous>, transform_indices = @transform_6, window_bounds = array<i64: 1, 64>}, {pipeline_mode = #tpu.pipeline_mode<synchronous>, transform_indices = @transform_7, window_bounds = array<i64: 192, 64>}, {pipeline_mode = #tpu.pipeline_mode<synchronous>, transform_indices = @transform_8, window_bounds = array<i64: 192, 64>}, {pipeline_mode = #tpu.pipeline_mode<synchronous>, transform_indices = @transform_9, window_bounds = array<i64: 192, 4>}, {pipeline_mode = #tpu.pipeline_mode<synchronous>, transform_indices = @transform_10, window_bounds = array<i64: 1, 12>}, {pipeline_mode = #tpu.pipeline_mode<synchronous>, transform_indices = @transform_11, window_bounds = array<i64: 16, 8>}, {pipeline_mode = #tpu.pipeline_mode<synchronous>, transform_indices = @transform_12, window_bounds = array<i64: 32, 16>}, {pipeline_mode = #tpu.pipeline_mode<synchronous>, transform_indices = @transform_13, window_bounds = array<i64: 64, 32>}, {transform_indices = @transform_14, window_bounds = array<i64: 1, 64, 1>}]} {
    %c0 = arith.constant 0 : index
    %c0_0 = arith.constant 0 : index
    %c0_1 = arith.constant 0 : index
    %0 = vector.load %arg1[%c0, %c0_0, %c0_1] : memref<1x64x4xf32, #tpu.memory_space<vmem>>, vector<1x64x4xf32>
    %1 = vector.shape_cast %0 : vector<1x64x4xf32> to vector<64x4xf32>
    %cst = arith.constant 0.000000e+00 : f32
    %2 = vector.broadcast %cst : f32 to vector<80x64xf32>
    %c0_2 = arith.constant 0 : index
    %c0_3 = arith.constant 0 : index
    %3 = vector.load %arg16[%c0_2, %c0_3] : memref<80x64xf32, #tpu.memory_space<vmem>>, vector<80x64xf32>
    tpu.vector_store %arg16[%c0_2, %c0_3], %2 {strides = array<i32>} : memref<80x64xf32, #tpu.memory_space<vmem>>, vector<80x64xf32>,
    %c8 = arith.constant 8 : index
    %c0_4 = arith.constant 0 : index
    %4 = vector.load %arg16[%c8, %c0_4] : memref<80x64xf32, #tpu.memory_space<vmem>>, vector<64x4xf32>
    tpu.vector_store %arg16[%c8, %c0_4], %1 {strides = array<i32>} : memref<80x64xf32, #tpu.memory_space<vmem>>, vector<64x4xf32>,
    %c2 = arith.constant 2 : index
    %c0_5 = arith.constant 0 : index
    %5 = vector.load %arg16[%c2, %c0_5] : memref<80x64xf32, #tpu.memory_space<vmem>>, vector<64x4xf32>
    %c0_6 = arith.constant 0 : index
    %c0_7 = arith.constant 0 : index
    %6 = vector.load %arg17[%c0_6, %c0_7] : memref<64x320xf32, #tpu.memory_space<vmem>>, vector<64x4xf32>
    tpu.vector_store %arg17[%c0_6, %c0_7], %5 {strides = array<i32>} : memref<64x320xf32, #tpu.memory_space<vmem>>, vector<64x4xf32>,
    %c3 = arith.constant 3 : index
    %c0_8 = arith.constant 0 : index
    %7 = vector.load %arg16[%c3, %c0_8] : memref<80x64xf32, #tpu.memory_space<vmem>>, vector<64x4xf32>
    %c0_9 = arith.constant 0 : index
    %c4 = arith.constant 4 : index
    %8 = vector.load %arg17[%c0_9, %c4] : memref<64x320xf32, #tpu.memory_space<vmem>>, vector<64x4xf32>
    tpu.vector_store %arg17[%c0_9, %c4], %7 {strides = array<i32>} : memref<64x320xf32, #tpu.memory_space<vmem>>, vector<64x4xf32>,
    %c4_10 = arith.constant 4 : index
    %c0_11 = arith.constant 0 : index
    %9 = vector.load %arg16[%c4_10, %c0_11] : memref<80x64xf32, #tpu.memory_space<vmem>>, vector<64x4xf32>
    %c0_12 = arith.constant 0 : index
    %c8_13 = arith.constant 8 : index
    %10 = vector.load %arg17[%c0_12, %c8_13] : memref<64x320xf32, #tpu.memory_space<vmem>>, vector<64x4xf32>
    tpu.vector_store %arg17[%c0_12, %c8_13], %9 {strides = array<i32>} : memref<64x320xf32, #tpu.memory_space<vmem>>, vector<64x4xf32>,
    %c5 = arith.constant 5 : index
    %c0_14 = arith.constant 0 : index
    %11 = vector.load %arg16[%c5, %c0_14] : memref<80x64xf32, #tpu.memory_space<vmem>>, vector<64x4xf32>
    %c0_15 = arith.constant 0 : index
    %c12 = arith.constant 12 : index
    %12 = vector.load %arg17[%c0_15, %c12] : memref<64x320xf32, #tpu.memory_space<vmem>>, vector<64x4xf32>
    tpu.vector_store %arg17[%c0_15, %c12], %11 {strides = array<i32>} : memref<64x320xf32, #tpu.memory_space<vmem>>, vector<64x4xf32>,
    %c6 = arith.constant 6 : index
    %c0_16 = arith.constant 0 : index
    %13 = vector.load %arg16[%c6, %c0_16] : memref<80x64xf32, #tpu.memory_space<vmem>>, vector<64x4xf32>
    %c0_17 = arith.constant 0 : index
    %c16 = arith.constant 16 : index
    %14 = vector.load %arg17[%c0_17, %c16] : memref<64x320xf32, #tpu.memory_space<vmem>>, vector<64x4xf32>
    tpu.vector_store %arg17[%c0_17, %c16], %13 {strides = array<i32>} : memref<64x320xf32, #tpu.memory_space<vmem>>, vector<64x4xf32>,
    %c7 = arith.constant 7 : index
    %c0_18 = arith.constant 0 : index
    %15 = vector.load %arg16[%c7, %c0_18] : memref<80x64xf32, #tpu.memory_space<vmem>>, vector<64x4xf32>
    %c0_19 = arith.constant 0 : index
    %c20 = arith.constant 20 : index
    %16 = vector.load %arg17[%c0_19, %c20] : memref<64x320xf32, #tpu.memory_space<vmem>>, vector<64x4xf32>
    tpu.vector_store %arg17[%c0_19, %c20], %15 {strides = array<i32>} : memref<64x320xf32, #tpu.memory_space<vmem>>, vector<64x4xf32>,
    %c8_20 = arith.constant 8 : index
    %c0_21 = arith.constant 0 : index
    %17 = vector.load %arg16[%c8_20, %c0_21] : memref<80x64xf32, #tpu.memory_space<vmem>>, vector<64x4xf32>
    %c0_22 = arith.constant 0 : index
    %c24 = arith.constant 24 : index
    %18 = vector.load %arg17[%c0_22, %c24] : memref<64x320xf32, #tpu.memory_space<vmem>>, vector<64x4xf32>
    tpu.vector_store %arg17[%c0_22, %c24], %17 {strides = array<i32>} : memref<64x320xf32, #tpu.memory_space<vmem>>, vector<64x4xf32>,
    %c9 = arith.constant 9 : index
    %c0_23 = arith.constant 0 : index
    %19 = vector.load %arg16[%c9, %c0_23] : memref<80x64xf32, #tpu.memory_space<vmem>>, vector<64x4xf32>
    %c0_24 = arith.constant 0 : index
    %c28 = arith.constant 28 : index
    %20 = vector.load %arg17[%c0_24, %c28] : memref<64x320xf32, #tpu.memory_space<vmem>>, vector<64x4xf32>
    tpu.vector_store %arg17[%c0_24, %c28], %19 {strides = array<i32>} : memref<64x320xf32, #tpu.memory_space<vmem>>, vector<64x4xf32>,
    %c10 = arith.constant 10 : index
    %c0_25 = arith.constant 0 : index
    %21 = vector.load %arg16[%c10, %c0_25] : memref<80x64xf32, #tpu.memory_space<vmem>>, vector<64x4xf32>
    %c0_26 = arith.constant 0 : index
    %c32 = arith.constant 32 : index
    %22 = vector.load %arg17[%c0_26, %c32] : memref<64x320xf32, #tpu.memory_space<vmem>>, vector<64x4xf32>
    tpu.vector_store %arg17[%c0_26, %c32], %21 {strides = array<i32>} : memref<64x320xf32, #tpu.memory_space<vmem>>, vector<64x4xf32>,
    %c11 = arith.constant 11 : index
    %c0_27 = arith.constant 0 : index
    %23 = vector.load %arg16[%c11, %c0_27] : memref<80x64xf32, #tpu.memory_space<vmem>>, vector<64x4xf32>
    %c0_28 = arith.constant 0 : index
    %c36 = arith.constant 36 : index
    %24 = vector.load %arg17[%c0_28, %c36] : memref<64x320xf32, #tpu.memory_space<vmem>>, vector<64x4xf32>
    tpu.vector_store %arg17[%c0_28, %c36], %23 {strides = array<i32>} : memref<64x320xf32, #tpu.memory_space<vmem>>, vector<64x4xf32>,
    %c12_29 = arith.constant 12 : index
    %c0_30 = arith.constant 0 : index
    %25 = vector.load %arg16[%c12_29, %c0_30] : memref<80x64xf32, #tpu.memory_space<vmem>>, vector<64x4xf32>
    %c0_31 = arith.constant 0 : index
    %c40 = arith.constant 40 : index
    %26 = vector.load %arg17[%c0_31, %c40] : memref<64x320xf32, #tpu.memory_space<vmem>>, vector<64x4xf32>
    tpu.vector_store %arg17[%c0_31, %c40], %25 {strides = array<i32>} : memref<64x320xf32, #tpu.memory_space<vmem>>, vector<64x4xf32>,
    %c13 = arith.constant 13 : index
    %c0_32 = arith.constant 0 : index
    %27 = vector.load %arg16[%c13, %c0_32] : memref<80x64xf32, #tpu.memory_space<vmem>>, vector<64x4xf32>
    %c0_33 = arith.constant 0 : index
    %c44 = arith.constant 44 : index
    %28 = vector.load %arg17[%c0_33, %c44] : memref<64x320xf32, #tpu.memory_space<vmem>>, vector<64x4xf32>
    tpu.vector_store %arg17[%c0_33, %c44], %27 {strides = array<i32>} : memref<64x320xf32, #tpu.memory_space<vmem>>, vector<64x4xf32>,
    %c14 = arith.constant 14 : index
    %c0_34 = arith.constant 0 : index
    %29 = vector.load %arg16[%c14, %c0_34] : memref<80x64xf32, #tpu.memory_space<vmem>>, vector<64x4xf32>
    %c0_35 = arith.constant 0 : index
    %c48 = arith.constant 48 : index
    %30 = vector.load %arg17[%c0_35, %c48] : memref<64x320xf32, #tpu.memory_space<vmem>>, vector<64x4xf32>
    tpu.vector_store %arg17[%c0_35, %c48], %29 {strides = array<i32>} : memref<64x320xf32, #tpu.memory_space<vmem>>, vector<64x4xf32>,
    %c0_36 = arith.constant 0 : index
    %c0_37 = arith.constant 0 : index
    %31 = vector.load %arg17[%c0_36, %c0_37] : memref<64x320xf32, #tpu.memory_space<vmem>>, vector<64x52xf32>
    %32 = arith.truncf %31 : vector<64x52xf32> to vector<64x52xbf16>
    %c0_38 = arith.constant 0 : index
    %c0_39 = arith.constant 0 : index
    %33 = vector.load %arg2[%c0_38, %c0_39] : memref<52x64xbf16, #tpu.memory_space<vmem>>, vector<52x64xbf16>
    %cst_40 = arith.constant dense<0.000000e+00> : vector<64x64xf32>
    %34 = tpu.matmul %32, %33, %cst_40 {dimension_numbers = #tpu.dot_dimension_numbers<[1], [0], [0], [1], [0, 0, 1, 1], [], []>} : vector<64x52xbf16>, vector<52x64xbf16>, vector<64x64xf32> -> vector<64x64xf32>
    %c0_41 = arith.constant 0 : index
    %c0_42 = arith.constant 0 : index
    %35 = vector.load %arg18[%c0_41, %c0_42] : memref<64x64xf32, #tpu.memory_space<vmem>>, vector<64x64xf32>
    tpu.vector_store %arg18[%c0_41, %c0_42], %34 {strides = array<i32>} : memref<64x64xf32, #tpu.memory_space<vmem>>, vector<64x64xf32>,
    %c0_43 = arith.constant 0 : index
    %c0_44 = arith.constant 0 : index
    %36 = tpu.strided_load %arg18[%c0_43, %c0_44] {strides = array<i32: 2, 1>} : memref<64x64xf32, #tpu.memory_space<vmem>>, vector<32x64xf32>
    %c1 = arith.constant 1 : index
    %c0_45 = arith.constant 0 : index
    %37 = tpu.strided_load %arg18[%c1, %c0_45] {strides = array<i32: 2, 1>} : memref<64x64xf32, #tpu.memory_space<vmem>>, vector<32x64xf32>
    %38 = arith.maximumf %36, %37 : vector<32x64xf32>
    %c0_46 = arith.constant 0 : index
    %c0_47 = arith.constant 0 : index
    %39 = vector.load %arg3[%c0_46, %c0_47] : memref<1x64xf32, #tpu.memory_space<vmem>>, vector<1x64xf32>
    %40 = vector.broadcast %39 : vector<1x64xf32> to vector<32x64xf32>
    %41 = arith.addf %38, %40 : vector<32x64xf32>
    %cst_48 = arith.constant 0.000000e+00 : f32
    %42 = vector.broadcast %cst_48 : f32 to vector<32x64xf32>
    %43 = arith.maximumf %41, %42 : vector<32x64xf32>
    %cst_49 = arith.constant 0.000000e+00 : f32
    %44 = vector.broadcast %cst_49 : f32 to vector<80x64xf32>
    %c0_50 = arith.constant 0 : index
    %c0_51 = arith.constant 0 : index
    %45 = vector.load %arg16[%c0_50, %c0_51] : memref<80x64xf32, #tpu.memory_space<vmem>>, vector<80x64xf32>
    tpu.vector_store %arg16[%c0_50, %c0_51], %44 {strides = array<i32>} : memref<80x64xf32, #tpu.memory_space<vmem>>, vector<80x64xf32>,
    %c8_52 = arith.constant 8 : index
    %c0_53 = arith.constant 0 : index
    %46 = vector.load %arg16[%c8_52, %c0_53] : memref<80x64xf32, #tpu.memory_space<vmem>>, vector<32x64xf32>
    tpu.vector_store %arg16[%c8_52, %c0_53], %43 {strides = array<i32>} : memref<80x64xf32, #tpu.memory_space<vmem>>, vector<32x64xf32>,
    %c6_54 = arith.constant 6 : index
    %c0_55 = arith.constant 0 : index
    %47 = vector.load %arg16[%c6_54, %c0_55] : memref<80x64xf32, #tpu.memory_space<vmem>>, vector<32x64xf32>
    %c0_56 = arith.constant 0 : index
    %c0_57 = arith.constant 0 : index
    %48 = vector.load %arg17[%c0_56, %c0_57] : memref<64x320xf32, #tpu.memory_space<vmem>>, vector<32x64xf32>
    tpu.vector_store %arg17[%c0_56, %c0_57], %47 {strides = array<i32>} : memref<64x320xf32, #tpu.memory_space<vmem>>, vector<32x64xf32>,
    %c7_58 = arith.constant 7 : index
    %c0_59 = arith.constant 0 : index
    %49 = vector.load %arg16[%c7_58, %c0_59] : memref<80x64xf32, #tpu.memory_space<vmem>>, vector<32x64xf32>
    %c0_60 = arith.constant 0 : index
    %c64 = arith.constant 64 : index
    %50 = vector.load %arg17[%c0_60, %c64] : memref<64x320xf32, #tpu.memory_space<vmem>>, vector<32x64xf32>
    tpu.vector_store %arg17[%c0_60, %c64], %49 {strides = array<i32>} : memref<64x320xf32, #tpu.memory_space<vmem>>, vector<32x64xf32>,
    %c8_61 = arith.constant 8 : index
    %c0_62 = arith.constant 0 : index
    %51 = vector.load %arg16[%c8_61, %c0_62] : memref<80x64xf32, #tpu.memory_space<vmem>>, vector<32x64xf32>
    %c0_63 = arith.constant 0 : index
    %c128 = arith.constant 128 : index
    %52 = vector.load %arg17[%c0_63, %c128] : memref<64x320xf32, #tpu.memory_space<vmem>>, vector<32x64xf32>
    tpu.vector_store %arg17[%c0_63, %c128], %51 {strides = array<i32>} : memref<64x320xf32, #tpu.memory_space<vmem>>, vector<32x64xf32>,
    %c9_64 = arith.constant 9 : index
    %c0_65 = arith.constant 0 : index
    %53 = vector.load %arg16[%c9_64, %c0_65] : memref<80x64xf32, #tpu.memory_space<vmem>>, vector<32x64xf32>
    %c0_66 = arith.constant 0 : index
    %c192 = arith.constant 192 : index
    %54 = vector.load %arg17[%c0_66, %c192] : memref<64x320xf32, #tpu.memory_space<vmem>>, vector<32x64xf32>
    tpu.vector_store %arg17[%c0_66, %c192], %53 {strides = array<i32>} : memref<64x320xf32, #tpu.memory_space<vmem>>, vector<32x64xf32>,
    %c10_67 = arith.constant 10 : index
    %c0_68 = arith.constant 0 : index
    %55 = vector.load %arg16[%c10_67, %c0_68] : memref<80x64xf32, #tpu.memory_space<vmem>>, vector<32x64xf32>
    %c0_69 = arith.constant 0 : index
    %c256 = arith.constant 256 : index
    %56 = vector.load %arg17[%c0_69, %c256] : memref<64x320xf32, #tpu.memory_space<vmem>>, vector<32x64xf32>
    tpu.vector_store %arg17[%c0_69, %c256], %55 {strides = array<i32>} : memref<64x320xf32, #tpu.memory_space<vmem>>, vector<32x64xf32>,
    %c0_70 = arith.constant 0 : index
    %c0_71 = arith.constant 0 : index
    %57 = vector.load %arg17[%c0_70, %c0_71] : memref<64x320xf32, #tpu.memory_space<vmem>>, vector<32x320xf32>
    %58 = arith.truncf %57 : vector<32x320xf32> to vector<32x320xbf16>
    %c0_72 = arith.constant 0 : index
    %c0_73 = arith.constant 0 : index
    %59 = vector.load %arg4[%c0_72, %c0_73] : memref<320x64xbf16, #tpu.memory_space<vmem>>, vector<320x64xbf16>
    %cst_74 = arith.constant dense<0.000000e+00> : vector<32x64xf32>
    %60 = tpu.matmul %58, %59, %cst_74 {dimension_numbers = #tpu.dot_dimension_numbers<[1], [0], [0], [1], [0, 0, 1, 1], [], []>} : vector<32x320xbf16>, vector<320x64xbf16>, vector<32x64xf32> -> vector<32x64xf32>
    %c0_75 = arith.constant 0 : index
    %c0_76 = arith.constant 0 : index
    %61 = vector.load %arg18[%c0_75, %c0_76] : memref<64x64xf32, #tpu.memory_space<vmem>>, vector<32x64xf32>
    tpu.vector_store %arg18[%c0_75, %c0_76], %60 {strides = array<i32>} : memref<64x64xf32, #tpu.memory_space<vmem>>, vector<32x64xf32>,
    %c0_77 = arith.constant 0 : index
    %c0_78 = arith.constant 0 : index
    %62 = tpu.strided_load %arg18[%c0_77, %c0_78] {strides = array<i32: 2, 1>} : memref<64x64xf32, #tpu.memory_space<vmem>>, vector<16x64xf32>
    %c1_79 = arith.constant 1 : index
    %c0_80 = arith.constant 0 : index
    %63 = tpu.strided_load %arg18[%c1_79, %c0_80] {strides = array<i32: 2, 1>} : memref<64x64xf32, #tpu.memory_space<vmem>>, vector<16x64xf32>
    %64 = arith.maximumf %62, %63 : vector<16x64xf32>
    %c0_81 = arith.constant 0 : index
    %c0_82 = arith.constant 0 : index
    %65 = vector.load %arg5[%c0_81, %c0_82] : memref<1x64xf32, #tpu.memory_space<vmem>>, vector<1x64xf32>
    %66 = vector.broadcast %65 : vector<1x64xf32> to vector<16x64xf32>
    %67 = arith.addf %64, %66 : vector<16x64xf32>
    %cst_83 = arith.constant 0.000000e+00 : f32
    %68 = vector.broadcast %cst_83 : f32 to vector<16x64xf32>
    %69 = arith.maximumf %67, %68 : vector<16x64xf32>
    %cst_84 = arith.constant 0.000000e+00 : f32
    %70 = vector.broadcast %cst_84 : f32 to vector<80x64xf32>
    %c0_85 = arith.constant 0 : index
    %c0_86 = arith.constant 0 : index
    %71 = vector.load %arg16[%c0_85, %c0_86] : memref<80x64xf32, #tpu.memory_space<vmem>>, vector<80x64xf32>
    tpu.vector_store %arg16[%c0_85, %c0_86], %70 {strides = array<i32>} : memref<80x64xf32, #tpu.memory_space<vmem>>, vector<80x64xf32>,
    %c8_87 = arith.constant 8 : index
    %c0_88 = arith.constant 0 : index
    %72 = vector.load %arg16[%c8_87, %c0_88] : memref<80x64xf32, #tpu.memory_space<vmem>>, vector<16x64xf32>
    tpu.vector_store %arg16[%c8_87, %c0_88], %69 {strides = array<i32>} : memref<80x64xf32, #tpu.memory_space<vmem>>, vector<16x64xf32>,
    %c7_89 = arith.constant 7 : index
    %c0_90 = arith.constant 0 : index
    %73 = vector.load %arg16[%c7_89, %c0_90] : memref<80x64xf32, #tpu.memory_space<vmem>>, vector<16x64xf32>
    %c0_91 = arith.constant 0 : index
    %c0_92 = arith.constant 0 : index
    %74 = vector.load %arg17[%c0_91, %c0_92] : memref<64x320xf32, #tpu.memory_space<vmem>>, vector<16x64xf32>
    tpu.vector_store %arg17[%c0_91, %c0_92], %73 {strides = array<i32>} : memref<64x320xf32, #tpu.memory_space<vmem>>, vector<16x64xf32>,
    %c8_93 = arith.constant 8 : index
    %c0_94 = arith.constant 0 : index
    %75 = vector.load %arg16[%c8_93, %c0_94] : memref<80x64xf32, #tpu.memory_space<vmem>>, vector<16x64xf32>
    %c0_95 = arith.constant 0 : index
    %c64_96 = arith.constant 64 : index
    %76 = vector.load %arg17[%c0_95, %c64_96] : memref<64x320xf32, #tpu.memory_space<vmem>>, vector<16x64xf32>
    tpu.vector_store %arg17[%c0_95, %c64_96], %75 {strides = array<i32>} : memref<64x320xf32, #tpu.memory_space<vmem>>, vector<16x64xf32>,
    %c9_97 = arith.constant 9 : index
    %c0_98 = arith.constant 0 : index
    %77 = vector.load %arg16[%c9_97, %c0_98] : memref<80x64xf32, #tpu.memory_space<vmem>>, vector<16x64xf32>
    %c0_99 = arith.constant 0 : index
    %c128_100 = arith.constant 128 : index
    %78 = vector.load %arg17[%c0_99, %c128_100] : memref<64x320xf32, #tpu.memory_space<vmem>>, vector<16x64xf32>
    tpu.vector_store %arg17[%c0_99, %c128_100], %77 {strides = array<i32>} : memref<64x320xf32, #tpu.memory_space<vmem>>, vector<16x64xf32>,
    %c0_101 = arith.constant 0 : index
    %c0_102 = arith.constant 0 : index
    %79 = vector.load %arg17[%c0_101, %c0_102] : memref<64x320xf32, #tpu.memory_space<vmem>>, vector<16x192xf32>
    %80 = arith.truncf %79 : vector<16x192xf32> to vector<16x192xbf16>
    %c0_103 = arith.constant 0 : index
    %c0_104 = arith.constant 0 : index
    %81 = vector.load %arg6[%c0_103, %c0_104] : memref<192x64xbf16, #tpu.memory_space<vmem>>, vector<192x64xbf16>
    %cst_105 = arith.constant dense<0.000000e+00> : vector<16x64xf32>
    %82 = tpu.matmul %80, %81, %cst_105 {dimension_numbers = #tpu.dot_dimension_numbers<[1], [0], [0], [1], [0, 0, 1, 1], [], []>} : vector<16x192xbf16>, vector<192x64xbf16>, vector<16x64xf32> -> vector<16x64xf32>
    %c0_106 = arith.constant 0 : index
    %c0_107 = arith.constant 0 : index
    %83 = vector.load %arg18[%c0_106, %c0_107] : memref<64x64xf32, #tpu.memory_space<vmem>>, vector<16x64xf32>
    tpu.vector_store %arg18[%c0_106, %c0_107], %82 {strides = array<i32>} : memref<64x64xf32, #tpu.memory_space<vmem>>, vector<16x64xf32>,
    %c0_108 = arith.constant 0 : index
    %c0_109 = arith.constant 0 : index
    %84 = tpu.strided_load %arg18[%c0_108, %c0_109] {strides = array<i32: 2, 1>} : memref<64x64xf32, #tpu.memory_space<vmem>>, vector<8x64xf32>
    %c1_110 = arith.constant 1 : index
    %c0_111 = arith.constant 0 : index
    %85 = tpu.strided_load %arg18[%c1_110, %c0_111] {strides = array<i32: 2, 1>} : memref<64x64xf32, #tpu.memory_space<vmem>>, vector<8x64xf32>
    %86 = arith.maximumf %84, %85 : vector<8x64xf32>
    %c0_112 = arith.constant 0 : index
    %c0_113 = arith.constant 0 : index
    %87 = vector.load %arg7[%c0_112, %c0_113] : memref<1x64xf32, #tpu.memory_space<vmem>>, vector<1x64xf32>
    %88 = vector.broadcast %87 : vector<1x64xf32> to vector<8x64xf32>
    %89 = arith.addf %86, %88 : vector<8x64xf32>
    %cst_114 = arith.constant 0.000000e+00 : f32
    %90 = vector.broadcast %cst_114 : f32 to vector<8x64xf32>
    %91 = arith.maximumf %89, %90 : vector<8x64xf32>
    %cst_115 = arith.constant dense<0.000000e+00> : vector<64xf32>
    %92 = vector.multi_reduction <add>, %91, %cst_115 [0] : vector<8x64xf32> to vector<64xf32>
    %93 = vector.shape_cast %92 : vector<64xf32> to vector<1x64xf32>
    %cst_116 = arith.constant 8.000000e+00 : f32
    %94 = vector.broadcast %cst_116 : f32 to vector<1x64xf32>
    %95 = arith.divf %93, %94 : vector<1x64xf32>
    %96 = vector.broadcast %95 : vector<1x64xf32> to vector<8x64xf32>
    %97 = arith.addf %96, %91 : vector<8x64xf32>
    %cst_117 = arith.constant 0.000000e+00 : f32
    %98 = vector.broadcast %cst_117 : f32 to vector<8x64xf32>
    %99 = arith.maximumf %97, %98 : vector<8x64xf32>
    %cst_118 = arith.constant 0.000000e+00 : f32
    %100 = vector.broadcast %cst_118 : f32 to vector<80x64xf32>
    %c0_119 = arith.constant 0 : index
    %c0_120 = arith.constant 0 : index
    %101 = vector.load %arg16[%c0_119, %c0_120] : memref<80x64xf32, #tpu.memory_space<vmem>>, vector<80x64xf32>
    tpu.vector_store %arg16[%c0_119, %c0_120], %100 {strides = array<i32>} : memref<80x64xf32, #tpu.memory_space<vmem>>, vector<80x64xf32>,
    %c8_121 = arith.constant 8 : index
    %c0_122 = arith.constant 0 : index
    %102 = vector.load %arg16[%c8_121, %c0_122] : memref<80x64xf32, #tpu.memory_space<vmem>>, vector<8x64xf32>
    tpu.vector_store %arg16[%c8_121, %c0_122], %99 {strides = array<i32>} : memref<80x64xf32, #tpu.memory_space<vmem>>, vector<8x64xf32>,
    %c7_123 = arith.constant 7 : index
    %c0_124 = arith.constant 0 : index
    %103 = vector.load %arg16[%c7_123, %c0_124] : memref<80x64xf32, #tpu.memory_space<vmem>>, vector<8x64xf32>
    %c0_125 = arith.constant 0 : index
    %c0_126 = arith.constant 0 : index
    %104 = vector.load %arg17[%c0_125, %c0_126] : memref<64x320xf32, #tpu.memory_space<vmem>>, vector<8x64xf32>
    tpu.vector_store %arg17[%c0_125, %c0_126], %103 {strides = array<i32>} : memref<64x320xf32, #tpu.memory_space<vmem>>, vector<8x64xf32>,
    %c8_127 = arith.constant 8 : index
    %c0_128 = arith.constant 0 : index
    %105 = vector.load %arg16[%c8_127, %c0_128] : memref<80x64xf32, #tpu.memory_space<vmem>>, vector<8x64xf32>
    %c0_129 = arith.constant 0 : index
    %c64_130 = arith.constant 64 : index
    %106 = vector.load %arg17[%c0_129, %c64_130] : memref<64x320xf32, #tpu.memory_space<vmem>>, vector<8x64xf32>
    tpu.vector_store %arg17[%c0_129, %c64_130], %105 {strides = array<i32>} : memref<64x320xf32, #tpu.memory_space<vmem>>, vector<8x64xf32>,
    %c9_131 = arith.constant 9 : index
    %c0_132 = arith.constant 0 : index
    %107 = vector.load %arg16[%c9_131, %c0_132] : memref<80x64xf32, #tpu.memory_space<vmem>>, vector<8x64xf32>
    %c0_133 = arith.constant 0 : index
    %c128_134 = arith.constant 128 : index
    %108 = vector.load %arg17[%c0_133, %c128_134] : memref<64x320xf32, #tpu.memory_space<vmem>>, vector<8x64xf32>
    tpu.vector_store %arg17[%c0_133, %c128_134], %107 {strides = array<i32>} : memref<64x320xf32, #tpu.memory_space<vmem>>, vector<8x64xf32>,
    %c0_135 = arith.constant 0 : index
    %c0_136 = arith.constant 0 : index
    %109 = vector.load %arg17[%c0_135, %c0_136] : memref<64x320xf32, #tpu.memory_space<vmem>>, vector<8x192xf32>
    %110 = arith.truncf %109 : vector<8x192xf32> to vector<8x192xbf16>
    %c0_137 = arith.constant 0 : index
    %c0_138 = arith.constant 0 : index
    %111 = vector.load %arg8[%c0_137, %c0_138] : memref<192x64xbf16, #tpu.memory_space<vmem>>, vector<192x64xbf16>
    %cst_139 = arith.constant dense<0.000000e+00> : vector<8x64xf32>
    %112 = tpu.matmul %110, %111, %cst_139 {dimension_numbers = #tpu.dot_dimension_numbers<[1], [0], [0], [1], [0, 0, 1, 1], [], []>} : vector<8x192xbf16>, vector<192x64xbf16>, vector<8x64xf32> -> vector<8x64xf32>
    %c0_140 = arith.constant 0 : index
    %c0_141 = arith.constant 0 : index
    %113 = vector.load %arg12[%c0_140, %c0_141] : memref<16x8xf32, #tpu.memory_space<vmem>>, vector<16x8xf32>
    %cst_142 = arith.constant dense<0.000000e+00> : vector<16x64xf32>
    %114 = tpu.matmul %113, %112, %cst_142 {dimension_numbers = #tpu.dot_dimension_numbers<[1], [0], [0], [1], [0, 0, 1, 1], [], []>} : vector<16x8xf32>, vector<8x64xf32>, vector<16x64xf32> -> vector<16x64xf32>
    %115 = arith.addf %114, %69 : vector<16x64xf32>
    %cst_143 = arith.constant 0.000000e+00 : f32
    %116 = vector.broadcast %cst_143 : f32 to vector<16x64xf32>
    %117 = arith.maximumf %115, %116 : vector<16x64xf32>
    %cst_144 = arith.constant 0.000000e+00 : f32
    %118 = vector.broadcast %cst_144 : f32 to vector<80x64xf32>
    %c0_145 = arith.constant 0 : index
    %c0_146 = arith.constant 0 : index
    %119 = vector.load %arg16[%c0_145, %c0_146] : memref<80x64xf32, #tpu.memory_space<vmem>>, vector<80x64xf32>
    tpu.vector_store %arg16[%c0_145, %c0_146], %118 {strides = array<i32>} : memref<80x64xf32, #tpu.memory_space<vmem>>, vector<80x64xf32>,
    %c8_147 = arith.constant 8 : index
    %c0_148 = arith.constant 0 : index
    %120 = vector.load %arg16[%c8_147, %c0_148] : memref<80x64xf32, #tpu.memory_space<vmem>>, vector<16x64xf32>
    tpu.vector_store %arg16[%c8_147, %c0_148], %117 {strides = array<i32>} : memref<80x64xf32, #tpu.memory_space<vmem>>, vector<16x64xf32>,
    %c7_149 = arith.constant 7 : index
    %c0_150 = arith.constant 0 : index
    %121 = vector.load %arg16[%c7_149, %c0_150] : memref<80x64xf32, #tpu.memory_space<vmem>>, vector<16x64xf32>
    %c0_151 = arith.constant 0 : index
    %c0_152 = arith.constant 0 : index
    %122 = vector.load %arg17[%c0_151, %c0_152] : memref<64x320xf32, #tpu.memory_space<vmem>>, vector<16x64xf32>
    tpu.vector_store %arg17[%c0_151, %c0_152], %121 {strides = array<i32>} : memref<64x320xf32, #tpu.memory_space<vmem>>, vector<16x64xf32>,
    %c8_153 = arith.constant 8 : index
    %c0_154 = arith.constant 0 : index
    %123 = vector.load %arg16[%c8_153, %c0_154] : memref<80x64xf32, #tpu.memory_space<vmem>>, vector<16x64xf32>
    %c0_155 = arith.constant 0 : index
    %c64_156 = arith.constant 64 : index
    %124 = vector.load %arg17[%c0_155, %c64_156] : memref<64x320xf32, #tpu.memory_space<vmem>>, vector<16x64xf32>
    tpu.vector_store %arg17[%c0_155, %c64_156], %123 {strides = array<i32>} : memref<64x320xf32, #tpu.memory_space<vmem>>, vector<16x64xf32>,
    %c9_157 = arith.constant 9 : index
    %c0_158 = arith.constant 0 : index
    %125 = vector.load %arg16[%c9_157, %c0_158] : memref<80x64xf32, #tpu.memory_space<vmem>>, vector<16x64xf32>
    %c0_159 = arith.constant 0 : index
    %c128_160 = arith.constant 128 : index
    %126 = vector.load %arg17[%c0_159, %c128_160] : memref<64x320xf32, #tpu.memory_space<vmem>>, vector<16x64xf32>
    tpu.vector_store %arg17[%c0_159, %c128_160], %125 {strides = array<i32>} : memref<64x320xf32, #tpu.memory_space<vmem>>, vector<16x64xf32>,
    %c0_161 = arith.constant 0 : index
    %c0_162 = arith.constant 0 : index
    %127 = vector.load %arg17[%c0_161, %c0_162] : memref<64x320xf32, #tpu.memory_space<vmem>>, vector<16x192xf32>
    %128 = arith.truncf %127 : vector<16x192xf32> to vector<16x192xbf16>
    %c0_163 = arith.constant 0 : index
    %c0_164 = arith.constant 0 : index
    %129 = vector.load %arg9[%c0_163, %c0_164] : memref<192x64xbf16, #tpu.memory_space<vmem>>, vector<192x64xbf16>
    %cst_165 = arith.constant dense<0.000000e+00> : vector<16x64xf32>
    %130 = tpu.matmul %128, %129, %cst_165 {dimension_numbers = #tpu.dot_dimension_numbers<[1], [0], [0], [1], [0, 0, 1, 1], [], []>} : vector<16x192xbf16>, vector<192x64xbf16>, vector<16x64xf32> -> vector<16x64xf32>
    %c0_166 = arith.constant 0 : index
    %c0_167 = arith.constant 0 : index
    %131 = vector.load %arg13[%c0_166, %c0_167] : memref<32x16xf32, #tpu.memory_space<vmem>>, vector<32x16xf32>
    %cst_168 = arith.constant dense<0.000000e+00> : vector<32x64xf32>
    %132 = tpu.matmul %131, %130, %cst_168 {dimension_numbers = #tpu.dot_dimension_numbers<[1], [0], [0], [1], [0, 0, 1, 1], [], []>} : vector<32x16xf32>, vector<16x64xf32>, vector<32x64xf32> -> vector<32x64xf32>
    %133 = arith.addf %132, %43 : vector<32x64xf32>
    %cst_169 = arith.constant 0.000000e+00 : f32
    %134 = vector.broadcast %cst_169 : f32 to vector<32x64xf32>
    %135 = arith.maximumf %133, %134 : vector<32x64xf32>
    %cst_170 = arith.constant 0.000000e+00 : f32
    %136 = vector.broadcast %cst_170 : f32 to vector<80x64xf32>
    %c0_171 = arith.constant 0 : index
    %c0_172 = arith.constant 0 : index
    %137 = vector.load %arg16[%c0_171, %c0_172] : memref<80x64xf32, #tpu.memory_space<vmem>>, vector<80x64xf32>
    tpu.vector_store %arg16[%c0_171, %c0_172], %136 {strides = array<i32>} : memref<80x64xf32, #tpu.memory_space<vmem>>, vector<80x64xf32>,
    %c8_173 = arith.constant 8 : index
    %c0_174 = arith.constant 0 : index
    %138 = vector.load %arg16[%c8_173, %c0_174] : memref<80x64xf32, #tpu.memory_space<vmem>>, vector<32x64xf32>
    tpu.vector_store %arg16[%c8_173, %c0_174], %135 {strides = array<i32>} : memref<80x64xf32, #tpu.memory_space<vmem>>, vector<32x64xf32>,
    %c7_175 = arith.constant 7 : index
    %c0_176 = arith.constant 0 : index
    %139 = vector.load %arg16[%c7_175, %c0_176] : memref<80x64xf32, #tpu.memory_space<vmem>>, vector<32x64xf32>
    %c0_177 = arith.constant 0 : index
    %c0_178 = arith.constant 0 : index
    %140 = vector.load %arg17[%c0_177, %c0_178] : memref<64x320xf32, #tpu.memory_space<vmem>>, vector<32x64xf32>
    tpu.vector_store %arg17[%c0_177, %c0_178], %139 {strides = array<i32>} : memref<64x320xf32, #tpu.memory_space<vmem>>, vector<32x64xf32>,
    %c8_179 = arith.constant 8 : index
    %c0_180 = arith.constant 0 : index
    %141 = vector.load %arg16[%c8_179, %c0_180] : memref<80x64xf32, #tpu.memory_space<vmem>>, vector<32x64xf32>
    %c0_181 = arith.constant 0 : index
    %c64_182 = arith.constant 64 : index
    %142 = vector.load %arg17[%c0_181, %c64_182] : memref<64x320xf32, #tpu.memory_space<vmem>>, vector<32x64xf32>
    tpu.vector_store %arg17[%c0_181, %c64_182], %141 {strides = array<i32>} : memref<64x320xf32, #tpu.memory_space<vmem>>, vector<32x64xf32>,
    %c9_183 = arith.constant 9 : index
    %c0_184 = arith.constant 0 : index
    %143 = vector.load %arg16[%c9_183, %c0_184] : memref<80x64xf32, #tpu.memory_space<vmem>>, vector<32x64xf32>
    %c0_185 = arith.constant 0 : index
    %c128_186 = arith.constant 128 : index
    %144 = vector.load %arg17[%c0_185, %c128_186] : memref<64x320xf32, #tpu.memory_space<vmem>>, vector<32x64xf32>
    tpu.vector_store %arg17[%c0_185, %c128_186], %143 {strides = array<i32>} : memref<64x320xf32, #tpu.memory_space<vmem>>, vector<32x64xf32>,
    %c0_187 = arith.constant 0 : index
    %c0_188 = arith.constant 0 : index
    %145 = vector.load %arg17[%c0_187, %c0_188] : memref<64x320xf32, #tpu.memory_space<vmem>>, vector<32x192xf32>
    %146 = arith.truncf %145 : vector<32x192xf32> to vector<32x192xbf16>
    %c0_189 = arith.constant 0 : index
    %c0_190 = arith.constant 0 : index
    %147 = vector.load %arg10[%c0_189, %c0_190] : memref<192x4xbf16, #tpu.memory_space<vmem>>, vector<192x4xbf16>
    %cst_191 = arith.constant dense<0.000000e+00> : vector<32x4xf32>
    %148 = tpu.matmul %146, %147, %cst_191 {dimension_numbers = #tpu.dot_dimension_numbers<[1], [0], [0], [1], [0, 0, 1, 1], [], []>} : vector<32x192xbf16>, vector<192x4xbf16>, vector<32x4xf32> -> vector<32x4xf32>
    %c0_192 = arith.constant 0 : index
    %c0_193 = arith.constant 0 : index
    %149 = vector.load %arg14[%c0_192, %c0_193] : memref<64x32xf32, #tpu.memory_space<vmem>>, vector<64x32xf32>
    %cst_194 = arith.constant dense<0.000000e+00> : vector<64x4xf32>
    %150 = tpu.matmul %149, %148, %cst_194 {dimension_numbers = #tpu.dot_dimension_numbers<[1], [0], [0], [1], [0, 0, 1, 1], [], []>} : vector<64x32xf32>, vector<32x4xf32>, vector<64x4xf32> -> vector<64x4xf32>
    %151 = arith.addf %150, %1 : vector<64x4xf32>
    %cst_195 = arith.constant 0.000000e+00 : f32
    %152 = vector.broadcast %cst_195 : f32 to vector<64x4xf32>
    %153 = arith.maximumf %151, %152 : vector<64x4xf32>
    %cst_196 = arith.constant 0.000000e+00 : f32
    %154 = vector.broadcast %cst_196 : f32 to vector<80x64xf32>
    %c0_197 = arith.constant 0 : index
    %c0_198 = arith.constant 0 : index
    %155 = vector.load %arg16[%c0_197, %c0_198] : memref<80x64xf32, #tpu.memory_space<vmem>>, vector<80x64xf32>
    tpu.vector_store %arg16[%c0_197, %c0_198], %154 {strides = array<i32>} : memref<80x64xf32, #tpu.memory_space<vmem>>, vector<80x64xf32>,
    %c8_199 = arith.constant 8 : index
    %c0_200 = arith.constant 0 : index
    %156 = vector.load %arg16[%c8_199, %c0_200] : memref<80x64xf32, #tpu.memory_space<vmem>>, vector<64x4xf32>
    tpu.vector_store %arg16[%c8_199, %c0_200], %153 {strides = array<i32>} : memref<80x64xf32, #tpu.memory_space<vmem>>, vector<64x4xf32>,
    %c7_201 = arith.constant 7 : index
    %c0_202 = arith.constant 0 : index
    %157 = vector.load %arg16[%c7_201, %c0_202] : memref<80x64xf32, #tpu.memory_space<vmem>>, vector<64x4xf32>
    %c0_203 = arith.constant 0 : index
    %c0_204 = arith.constant 0 : index
    %158 = vector.load %arg17[%c0_203, %c0_204] : memref<64x320xf32, #tpu.memory_space<vmem>>, vector<64x4xf32>
    tpu.vector_store %arg17[%c0_203, %c0_204], %157 {strides = array<i32>} : memref<64x320xf32, #tpu.memory_space<vmem>>, vector<64x4xf32>,
    %c8_205 = arith.constant 8 : index
    %c0_206 = arith.constant 0 : index
    %159 = vector.load %arg16[%c8_205, %c0_206] : memref<80x64xf32, #tpu.memory_space<vmem>>, vector<64x4xf32>
    %c0_207 = arith.constant 0 : index
    %c4_208 = arith.constant 4 : index
    %160 = vector.load %arg17[%c0_207, %c4_208] : memref<64x320xf32, #tpu.memory_space<vmem>>, vector<64x4xf32>
    tpu.vector_store %arg17[%c0_207, %c4_208], %159 {strides = array<i32>} : memref<64x320xf32, #tpu.memory_space<vmem>>, vector<64x4xf32>,
    %c9_209 = arith.constant 9 : index
    %c0_210 = arith.constant 0 : index
    %161 = vector.load %arg16[%c9_209, %c0_210] : memref<80x64xf32, #tpu.memory_space<vmem>>, vector<64x4xf32>
    %c0_211 = arith.constant 0 : index
    %c8_212 = arith.constant 8 : index
    %162 = vector.load %arg17[%c0_211, %c8_212] : memref<64x320xf32, #tpu.memory_space<vmem>>, vector<64x4xf32>
    tpu.vector_store %arg17[%c0_211, %c8_212], %161 {strides = array<i32>} : memref<64x320xf32, #tpu.memory_space<vmem>>, vector<64x4xf32>,
    %c0_213 = arith.constant 0 : index
    %c0_214 = arith.constant 0 : index
    %163 = vector.load %arg17[%c0_213, %c0_214] : memref<64x320xf32, #tpu.memory_space<vmem>>, vector<64x12xf32>
    %c0_215 = arith.constant 0 : index
    %c0_216 = arith.constant 0 : index
    %164 = vector.load %arg11[%c0_215, %c0_216] : memref<1x12xf32, #tpu.memory_space<vmem>>, vector<1x12xf32>
    %165 = vector.broadcast %164 : vector<1x12xf32> to vector<64x12xf32>
    %166 = arith.mulf %163, %165 : vector<64x12xf32>
    %cst_217 = arith.constant dense<0.000000e+00> : vector<64xf32>
    %167 = vector.multi_reduction <add>, %166, %cst_217 [1] : vector<64x12xf32> to vector<64xf32>
    %168 = vector.shape_cast %167 : vector<64xf32> to vector<64x1xf32>
    %cst_218 = arith.constant 0.000000e+00 : f32
    %169 = vector.broadcast %cst_218 : f32 to vector<64x1xf32>
    %170 = arith.subf %169, %168 : vector<64x1xf32>
    %171 = math.exp %170 : vector<64x1xf32>
    %cst_219 = arith.constant 1.000000e+00 : f32
    %172 = vector.broadcast %cst_219 : f32 to vector<64x1xf32>
    %173 = arith.addf %172, %171 : vector<64x1xf32>
    %cst_220 = arith.constant 1.000000e+00 : f32
    %174 = vector.broadcast %cst_220 : f32 to vector<64x1xf32>
    %175 = arith.divf %174, %173 : vector<64x1xf32>
    %c0_221 = arith.constant 0 : index
    %c0_222 = arith.constant 0 : index
    %c0_223 = arith.constant 0 : index
    %176 = vector.load %arg15[%c0_221, %c0_222, %c0_223] : memref<1x64x1xf32, #tpu.memory_space<vmem>>, vector<1x64x1xf32>
    %177 = vector.shape_cast %176 : vector<1x64x1xf32> to vector<64x1xf32>
    %178 = vector.shape_cast %175 : vector<64x1xf32> to vector<1x64x1xf32>
    tpu.vector_store %arg15[%c0_221, %c0_222, %c0_223], %178 {strides = array<i32>} : memref<1x64x1xf32, #tpu.memory_space<vmem>>, vector<1x64x1xf32>,
    return
  }
  func.func @transform_0(%arg0: i32) -> (i32, i32, i32) {
    %c0_i32 = arith.constant 0 : i32
    %c0_i32_0 = arith.constant 0 : i32
    %c0_i32_1 = arith.constant 0 : i32
    return %arg0, %c0_i32, %c0_i32_0 : i32, i32, i32
  }
  func.func @transform_1(%arg0: i32) -> (i32, i32) {
    %c0_i32 = arith.constant 0 : i32
    %c0_i32_0 = arith.constant 0 : i32
    %c0_i32_1 = arith.constant 0 : i32
    return %c0_i32, %c0_i32_0 : i32, i32
  }
  func.func @transform_2(%arg0: i32) -> (i32, i32) {
    %c0_i32 = arith.constant 0 : i32
    %c0_i32_0 = arith.constant 0 : i32
    %c0_i32_1 = arith.constant 0 : i32
    return %c0_i32, %c0_i32_0 : i32, i32
  }
  func.func @transform_3(%arg0: i32) -> (i32, i32) {
    %c0_i32 = arith.constant 0 : i32
    %c0_i32_0 = arith.constant 0 : i32
    %c0_i32_1 = arith.constant 0 : i32
    return %c0_i32, %c0_i32_0 : i32, i32
  }
  func.func @transform_4(%arg0: i32) -> (i32, i32) {
    %c0_i32 = arith.constant 0 : i32
    %c0_i32_0 = arith.constant 0 : i32
    %c0_i32_1 = arith.constant 0 : i32
    return %c0_i32, %c0_i32_0 : i32, i32
  }
  func.func @transform_5(%arg0: i32) -> (i32, i32) {
    %c0_i32 = arith.constant 0 : i32
    %c0_i32_0 = arith.constant 0 : i32
    %c0_i32_1 = arith.constant 0 : i32
    return %c0_i32, %c0_i32_0 : i32, i32
  }
  func.func @transform_6(%arg0: i32) -> (i32, i32) {
    %c0_i32 = arith.constant 0 : i32
    %c0_i32_0 = arith.constant 0 : i32
    %c0_i32_1 = arith.constant 0 : i32
    return %c0_i32, %c0_i32_0 : i32, i32
  }
  func.func @transform_7(%arg0: i32) -> (i32, i32) {
    %c0_i32 = arith.constant 0 : i32
    %c0_i32_0 = arith.constant 0 : i32
    %c0_i32_1 = arith.constant 0 : i32
    return %c0_i32, %c0_i32_0 : i32, i32
  }
  func.func @transform_8(%arg0: i32) -> (i32, i32) {
    %c0_i32 = arith.constant 0 : i32
    %c0_i32_0 = arith.constant 0 : i32
    %c0_i32_1 = arith.constant 0 : i32
    return %c0_i32, %c0_i32_0 : i32, i32
  }
  func.func @transform_9(%arg0: i32) -> (i32, i32) {
    %c0_i32 = arith.constant 0 : i32
    %c0_i32_0 = arith.constant 0 : i32
    %c0_i32_1 = arith.constant 0 : i32
    return %c0_i32, %c0_i32_0 : i32, i32
  }
  func.func @transform_10(%arg0: i32) -> (i32, i32) {
    %c0_i32 = arith.constant 0 : i32
    %c0_i32_0 = arith.constant 0 : i32
    %c0_i32_1 = arith.constant 0 : i32
    return %c0_i32, %c0_i32_0 : i32, i32
  }
  func.func @transform_11(%arg0: i32) -> (i32, i32) {
    %c0_i32 = arith.constant 0 : i32
    %c0_i32_0 = arith.constant 0 : i32
    %c0_i32_1 = arith.constant 0 : i32
    return %c0_i32, %c0_i32_0 : i32, i32
  }
  func.func @transform_12(%arg0: i32) -> (i32, i32) {
    %c0_i32 = arith.constant 0 : i32
    %c0_i32_0 = arith.constant 0 : i32
    %c0_i32_1 = arith.constant 0 : i32
    return %c0_i32, %c0_i32_0 : i32, i32
  }
  func.func @transform_13(%arg0: i32) -> (i32, i32) {
    %c0_i32 = arith.constant 0 : i32
    %c0_i32_0 = arith.constant 0 : i32
    %c0_i32_1 = arith.constant 0 : i32
    return %c0_i32, %c0_i32_0 : i32, i32
  }
  func.func @transform_14(%arg0: i32) -> (i32, i32, i32) {
    %c0_i32 = arith.constant 0 : i32
    %c0_i32_0 = arith.constant 0 : i32
    %c0_i32_1 = arith.constant 0 : i32
    return %arg0, %c0_i32, %c0_i32_0 : i32, i32, i32
  }
}

</mosaic_0001>

<bundles_post_ra>
// kernel: fcnar_forward.1
= control target key start
LH: loop header
LB: loop body
LE: loop exit
PB: predicated region body
PF: predicated region fallthrough
CT: control target
= control target key end

     0   :  { %s3511_s29 = smov 0   ;;  %s4684_s0 = inlined_call_operand.vmem [shape: f32[2,64,4], index: 0, kind: input, shape index: {}]   ;;  %s4685_s1 = inlined_call_operand.vmem [shape: bf16[52,64], index: 1, kind: input, shape index: {}]   ;;  %s4686_s2 = inlined_call_operand.vmem [shape: f32[1,64], index: 2, kind: input, shape index: {}]   ;;  %s4687_s3 = inlined_call_operand.vmem [shape: bf16[320,64], index: 3, kind: input, shape index: {}]   ;;  %s4688_s4 = inlined_call_operand.vmem [shape: f32[1,64], index: 4, kind: input, shape index: {}]   ;;  %s4689_s5 = inlined_call_operand.vmem [shape: bf16[192,64], index: 5, kind: input, shape index: {}]   ;;  %s4690_s6 = inlined_call_operand.vmem [shape: f32[1,64], index: 6, kind: input, shape index: {}]   ;;  %s4691_s7 = inlined_call_operand.vmem [shape: bf16[192,64], index: 7, kind: input, shape index: {}]   ;;  %s4692_s8 = inlined_call_operand.vmem [shape: bf16[192,64], index: 8, kind: input, shape index: {}]   ;;  %s4693_s9 = inlined_call_operand.vmem [shape: bf16[192,4], index: 9, kind: input, shape index: {}]   ;;  %s4694_s10 = inlined_call_operand.vmem [shape: f32[1,12], index: 10, kind: input, shape index: {}]   ;;  %s4695_s11 = inlined_call_operand.vmem [shape: f32[16,8], index: 11, kind: input, shape index: {}]   ;;  %s4696_s12 = inlined_call_operand.vmem [shape: f32[32,16], index: 12, kind: input, shape index: {}]   ;;  %s4697_s13 = inlined_call_operand.vmem [shape: f32[64,32], index: 13, kind: input, shape index: {}]   ;;  %s4698_s14 = inlined_call_operand.vmem [shape: f32[2,64,1], index: 14, kind: output, shape index: {}]  }
   0x1 LB: > { %s3045_s30 = sadd.s32 4294967295, %s3419_s29   ;;  %p3049_p0 = scmp.ge.s32.totalorder %s3419_s29, 1  ;;  %s3419_s29 = sphi %s3511_s29, %s24_s29  }
   0x2   : > { %p412_p1 = scmp.lt.s32.totalorder %s3419_s29, 3 }
   0x4   : > { %p413_p2 = pnand %p3049_p0, %p412_p1 }
   0x5   : > { %p458_p3 = scmp.lt.s32.totalorder (!%p413_p2), %s3045_s30, 1  ;;  %s4702_s19 = smov (!%p413_p2), 4  }
   0x6   : > { %416 = sbr.rel (%p413_p2) target bundleno = 3217 (0xc91), region = 76  ;;  %s4700_s20 = smov (!%p413_p2), 8  }
   0x7   : > { %s3424_s21 = smov (!%p413_p2), 12   ;;  %s3425_s22 = smov (!%p413_p2), 16  }
   0x8   : > { %s3426_s23 = smov (!%p413_p2), 20   ;;  %s3427_s24 = smov (!%p413_p2), 24  }
   0x9   : > { %s3428_s25 = smov (!%p413_p2), 28   ;;  %s3429_s26 = smov (!%p413_p2), 32  }
   0xa   : > { %s3430_s27 = smov (!%p413_p2), 36   ;;  %s3431_s28 = smov (!%p413_p2), 40  }
   0xb   : > { %vm477_vm0 = vcmask 523264   ;;  %v3421_v0 = vmov 0.0   ;;  %s4708_s30 = smov (!%p458_p3, %s3045_s30), 1  ;;  %vm488_vm1 = vcmask 31744   ;;  %s3432_s16 = smov 44   ;;  %vm553_vm2 = vcmask 64544  }
   0xc   : > { %478 = vst.msk [vmem:[#allocation2] sm:$0xff] %vm477_vm0, %v3421_v0  ;;  %479 = vst.msk [vmem:[#allocation2 + $0x8] sm:$0xff] %vm477_vm0, %v3421_v0  ;;  %s4699_s15 = sshll.u32 %s4708_s30, 6  ;;  %vm1154_vm3 = vcmask 1041408   ;;  %vm602_vm4 = vcmask 97344   ;;  %vm651_vm5 = vcmask 130144  }
   0xd   : > { %480 = vst.msk [vmem:[#allocation2 + $0x10] sm:$0xff] %vm477_vm0, %v3421_v0  ;;  %481 = vst.msk [vmem:[#allocation2 + $0x18] sm:$0xff] %vm477_vm0, %v3421_v0  ;;  %s3547_s18 = scalar_lea.vmem %s4684_s0, %s4699_s15  ;;  %vm700_vm6 = vcmask 162944   ;;  %vm749_vm7 = vcmask 195744   ;;  %vm798_vm8 = vcmask 228544   ;;  %vm847_vm9 = vcmask 261344  }
   0xe   : > { %482 = vst.msk [vmem:[#allocation2 + $0x20] sm:$0xff] %vm477_vm0, %v3421_v0  ;;  %483 = vst.msk [vmem:[#allocation2 + $0x28] sm:$0xff] %vm477_vm0, %v3421_v0  ;;  %v3550_v1 = vld [vmem:[%s3547_s18 + $0x8] sm:$0xff]  ;;  %v3553_v2 = vld [vmem:[%s3547_s18 + $0x18] sm:$0xff]  ;;  %vm896_vm10 = vcmask 294144   ;;  %vm945_vm11 = vcmask 326944  }
   0xf   : > { %484 = vst.msk [vmem:[#allocation2 + $0x30] sm:$0xff] %vm477_vm0, %v3421_v0  ;;  %485 = vst.msk [vmem:[#allocation2 + $0x38] sm:$0xff] %vm477_vm0, %v3421_v0  ;;  %v3556_v3 = vld [vmem:[%s3547_s18 + $0x28] sm:$0xff]  ;;  %v3565_v4 = vld [vmem:[%s3547_s18 + $0x38] sm:$0xff]  ;;  %vm994_vm12 = vcmask 359744   ;;  %vm1043_vm13 = vcmask 392544  }
  0x10   : > { %486 = vst.msk [vmem:[#allocation2 + $0x40] sm:$0xff] %vm477_vm0, %v3421_v0  ;;  %487 = vst.msk [vmem:[#allocation2 + $0x48] sm:$0xff] %vm477_vm0, %v3421_v0  ;;  %vm1092_vm14 = vcmask 425344   ;;  %vm1141_vm15 = vcmask 424960  }
  0x11   : > { %490 = vst.msk [vmem:[#allocation2 + $0x10] sm:$0xff] %vm488_vm1, %v3550_v1  ;;  %492 = vst.msk [vmem:[#allocation2 + $0x20] sm:$0xff] %vm488_vm1, %v3553_v2 }
  0x12   : > { %494 = vst.msk [vmem:[#allocation2 + $0x30] sm:$0xff] %vm488_vm1, %v3556_v3  ;;  %496 = vst.msk [vmem:[#allocation2 + $0x40] sm:$0xff] %vm488_vm1, %v3565_v4 }
  0x13   : > { %v513_v5 = vld [vmem:[#allocation2 + $0x3] sm:$0xff] }
  0x14   : > { %v562_v6 = vld [vmem:[#allocation2 + $0x4] sm:$0xff]  ;;  %529 = vrot.lane.b32.xlu0 %v513_v5, %s4702_s19  ;;  %v3622_v29 = vld [vmem:[#allocation2 + $0x18] sm:$0xff] }
  0x15   : > { %v611_v7 = vld [vmem:[#allocation2 + $0x5] sm:$0xff] }
  0x16   : > { %v660_v8 = vld [vmem:[#allocation2 + $0x6] sm:$0xff]  ;;  %v3730_v5 = vld [vmem:[#allocation2 + $0x38] sm:$0xff] }
  0x17   : > { %v3570_v9 = vld [vmem:[#allocation2 + $0x7] sm:$0xff] }
  0x18   : > { %v497_v10 = vld [vmem:[#allocation2 + $0x2] sm:$0xff]  ;;  %578 = vrot.lane.b32.xlu0 %v562_v6, %s4700_s20  ;;  %v3576_v11 = vld [vmem:[#allocation2 + $0x13] sm:$0xff]  ;;  %v3578_v12 = vld [vmem:[#allocation2 + $0xb] sm:$0xff] }
  0x19   : > { %505 = vst.msk [vmem:[#allocation3] sm:$0xff] %vm488_vm1, %v497_v10  ;;  %533 = vrot.lane.b32.xlu1 %v3576_v11, %s4702_s19  ;;  %v3582_v13 = vld [vmem:[#allocation2 + $0x1b] sm:$0xff]  ;;  %v3586_v14 = vld [vmem:[#allocation2 + $0xc] sm:$0xff]  ;;  %v3657_v38 = vld [vmem:[#allocation2 + $0x23] sm:$0xff] }
  0x1a   : > { %1265 = vst.msk [vmem:[#allocation2] sm:$0xff] %vm477_vm0, %v3421_v0  ;;  %v3588_v15 = vld [vmem:[#allocation2 + $0x8] sm:$0xff]  ;;  %v3590_v16 = vld [vmem:[#allocation2 + $0x14] sm:$0xff]  ;;  %v3606_v23 = vld [vmem:[#allocation2 + $0x1c] sm:$0xff] }
  0x1b   : > { %v3592_v17 = vld [vmem:[#allocation2 + $0xd] sm:$0xff]  ;;  %v3598_v19 = vld [vmem:[#allocation2 + $0x15] sm:$0xff]  ;;  %v3608_v24 = vld [vmem:[#allocation2 + $0x1d] sm:$0xff] }
  0x1c   : > { %531 = vrot.lane.b32.xlu0 %v3578_v12, %s4702_s19  ;;  %v3594_v18 = vld [vmem:[#allocation2 + $0xe] sm:$0xff]  ;;  %v3610_v25 = vld [vmem:[#allocation2 + $0x1e] sm:$0xff]  ;;  %v3612_v26 = vld [vmem:[#allocation2 + $0x16] sm:$0xff] }
  0x1d   : > { %535 = vrot.lane.b32.xlu1 %v3582_v13, %s4702_s19  ;;  %v3600_v20 = vld [vmem:[#allocation2 + $0xf] sm:$0xff]  ;;  %v3614_v27 = vld [vmem:[#allocation2 + $0x1f] sm:$0xff]  ;;  %v3616_v28 = vld [vmem:[#allocation2 + $0x17] sm:$0xff] }
  0x1e   : > { %v3602_v21 = vld [vmem:[#allocation2 + $0x9] sm:$0xff]  ;;  %v3628_v31 = vld [vmem:[#allocation2 + $0x11] sm:$0xff]  ;;  %v3632_v33 = vld [vmem:[#allocation2 + $0x19] sm:$0xff] }
  0x1f   : > { %v3604_v22 = vld [vmem:[#allocation2 + $0xa] sm:$0xff]  ;;  %v3630_v32 = vld [vmem:[#allocation2 + $0x12] sm:$0xff]  ;;  %v3634_v34 = vld [vmem:[#allocation2 + $0x22] sm:$0xff] }
  0x20   : > { %1266 = vst.msk [vmem:[#allocation2 + $0x8] sm:$0xff] %vm477_vm0, %v3421_v0  ;;  %582 = vrot.lane.b32.xlu0 %v3590_v16, %s4700_s20  ;;  %v3626_v30 = vld [vmem:[#allocation2 + $0x10] sm:$0xff]  ;;  %v3636_v35 = vld [vmem:[#allocation2 + $0x1a] sm:$0xff]  ;;  %v3659_v39 = vld [vmem:[#allocation2 + $0x24] sm:$0xff] }
  0x21   : > { %506 = vst.msk [vmem:[#allocation3 + $0x18] sm:$0xff] %vm488_vm1, %v3604_v22  ;;  %507 = vst.msk [vmem:[#allocation3 + $0x30] sm:$0xff] %vm488_vm1, %v3630_v32  ;;  %580 = vrot.lane.b32.xlu1 %v3586_v14, %s4700_s20  ;;  %v3651_v36 = vld [vmem:[#allocation2 + $0x20] sm:$0xff]  ;;  %v3676_v43 = vld [vmem:[#allocation2 + $0x2b] sm:$0xff] }
  0x22   : > { %1267 = vst.msk [vmem:[#allocation2 + $0x10] sm:$0xff] %vm477_vm0, %v3421_v0  ;;  %1268 = vst.msk [vmem:[#allocation2 + $0x18] sm:$0xff] %vm477_vm0, %v3421_v0  ;;  %v3655_v37 = vld [vmem:[#allocation2 + $0x21] sm:$0xff]  ;;  %v3678_v44 = vld [vmem:[#allocation2 + $0x33] sm:$0xff] }
  0x23   : > { %508 = vst.msk [vmem:[#allocation3 + $0x48] sm:$0xff] %vm488_vm1, %v3636_v35  ;;  %509 = vst.msk [vmem:[#allocation3 + $0x60] sm:$0xff] %vm488_vm1, %v3634_v34  ;;  %v3661_v40 = vld [vmem:[#allocation2 + $0x25] sm:$0xff]  ;;  %v3682_v46 = vld [vmem:[#allocation2 + $0x34] sm:$0xff] }
  0x24   : > { %627 = vrot.lane.b32.xlu0 %v611_v7, %s3424_s21  ;;  %v3663_v41 = vld [vmem:[#allocation2 + $0x26] sm:$0xff]  ;;  %v3686_v48 = vld [vmem:[#allocation2 + $0x35] sm:$0xff]  ;;  %v3724_v61 = vld [vmem:[#allocation2 + $0x3d] sm:$0xff] }
  0x25   : > { %584 = vrot.lane.b32.xlu1 %v3606_v23, %s4700_s20  ;;  %v3665_v42 = vld [vmem:[#allocation2 + $0x27] sm:$0xff]  ;;  %v3690_v50 = vld [vmem:[#allocation2 + $0x36] sm:$0xff]  ;;  %v3726_v62 = vld [vmem:[#allocation2 + $0x3e] sm:$0xff] }
  0x26   : > { %1269 = vst.msk [vmem:[#allocation2 + $0x20] sm:$0xff] %vm477_vm0, %v3421_v0  ;;  %v3680_v45 = vld [vmem:[#allocation2 + $0x2c] sm:$0xff]  ;;  %v3694_v52 = vld [vmem:[#allocation2 + $0x37] sm:$0xff]  ;;  %v3728_v63 = vld [vmem:[#allocation2 + $0x3f] sm:$0xff] }
  0x27   : > { %v3684_v47 = vld [vmem:[#allocation2 + $0x2d] sm:$0xff]  ;;  %v3720_v59 = vld [vmem:[#allocation2 + $0x3b] sm:$0xff] }
  0x28   : > { %631 = vrot.lane.b32.xlu0 %v3598_v19, %s3424_s21  ;;  %v3688_v49 = vld [vmem:[#allocation2 + $0x2e] sm:$0xff]  ;;  %v3722_v60 = vld [vmem:[#allocation2 + $0x3c] sm:$0xff] }
  0x29   : > { %629 = vrot.lane.b32.xlu1 %v3592_v17, %s3424_s21  ;;  %v3692_v51 = vld [vmem:[#allocation2 + $0x2f] sm:$0xff]  ;;  %v3738_v6 = vld [vmem:[#allocation2 + $0x39] sm:$0xff]  ;;  %v3794_v10 = vld [vmem:[#allocation2 + $0x42] sm:$0xff] }
  0x2a   : > { %v3696_v53 = vld [vmem:[#allocation2 + $0x30] sm:$0xff]  ;;  %v3698_v54 = vld [vmem:[#allocation2 + $0x28] sm:$0xff]  ;;  %v3740_v7 = vld [vmem:[#allocation2 + $0x3a] sm:$0xff] }
  0x2b   : > { %v3700_v55 = vld [vmem:[#allocation2 + $0x31] sm:$0xff]  ;;  %v3702_v56 = vld [vmem:[#allocation2 + $0x29] sm:$0xff]  ;;  %512 = vst.msk [vmem:[#allocation3 + $0xa8] sm:$0xff] %vm488_vm1, %v3740_v7 }
  0x2c   : > { %676 = vrot.lane.b32.xlu0 %v660_v8, %s3425_s22  ;;  %v3706_v57 = vld [vmem:[#allocation2 + $0x32] sm:$0xff]  ;;  %v3708_v58 = vld [vmem:[#allocation2 + $0x2a] sm:$0xff]  ;;  %v3790_v8 = vld [vmem:[#allocation2 + $0x40] sm:$0xff] }
  0x2d   : > { %633 = vrot.lane.b32.xlu1 %v3608_v24, %s3424_s21  ;;  %510 = vst.msk [vmem:[#allocation3 + $0x78] sm:$0xff] %vm488_vm1, %v3708_v58  ;;  %511 = vst.msk [vmem:[#allocation3 + $0x90] sm:$0xff] %vm488_vm1, %v3706_v57 }
  0x2e   : > { %1270 = vst.msk [vmem:[#allocation2 + $0x28] sm:$0xff] %vm477_vm0, %v3421_v0  ;;  %1271 = vst.msk [vmem:[#allocation2 + $0x30] sm:$0xff] %vm477_vm0, %v3421_v0 }
  0x2f   : > { %1661 = vst.msk [vmem:[#allocation2 + $0x30] sm:$0xff] %vm477_vm0, %v3421_v0  ;;  %1272 = vst.msk [vmem:[#allocation2 + $0x38] sm:$0xff] %vm477_vm0, %v3421_v0 }
  0x30   : > { %680 = vrot.lane.b32.xlu0 %v3612_v26, %s3425_s22  ;;  %1864 = vst.msk [vmem:[#allocation2 + $0x30] sm:$0xff] %vm477_vm0, %v3421_v0  ;;  %1662 = vst.msk [vmem:[#allocation2 + $0x38] sm:$0xff] %vm477_vm0, %v3421_v0 }
  0x31   : > { %678 = vrot.lane.b32.xlu1 %v3594_v18, %s3425_s22  ;;  %2114 = vst.msk [vmem:[#allocation2 + $0x30] sm:$0xff] %vm477_vm0, %v3421_v0  ;;  %1865 = vst.msk [vmem:[#allocation2 + $0x38] sm:$0xff] %vm477_vm0, %v3421_v0 }
  0x32   : > { %2398 = vst.msk [vmem:[#allocation2 + $0x30] sm:$0xff] %vm477_vm0, %v3421_v0  ;;  %2115 = vst.msk [vmem:[#allocation2 + $0x38] sm:$0xff] %vm477_vm0, %v3421_v0 }
  0x33   : > { %2761 = vst.msk [vmem:[#allocation2 + $0x30] sm:$0xff] %vm477_vm0, %v3421_v0  ;;  %2399 = vst.msk [vmem:[#allocation2 + $0x38] sm:$0xff] %vm477_vm0, %v3421_v0 }
  0x34   : > { %725 = vrot.lane.b32.xlu0 %v3570_v9, %s3426_s23  ;;  %v3792_v9 = vld [vmem:[#allocation2 + $0x41] sm:$0xff] }
  0x35   : > { %682 = vrot.lane.b32.xlu1 %v3610_v25, %s3425_s22 }
  0x38   : > { %729 = vrot.lane.b32.xlu0 %v3616_v28, %s3426_s23 }
  0x39   : > { %727 = vrot.lane.b32.xlu1 %v3600_v20, %s3426_s23  ;;  %v3798_v20 = vld [vmem:[#allocation2 + $0x44] sm:$0xff] }
  0x3c   : > { %774 = vrot.lane.b32.xlu0 %v3588_v15, %s3427_s24  ;;  %v3796_v15 = vld [vmem:[#allocation2 + $0x43] sm:$0xff] }
  0x3d   : > { %731 = vrot.lane.b32.xlu1 %v3614_v27, %s3426_s23 }
  0x40   : > { %778 = vrot.lane.b32.xlu0 %v3622_v29, %s3427_s24 }
  0x41   : > { %776 = vrot.lane.b32.xlu1 %v3626_v30, %s3427_s24 }
  0x44   : > { %823 = vrot.lane.b32.xlu0 %v3602_v21, %s3428_s25  ;;  %v3800_v21 = vld [vmem:[#allocation2 + $0x45] sm:$0xff] }
  0x45   : > { %780 = vrot.lane.b32.xlu1 %v3651_v36, %s3427_s24 }
  0x48   : > { %827 = vrot.lane.b32.xlu0 %v3632_v33, %s3428_s25 }
  0x49   : > { %825 = vrot.lane.b32.xlu1 %v3628_v31, %s3428_s25 }
  0x4c   : > { %872 = vrot.lane.b32.xlu0 %v3604_v22, %s3429_s26  ;;  %v3804_v22 = vld [vmem:[#allocation2 + $0x46] sm:$0xff] }
  0x4d   : > { %829 = vrot.lane.b32.xlu1 %v3655_v37, %s3428_s25  ;;  %1274 = vst.msk [vmem:[#allocation2 + $0x48] sm:$0xff] %vm477_vm0, %v3421_v0  ;;  %1273 = vst.msk [vmem:[#allocation2 + $0x40] sm:$0xff] %vm477_vm0, %v3421_v0 }
  0x4e   : > { %1664 = vst.msk [vmem:[#allocation2 + $0x48] sm:$0xff] %vm477_vm0, %v3421_v0  ;;  %1663 = vst.msk [vmem:[#allocation2 + $0x40] sm:$0xff] %vm477_vm0, %v3421_v0 }
  0x4f   : > { %1867 = vst.msk [vmem:[#allocation2 + $0x48] sm:$0xff] %vm477_vm0, %v3421_v0  ;;  %1866 = vst.msk [vmem:[#allocation2 + $0x40] sm:$0xff] %vm477_vm0, %v3421_v0 }
  0x50   : > { %537 = vrot.lane.b32.xlu0 %v3657_v38, %s4702_s19  ;;  %2116 = vst.msk [vmem:[#allocation2 + $0x40] sm:$0xff] %vm477_vm0, %v3421_v0  ;;  %2117 = vst.msk [vmem:[#allocation2 + $0x48] sm:$0xff] %vm477_vm0, %v3421_v0 }
  0x51   : > { %874 = vrot.lane.b32.xlu1 %v3630_v32, %s3429_s26  ;;  %2400 = vst.msk [vmem:[#allocation2 + $0x40] sm:$0xff] %vm477_vm0, %v3421_v0  ;;  %2401 = vst.msk [vmem:[#allocation2 + $0x48] sm:$0xff] %vm477_vm0, %v3421_v0 }
  0x52   : > { %2763 = vst.msk [vmem:[#allocation2 + $0x40] sm:$0xff] %vm477_vm0, %v3421_v0  ;;  %2764 = vst.msk [vmem:[#allocation2 + $0x48] sm:$0xff] %vm477_vm0, %v3421_v0 }
  0x54   : > { %876 = vrot.lane.b32.xlu0 %v3636_v35, %s3429_s26 }
  0x55   : > { %539 = vrot.lane.b32.xlu1 %v3676_v43, %s4702_s19 }
  0x58   : > { %921 = vrot.lane.b32.xlu0 %v3578_v12, %s3430_s27 }
  0x59   : > { %878 = vrot.lane.b32.xlu1 %v3634_v34, %s3429_s26 }
  0x5c   : > { %541 = vrot.lane.b32.xlu0 %v3678_v44, %s4702_s19 }
  0x5d   : > { %923 = vrot.lane.b32.xlu1 %v3576_v11, %s3430_s27  ;;  %v3309_v11 = vld [vmem:[%s4685_s1 + $0x18] ss:$0 sps:$4 sm:$0x33]  }
  0x5e   : > { %3285 = vmatprep.subr.msk.bf16.mxu0 %vm1154_vm3, %v3309_v11 }
  0x60   : > { %586 = vrot.lane.b32.xlu0 %v3659_v39, %s4700_s20 }
  0x61   : > { %543 = vrot.lane.b32.xlu1 %v3720_v59, %s4702_s19  ;;  %s3434_s19 = smov 64  }
  0x64   : > { %925 = vrot.lane.b32.xlu0 %v3582_v13, %s3430_s27  ;;  %v1156_v13 = vsel %vm1154_vm3, %v3309_v11, 0  ;;  %vm1307_vm3 = vcmask 1048064  }
  0x65   : > { %588 = vrot.lane.b32.xlu1 %v3680_v45, %s4700_s20  ;;  %3223 = vmatpush3.bf16.msra.mxu0 %v1156_v13 }
  0x68   : > { %970 = vrot.lane.b32.xlu0 %v3586_v14, %s3431_s28  ;;  %v3310_v14 = vld [vmem:[%s4685_s1 + $0x10] sm:$0xff]  }
  0x69   : > { %927 = vrot.lane.b32.xlu1 %v3657_v38, %s3430_s27  ;;  %3224 = vmatprep.subr.bf16.mxu0 %v3310_v14 }
  0x6a   : > { %3225 = vmatpush3.bf16.msra.mxu0 %v3310_v14 }
  0x6c   : > { %590 = vrot.lane.b32.xlu0 %v3682_v46, %s4700_s20 }
  0x6d   : > { %972 = vrot.lane.b32.xlu1 %v3590_v16, %s3431_s28 }
  0x70   : > { %635 = vrot.lane.b32.xlu0 %v3661_v40, %s3424_s21 }
  0x71   : > { %592 = vrot.lane.b32.xlu1 %v3722_v60, %s4700_s20  ;;  %s3433_s20 = smov 48  }
  0x74   : > { %974 = vrot.lane.b32.xlu0 %v3606_v23, %s3431_s28 }
  0x75   : > { %637 = vrot.lane.b32.xlu1 %v3684_v47, %s3424_s21 }
  0x78   : > { %1019 = vrot.lane.b32.xlu0 %v3592_v17, %s3432_s16 }
  0x79   : > { %976 = vrot.lane.b32.xlu1 %v3659_v39, %s3431_s28 }
  0x7c   : > { %639 = vrot.lane.b32.xlu0 %v3686_v48, %s3424_s21 }
  0x7d   : > { %1021 = vrot.lane.b32.xlu1 %v3598_v19, %s3432_s16 }
  0x80   : > { %684 = vrot.lane.b32.xlu0 %v3663_v41, %s3425_s22 }
  0x81   : > { %641 = vrot.lane.b32.xlu1 %v3724_v61, %s3424_s21  ;;  %s4705_s21 = smov 8  }
  0x84   : > { %1023 = vrot.lane.b32.xlu0 %v3608_v24, %s3432_s16  ;;  %v3312_v24 = vld [vmem:[%s4685_s1] sm:$0xff]  }
  0x85   : > { %686 = vrot.lane.b32.xlu1 %v3688_v49, %s3425_s22 }
  0x86   : > { %v530_v12 = vpop.permute.xlu0 %529 }
  0x87   : > { %554 = vst.msk [vmem:[#allocation3] sm:$0xff] %vm553_vm2, %v530_v12 }
  0x88   : > { %1068 = vrot.lane.b32.xlu0 %v3594_v18, %s3433_s20  ;;  %v3311_v18 = vld [vmem:[%s4685_s1 + $0x8] sm:$0xff]  }
  0x89   : > { %1025 = vrot.lane.b32.xlu1 %v3661_v40, %s3432_s16  ;;  %3226 = vmatprep.subr.bf16.mxu0 %v3311_v18 }
  0x8a   : > { %v579_v16 = vpop.permute.xlu0 %578  ;;  %3227 = vmatpush3.bf16.msra.mxu0 %v3311_v18 }
  0x8b   : > { %603 = vst.msk [vmem:[#allocation3] sm:$0xff] %vm602_vm4, %v579_v16  ;;  %v534_v17 = vpop.permute.xlu1 %533  ;;  %3228 = vmatprep.subr.bf16.mxu0 %v3312_v24 }
  0x8c   : > { %688 = vrot.lane.b32.xlu0 %v3690_v50, %s3425_s22  ;;  %556 = vst.msk [vmem:[#allocation3 + $0x30] sm:$0xff] %vm553_vm2, %v534_v17 }
  0x8d   : > { %1070 = vrot.lane.b32.xlu1 %v3612_v26, %s3433_s20 }
  0x8e   : > { %v532_v19 = vpop.permute.xlu0 %531  ;;  %3229 = vmatpush3.bf16.msra.mxu0 %v3312_v24 }
  0x8f   : > { %555 = vst.msk [vmem:[#allocation3 + $0x18] sm:$0xff] %vm553_vm2, %v532_v19  ;;  %v536_v23 = vpop.permute.xlu1 %535 }
  0x90   : > { %733 = vrot.lane.b32.xlu0 %v3665_v42, %s3426_s23  ;;  %557 = vst.msk [vmem:[#allocation3 + $0x48] sm:$0xff] %vm553_vm2, %v536_v23 }
  0x91   : > { %690 = vrot.lane.b32.xlu1 %v3726_v62, %s3425_s22 }
  0x92   : > { %v583_v27 = vpop.permute.xlu0 %582 }
  0x93   : > { %605 = vst.msk [vmem:[#allocation3 + $0x30] sm:$0xff] %vm602_vm4, %v583_v27  ;;  %v581_v26 = vpop.permute.xlu1 %580 }
  0x94   : > { %1072 = vrot.lane.b32.xlu0 %v3610_v25, %s3433_s20  ;;  %604 = vst.msk [vmem:[#allocation3 + $0x18] sm:$0xff] %vm602_vm4, %v581_v26 }
  0x95   : > { %735 = vrot.lane.b32.xlu1 %v3692_v51, %s3426_s23 }
  0x96   : > { %v628_v28 = vpop.permute.xlu0 %627 }
  0x97   : > { %652 = vst.msk [vmem:[#allocation3] sm:$0xff] %vm651_vm5, %v628_v28  ;;  %v585_v29 = vpop.permute.xlu1 %584 }
  0x98   : > { %737 = vrot.lane.b32.xlu0 %v3694_v52, %s3426_s23  ;;  %606 = vst.msk [vmem:[#allocation3 + $0x48] sm:$0xff] %vm602_vm4, %v585_v29 }
  0x99   : > { %1074 = vrot.lane.b32.xlu1 %v3663_v41, %s3433_s20 }
  0x9a   : > { %v632_v25 = vpop.permute.xlu0 %631 }
  0x9b   : > { %654 = vst.msk [vmem:[#allocation3 + $0x30] sm:$0xff] %vm651_vm5, %v632_v25  ;;  %v630_v30 = vpop.permute.xlu1 %629 }
  0x9c   : > { %782 = vrot.lane.b32.xlu0 %v3698_v54, %s3427_s24  ;;  %653 = vst.msk [vmem:[#allocation3 + $0x18] sm:$0xff] %vm651_vm5, %v630_v30 }
  0x9d   : > { %739 = vrot.lane.b32.xlu1 %v3728_v63, %s3426_s23  ;;  %s4706_s23 = sshll.u32 %s4708_s30, 6 }
  0x9e   : > { %v677_v31 = vpop.permute.xlu0 %676 }
  0x9f   : > { %701 = vst.msk [vmem:[#allocation3] sm:$0xff] %vm700_vm6, %v677_v31  ;;  %v634_v32 = vpop.permute.xlu1 %633 }
  0xa0   : > { %786 = vrot.lane.b32.xlu0 %v3730_v5, %s3427_s24  ;;  %655 = vst.msk [vmem:[#allocation3 + $0x48] sm:$0xff] %vm651_vm5, %v634_v32 }
  0xa1   : > { %784 = vrot.lane.b32.xlu1 %v3696_v53, %s3427_s24 }
  0xa2   : > { %v681_v33 = vpop.permute.xlu0 %680 }
  0xa3   : > { %703 = vst.msk [vmem:[#allocation3 + $0x30] sm:$0xff] %vm700_vm6, %v681_v33  ;;  %v679_v34 = vpop.permute.xlu1 %678 }
  0xa4   : > { %831 = vrot.lane.b32.xlu0 %v3702_v56, %s3428_s25  ;;  %702 = vst.msk [vmem:[#allocation3 + $0x18] sm:$0xff] %vm700_vm6, %v679_v34 }
  0xa5   : > { %788 = vrot.lane.b32.xlu1 %v3790_v8, %s3427_s24 }
  0xa6   : > { %v726_v35 = vpop.permute.xlu0 %725 }
  0xa7   : > { %750 = vst.msk [vmem:[#allocation3] sm:$0xff] %vm749_vm7, %v726_v35  ;;  %v683_v36 = vpop.permute.xlu1 %682 }
  0xa8   : > { %835 = vrot.lane.b32.xlu0 %v3738_v6, %s3428_s25  ;;  %704 = vst.msk [vmem:[#allocation3 + $0x48] sm:$0xff] %vm700_vm6, %v683_v36 }
  0xa9   : > { %833 = vrot.lane.b32.xlu1 %v3700_v55, %s3428_s25 }
  0xaa   : > { %v730_v37 = vpop.permute.xlu0 %729 }
  0xab   : > { %752 = vst.msk [vmem:[#allocation3 + $0x30] sm:$0xff] %vm749_vm7, %v730_v37  ;;  %v728_v38 = vpop.permute.xlu1 %727 }
  0xac   : > { %880 = vrot.lane.b32.xlu0 %v3708_v58, %s3429_s26  ;;  %751 = vst.msk [vmem:[#allocation3 + $0x18] sm:$0xff] %vm749_vm7, %v728_v38 }
  0xad   : > { %837 = vrot.lane.b32.xlu1 %v3792_v9, %s3428_s25 }
  0xae   : > { %v775_v39 = vpop.permute.xlu0 %774 }
  0xaf   : > { %799 = vst.msk [vmem:[#allocation3] sm:$0xff] %vm798_vm8, %v775_v39  ;;  %v732_v40 = vpop.permute.xlu1 %731 }
  0xb0   : > { %884 = vrot.lane.b32.xlu0 %v3740_v7, %s3429_s26  ;;  %753 = vst.msk [vmem:[#allocation3 + $0x48] sm:$0xff] %vm749_vm7, %v732_v40 }
  0xb1   : > { %882 = vrot.lane.b32.xlu1 %v3706_v57, %s3429_s26 }
  0xb2   : > { %v779_v41 = vpop.permute.xlu0 %778 }
  0xb3   : > { %801 = vst.msk [vmem:[#allocation3 + $0x30] sm:$0xff] %vm798_vm8, %v779_v41  ;;  %v777_v42 = vpop.permute.xlu1 %776 }
  0xb4   : > { %929 = vrot.lane.b32.xlu0 %v3676_v43, %s3430_s27  ;;  %800 = vst.msk [vmem:[#allocation3 + $0x18] sm:$0xff] %vm798_vm8, %v777_v42 }
  0xb5   : > { %886 = vrot.lane.b32.xlu1 %v3794_v10, %s3429_s26  ;;  %s467_s26 = scalar_lea.vmem %s4698_s14, %s4706_s23 }
  0xb6   : > { %v824_v51 = vpop.permute.xlu0 %823 }
  0xb7   : > { %848 = vst.msk [vmem:[#allocation3] sm:$0xff] %vm847_vm9, %v824_v51  ;;  %v781_v52 = vpop.permute.xlu1 %780 }
  0xb8   : > { %933 = vrot.lane.b32.xlu0 %v3720_v59, %s3430_s27  ;;  %802 = vst.msk [vmem:[#allocation3 + $0x48] sm:$0xff] %vm798_vm8, %v781_v52 }
  0xb9   : > { %931 = vrot.lane.b32.xlu1 %v3678_v44, %s3430_s27 }
  0xba   : > { %v828_v53 = vpop.permute.xlu0 %827 }
  0xbb   : > { %850 = vst.msk [vmem:[#allocation3 + $0x30] sm:$0xff] %vm847_vm9, %v828_v53  ;;  %v826_v43 = vpop.permute.xlu1 %825 }
  0xbc   : > { %978 = vrot.lane.b32.xlu0 %v3680_v45, %s3431_s28  ;;  %849 = vst.msk [vmem:[#allocation3 + $0x18] sm:$0xff] %vm847_vm9, %v826_v43 }
  0xbd   : > { %935 = vrot.lane.b32.xlu1 %v3796_v15, %s3430_s27 }
  0xbe   : > { %v873_v54 = vpop.permute.xlu0 %872 }
  0xbf   : > { %897 = vst.msk [vmem:[#allocation3] sm:$0xff] %vm896_vm10, %v873_v54  ;;  %v830_v55 = vpop.permute.xlu1 %829 }
  0xc0   : > { %982 = vrot.lane.b32.xlu0 %v3722_v60, %s3431_s28  ;;  %851 = vst.msk [vmem:[#allocation3 + $0x48] sm:$0xff] %vm847_vm9, %v830_v55 }
  0xc1   : > { %980 = vrot.lane.b32.xlu1 %v3682_v46, %s3431_s28 }
  0xc2   : > { %v538_v44 = vpop.permute.xlu0 %537 }
  0xc3   : > { %558 = vst.msk [vmem:[#allocation3 + $0x60] sm:$0xff] %vm553_vm2, %v538_v44  ;;  %v875_v45 = vpop.permute.xlu1 %874 }
  0xc4   : > { %1027 = vrot.lane.b32.xlu0 %v3684_v47, %s3432_s16  ;;  %898 = vst.msk [vmem:[#allocation3 + $0x18] sm:$0xff] %vm896_vm10, %v875_v45 }
  0xc5   : > { %984 = vrot.lane.b32.xlu1 %v3798_v20, %s3431_s28 }
  0xc6   : > { %v877_v56 = vpop.permute.xlu0 %876 }
  0xc7   : > { %899 = vst.msk [vmem:[#allocation3 + $0x30] sm:$0xff] %vm896_vm10, %v877_v56  ;;  %v540_v57 = vpop.permute.xlu1 %539 }
  0xc8   : > { %1031 = vrot.lane.b32.xlu0 %v3724_v61, %s3432_s16  ;;  %559 = vst.msk [vmem:[#allocation3 + $0x78] sm:$0xff] %vm553_vm2, %v540_v57 }
  0xc9   : > { %1029 = vrot.lane.b32.xlu1 %v3686_v48, %s3432_s16 }
  0xca   : > { %v922_v46 = vpop.permute.xlu0 %921 }
  0xcb   : > { %946 = vst.msk [vmem:[#allocation3] sm:$0xff] %vm945_vm11, %v922_v46  ;;  %v879_v47 = vpop.permute.xlu1 %878 }
  0xcc   : > { %1076 = vrot.lane.b32.xlu0 %v3688_v49, %s3433_s20  ;;  %900 = vst.msk [vmem:[#allocation3 + $0x48] sm:$0xff] %vm896_vm10, %v879_v47 }
  0xcd   : > { %1033 = vrot.lane.b32.xlu1 %v3800_v21, %s3432_s16 }
  0xce   : > { %v542_v58 = vpop.permute.xlu0 %541 }
  0xcf   : > { %560 = vst.msk [vmem:[#allocation3 + $0x90] sm:$0xff] %vm553_vm2, %v542_v58  ;;  %v924_v59 = vpop.permute.xlu1 %923 }
  0xd0   : > { %1080 = vrot.lane.b32.xlu0 %v3726_v62, %s3433_s20  ;;  %947 = vst.msk [vmem:[#allocation3 + $0x18] sm:$0xff] %vm945_vm11, %v924_v59 }
  0xd1   : > { %1078 = vrot.lane.b32.xlu1 %v3690_v50, %s3433_s20 }
  0xd2   : > { %v587_v48 = vpop.permute.xlu0 %586 }
  0xd3   : > { %607 = vst.msk [vmem:[#allocation3 + $0x60] sm:$0xff] %vm602_vm4, %v587_v48  ;;  %v544_v49 = vpop.permute.xlu1 %543 }
  0xd4   : > { %561 = vst.msk [vmem:[#allocation3 + $0xa8] sm:$0xff] %vm553_vm2, %v544_v49 }
  0xd5   : > { %1082 = vrot.lane.b32.xlu1 %v3804_v22, %s3433_s20 }
  0xd6   : > { %v926_v60 = vpop.permute.xlu0 %925 }
  0xd7   : > { %948 = vst.msk [vmem:[#allocation3 + $0x30] sm:$0xff] %vm945_vm11, %v926_v60  ;;  %v589_v61 = vpop.permute.xlu1 %588 }
  0xd8   : > { %608 = vst.msk [vmem:[#allocation3 + $0x78] sm:$0xff] %vm602_vm4, %v589_v61 }
  0xda   : > { %v971_v62 = vpop.permute.xlu0 %970 }
  0xdb   : > { %995 = vst.msk [vmem:[#allocation3] sm:$0xff] %vm994_vm12, %v971_v62  ;;  %v928_v50 = vpop.permute.xlu1 %927 }
  0xdc   : > { %949 = vst.msk [vmem:[#allocation3 + $0x48] sm:$0xff] %vm945_vm11, %v928_v50 }
  0xde   : > { %v591_v63 = vpop.permute.xlu0 %590 }
  0xdf   : > { %609 = vst.msk [vmem:[#allocation3 + $0x90] sm:$0xff] %vm602_vm4, %v591_v63  ;;  %v973_v5 = vpop.permute.xlu1 %972 }
  0xe0   : > { %996 = vst.msk [vmem:[#allocation3 + $0x18] sm:$0xff] %vm994_vm12, %v973_v5 }
  0xe2   : > { %v636_v6 = vpop.permute.xlu0 %635 }
  0xe3   : > { %656 = vst.msk [vmem:[#allocation3 + $0x60] sm:$0xff] %vm651_vm5, %v636_v6  ;;  %v593_v7 = vpop.permute.xlu1 %592 }
  0xe4   : > { %610 = vst.msk [vmem:[#allocation3 + $0xa8] sm:$0xff] %vm602_vm4, %v593_v7 }
  0xe6   : > { %v975_v8 = vpop.permute.xlu0 %974 }
  0xe7   : > { %997 = vst.msk [vmem:[#allocation3 + $0x30] sm:$0xff] %vm994_vm12, %v975_v8  ;;  %v638_v9 = vpop.permute.xlu1 %637 }
  0xe8   : > { %657 = vst.msk [vmem:[#allocation3 + $0x78] sm:$0xff] %vm651_vm5, %v638_v9 }
  0xea   : > { %v1020_v10 = vpop.permute.xlu0 %1019 }
  0xeb   : > { %1044 = vst.msk [vmem:[#allocation3] sm:$0xff] %vm1043_vm13, %v1020_v10  ;;  %v977_v15 = vpop.permute.xlu1 %976  ;;  %v3313_v10 = vld [vmem:[%s4687_s3 + $0x98] sm:$0xff]  }
  0xec   : > { %998 = vst.msk [vmem:[#allocation3 + $0x48] sm:$0xff] %vm994_vm12, %v977_v15  ;;  %v3314_v15 = vld [vmem:[%s4687_s3 + $0x90] sm:$0xff]   ;;  %3238 = vmatprep.subr.bf16.mxu0 %v3313_v10 }
  0xee   : > { %v640_v20 = vpop.permute.xlu0 %639 }
  0xef   : > { %658 = vst.msk [vmem:[#allocation3 + $0x90] sm:$0xff] %vm651_vm5, %v640_v20  ;;  %v1022_v21 = vpop.permute.xlu1 %1021  ;;  %v3315_v20 = vld [vmem:[%s4687_s3 + $0x88] sm:$0xff]  }
  0xf0   : > { %1045 = vst.msk [vmem:[#allocation3 + $0x18] sm:$0xff] %vm1043_vm13, %v1022_v21  ;;  %v3316_v21 = vld [vmem:[%s4687_s3 + $0x80] sm:$0xff]  }
  0xf2   : > { %v685_v22 = vpop.permute.xlu0 %684 }
  0xf3   : > { %705 = vst.msk [vmem:[#allocation3 + $0x60] sm:$0xff] %vm700_vm6, %v685_v22  ;;  %v642_v11 = vpop.permute.xlu1 %641 }
  0xf4   : > { %659 = vst.msk [vmem:[#allocation3 + $0xa8] sm:$0xff] %vm651_vm5, %v642_v11  ;;  %vm2024_vm5 = vcmask 64512  }
  0xf6   : > { %v1024_v12 = vpop.permute.xlu0 %1023 }
  0xf7   : > { %1046 = vst.msk [vmem:[#allocation3 + $0x30] sm:$0xff] %vm1043_vm13, %v1024_v12  ;;  %v687_v13 = vpop.permute.xlu1 %686 }
  0xf8   : > { %706 = vst.msk [vmem:[#allocation3 + $0x78] sm:$0xff] %vm700_vm6, %v687_v13 }
  0xfa   : > { %v1069_v14 = vpop.permute.xlu0 %1068 }
  0xfb   : > { %1093 = vst.msk [vmem:[#allocation3] sm:$0xff] %vm1092_vm14, %v1069_v14  ;;  %v1026_v16 = vpop.permute.xlu1 %1025 }
  0xfc   : > { %1047 = vst.msk [vmem:[#allocation3 + $0x48] sm:$0xff] %vm1043_vm13, %v1026_v16 }
  0xfe   : > { %v689_v17 = vpop.permute.xlu0 %688 }
  0xff   : > { %707 = vst.msk [vmem:[#allocation3 + $0x90] sm:$0xff] %vm700_vm6, %v689_v17  ;;  %v1071_v18 = vpop.permute.xlu1 %1070  ;;  %v4089_v17 = vld [vmem:[%s4686_s2] ss:$0 sm:$0xff] }
 0x100   : > { %1094 = vst.msk [vmem:[#allocation3 + $0x18] sm:$0xff] %vm1092_vm14, %v1071_v18 }
 0x102   : > { %v734_v19 = vpop.permute.xlu0 %733  ;;  %v1101_v24 = vld [vmem:[#allocation3] sm:$0xff] }
 0x103   : > { %754 = vst.msk [vmem:[#allocation3 + $0x60] sm:$0xff] %vm749_vm7, %v734_v19  ;;  %v691_v23 = vpop.permute.xlu1 %690 }
 0x104   : > { %708 = vst.msk [vmem:[#allocation3 + $0xa8] sm:$0xff] %vm700_vm6, %v691_v23  ;;  %vm2290_vm6 = vcmask 130048  }
 0x106   : > { %v1073_v27 = vpop.permute.xlu0 %1072 }
 0x107   : > { %1095 = vst.msk [vmem:[#allocation3 + $0x30] sm:$0xff] %vm1092_vm14, %v1073_v27  ;;  %v736_v26 = vpop.permute.xlu1 %735  ;;  %v1102_v28 = vld [vmem:[#allocation3 + $0x18] sm:$0xff] }
 0x108   : > { %755 = vst.msk [vmem:[#allocation3 + $0x78] sm:$0xff] %vm749_vm7, %v736_v26  ;;  %v1109_v29 = vpack.c.bf16 %v1102_v28, %v1101_v24 }
 0x10a   : > { %v738_v25 = vpop.permute.xlu0 %737  ;;  %3230 = vmatprep.mubr.msk.bf16.mxu0 %vm1141_vm15, %v1109_v29 }
 0x10b   : > { %756 = vst.msk [vmem:[#allocation3 + $0x90] sm:$0xff] %vm749_vm7, %v738_v25  ;;  %v1075_v30 = vpop.permute.xlu1 %1074  ;;  %v3317_v25 = vld [vmem:[%s4687_s3 + $0x78] sm:$0xff]  }
 0x10c   : > { %1096 = vst.msk [vmem:[#allocation3 + $0x48] sm:$0xff] %vm1092_vm14, %v1075_v30  ;;  %v3318_v30 = vld [vmem:[%s4687_s3 + $0x38] sm:$0xff]   ;;  %3167 = vmatprep.subr.bf16.mxu1 %v3317_v25 }
 0x10d   : > { %3168 = vmatpush3.bf16.msra.mxu1 %v3318_v30 }
 0x10e   : > { %v783_v31 = vpop.permute.xlu0 %782  ;;  %v1103_v33 = vld [vmem:[#allocation3 + $0x30] sm:$0xff] }
 0x10f   : > { %803 = vst.msk [vmem:[#allocation3 + $0x60] sm:$0xff] %vm798_vm8, %v783_v31  ;;  %v740_v32 = vpop.permute.xlu1 %739  ;;  %v3319_v31 = vld [vmem:[%s4687_s3 + $0x70] sm:$0xff]  }
 0x110   : > { %757 = vst.msk [vmem:[#allocation3 + $0xa8] sm:$0xff] %vm749_vm7, %v740_v32  ;;  %v3320_v32 = vld [vmem:[%s4687_s3 + $0x30] sm:$0xff]   ;;  %3169 = vmatprep.subr.bf16.mxu1 %v3319_v31  ;;  %vm2617_vm7 = vcmask 261120  }
 0x111   : > { %3170 = vmatpush3.bf16.msra.mxu1 %v3320_v32 }
 0x112   : > { %v787_v34 = vpop.permute.xlu0 %786 }
 0x113   : > { %805 = vst.msk [vmem:[#allocation3 + $0x90] sm:$0xff] %vm798_vm8, %v787_v34  ;;  %v785_v35 = vpop.permute.xlu1 %784  ;;  %v1104_v36 = vld [vmem:[#allocation3 + $0x48] sm:$0xff] }
 0x114   : > { %804 = vst.msk [vmem:[#allocation3 + $0x78] sm:$0xff] %vm798_vm8, %v785_v35  ;;  %v1110_v37 = vpack.c.bf16 %v1104_v36, %v1103_v33  ;;  %v3321_v33 = vld [vmem:[%s4687_s3 + $0x68] sm:$0xff]  }
 0x115   : > { %v3322_v35 = vld [vmem:[%s4687_s3 + $0x28] sm:$0xff]   ;;  %3171 = vmatprep.subr.bf16.mxu1 %v3321_v33 }
 0x116   : > { %v832_v38 = vpop.permute.xlu0 %831  ;;  %3231 = vmatmul.mubr.msk.bf16.vlgmr.msra.gmra.mxu0 %vm1141_vm15, %v1110_v37  ;;  %3172 = vmatpush3.bf16.msra.mxu1 %v3322_v35 }
 0x117   : > { %852 = vst.msk [vmem:[#allocation3 + $0x60] sm:$0xff] %vm847_vm9, %v832_v38  ;;  %v789_v39 = vpop.permute.xlu1 %788  ;;  %3239 = vmatpush3.bf16.msra.mxu0 %v3313_v10  ;;  %v3323_v38 = vld [vmem:[%s4687_s3 + $0x60] sm:$0xff]  }
 0x118   : > { %806 = vst.msk [vmem:[#allocation3 + $0xa8] sm:$0xff] %vm798_vm8, %v789_v39  ;;  %3240 = vmatprep.subr.bf16.mxu0 %v3314_v15  ;;  %3173 = vmatprep.subr.bf16.mxu1 %v3323_v38  ;;  %v3332_v10 = vld [vmem:[%s4687_s3] sm:$0xff]  }
 0x11a   : > { %v836_v40 = vpop.permute.xlu0 %835 }
 0x11b   : > { %854 = vst.msk [vmem:[#allocation3 + $0x90] sm:$0xff] %vm847_vm9, %v836_v40  ;;  %v834_v41 = vpop.permute.xlu1 %833  ;;  %3241 = vmatpush3.bf16.msra.mxu0 %v3314_v15 }
 0x11c   : > { %853 = vst.msk [vmem:[#allocation3 + $0x78] sm:$0xff] %vm847_vm9, %v834_v41  ;;  %3242 = vmatprep.subr.bf16.mxu0 %v3315_v20 }
 0x11e   : > { %v881_v42 = vpop.permute.xlu0 %880 }
 0x11f   : > { %901 = vst.msk [vmem:[#allocation3 + $0x60] sm:$0xff] %vm896_vm10, %v881_v42  ;;  %v838_v51 = vpop.permute.xlu1 %837  ;;  %3243 = vmatpush3.bf16.msra.mxu0 %v3315_v20 }
 0x120   : > { %855 = vst.msk [vmem:[#allocation3 + $0xa8] sm:$0xff] %vm847_vm9, %v838_v51  ;;  %3244 = vmatprep.subr.bf16.mxu0 %v3316_v21 }
 0x122   : > { %v885_v52 = vpop.permute.xlu0 %884 }
 0x123   : > { %903 = vst.msk [vmem:[#allocation3 + $0x90] sm:$0xff] %vm896_vm10, %v885_v52  ;;  %v883_v53 = vpop.permute.xlu1 %882  ;;  %3245 = vmatpush3.bf16.msra.mxu0 %v3316_v21  ;;  %v3324_v52 = vld [vmem:[%s4687_s3 + $0x20] sm:$0xff]  }
 0x124   : > { %902 = vst.msk [vmem:[#allocation3 + $0x78] sm:$0xff] %vm896_vm10, %v883_v53  ;;  %v3325_v53 = vld [vmem:[%s4687_s3 + $0x58] sm:$0xff]   ;;  %3174 = vmatpush3.bf16.msra.mxu1 %v3324_v52 }
 0x125   : > { %3175 = vmatprep.subr.bf16.mxu1 %v3325_v53 }
 0x126   : > { %v930_v43 = vpop.permute.xlu0 %929 }
 0x127   : > { %950 = vst.msk [vmem:[#allocation3 + $0x60] sm:$0xff] %vm945_vm11, %v930_v43  ;;  %v887_v54 = vpop.permute.xlu1 %886  ;;  %v3326_v43 = vld [vmem:[%s4687_s3 + $0x18] sm:$0xff]  }
 0x128   : > { %904 = vst.msk [vmem:[#allocation3 + $0xa8] sm:$0xff] %vm896_vm10, %v887_v54  ;;  %3176 = vmatpush3.bf16.msra.mxu1 %v3326_v43 }
 0x12a   : > { %v934_v55 = vpop.permute.xlu0 %933 }
 0x12b   : > { %952 = vst.msk [vmem:[#allocation3 + $0x90] sm:$0xff] %vm945_vm11, %v934_v55  ;;  %v932_v44 = vpop.permute.xlu1 %931 }
 0x12c   : > { %951 = vst.msk [vmem:[#allocation3 + $0x78] sm:$0xff] %vm945_vm11, %v932_v44 }
 0x12e   : > { %v979_v45 = vpop.permute.xlu0 %978 }
 0x12f   : > { %999 = vst.msk [vmem:[#allocation3 + $0x60] sm:$0xff] %vm994_vm12, %v979_v45  ;;  %v936_v56 = vpop.permute.xlu1 %935 }
 0x130   : > { %953 = vst.msk [vmem:[#allocation3 + $0xa8] sm:$0xff] %vm945_vm11, %v936_v56 }
 0x132   : > { %v983_v57 = vpop.permute.xlu0 %982 }
 0x133   : > { %1001 = vst.msk [vmem:[#allocation3 + $0x90] sm:$0xff] %vm994_vm12, %v983_v57  ;;  %v981_v46 = vpop.permute.xlu1 %980 }
 0x134   : > { %1000 = vst.msk [vmem:[#allocation3 + $0x78] sm:$0xff] %vm994_vm12, %v981_v46 }
 0x136   : > { %v1028_v47 = vpop.permute.xlu0 %1027 }
 0x137   : > { %1048 = vst.msk [vmem:[#allocation3 + $0x60] sm:$0xff] %vm1043_vm13, %v1028_v47  ;;  %v985_v58 = vpop.permute.xlu1 %984 }
 0x138   : > { %1002 = vst.msk [vmem:[#allocation3 + $0xa8] sm:$0xff] %vm994_vm12, %v985_v58 }
 0x13a   : > { %v1032_v59 = vpop.permute.xlu0 %1031 }
 0x13b   : > { %1050 = vst.msk [vmem:[#allocation3 + $0x90] sm:$0xff] %vm1043_vm13, %v1032_v59  ;;  %v1030_v48 = vpop.permute.xlu1 %1029 }
 0x13c   : > { %1049 = vst.msk [vmem:[#allocation3 + $0x78] sm:$0xff] %vm1043_vm13, %v1030_v48 }
 0x13e   : > { %v1077_v49 = vpop.permute.xlu0 %1076 }
 0x13f   : > { %1097 = vst.msk [vmem:[#allocation3 + $0x60] sm:$0xff] %vm1092_vm14, %v1077_v49  ;;  %v1034_v60 = vpop.permute.xlu1 %1033  ;;  %v3327_v49 = vld [vmem:[%s4687_s3 + $0x50] sm:$0xff]  }
 0x140   : > { %1051 = vst.msk [vmem:[#allocation3 + $0xa8] sm:$0xff] %vm1043_vm13, %v1034_v60  ;;  %v3328_v60 = vld [vmem:[%s4687_s3 + $0x10] sm:$0xff]   ;;  %3177 = vmatprep.subr.bf16.mxu1 %v3327_v49  ;;  %v3339_v49 = vld [vmem:[%s4689_s5 + $0x8] sm:$0xff]  }
 0x141   : > { %3178 = vmatpush3.bf16.msra.mxu1 %v3328_v60  ;;  %v3340_v60 = vld [vmem:[%s4689_s5] sm:$0xff]  }
 0x142   : > { %v1081_v61 = vpop.permute.xlu0 %1080 }
 0x143   : > { %1099 = vst.msk [vmem:[#allocation3 + $0x90] sm:$0xff] %vm1092_vm14, %v1081_v61  ;;  %v1079_v62 = vpop.permute.xlu1 %1078 }
 0x144   : > { %1098 = vst.msk [vmem:[#allocation3 + $0x78] sm:$0xff] %vm1092_vm14, %v1079_v62 }
 0x146   : > { %v1105_v63 = vld [vmem:[#allocation3 + $0x60] sm:$0xff] }
 0x147   : > { %v1083_v50 = vpop.permute.xlu1 %1082 }
 0x148   : > { %1100 = vst.msk [vmem:[#allocation3 + $0xa8] sm:$0xff] %vm1092_vm14, %v1083_v50 }
 0x14a   : > { %v1107_v7 = vld [vmem:[#allocation3 + $0x90] sm:$0xff] }
 0x14b   : > { %v1106_v5 = vld [vmem:[#allocation3 + $0x78] sm:$0xff] }
 0x14c   : > { %v1111_v6 = vpack.c.bf16 %v1106_v5, %v1105_v63  ;;  %v3329_v63 = vld [vmem:[%s4687_s3 + $0x48] sm:$0xff]  }
 0x14d   : > { %v3330_v5 = vld [vmem:[%s4687_s3 + $0x8] sm:$0xff]   ;;  %3179 = vmatprep.subr.bf16.mxu1 %v3329_v63 }
 0x14e   : > { %3234 = vmatprep.mubr.msk.bf16.mxu0 %vm1141_vm15, %v1111_v6  ;;  %3180 = vmatpush3.bf16.msra.mxu1 %v3330_v5  ;;  %v3331_v6 = vld [vmem:[%s4687_s3 + $0x40] sm:$0xff]  }
 0x14f   : > { %v1108_v8 = vld [vmem:[#allocation3 + $0xa8] sm:$0xff]  ;;  %3181 = vmatprep.subr.bf16.mxu1 %v3331_v6 }
 0x150   : > { %v1112_v9 = vpack.c.bf16 %v1108_v8, %v1107_v7 }
 0x152   : > { %3235 = vmatmul.mubr.msk.bf16.gmra.mxu0 %vm1141_vm15, %v1112_v9  ;;  %3182 = vmatpush3.bf16.msra.mxu1 %v3332_v10 }
 0x1d6   : > { %v3232_v22 = vpop.f32.mrf.mxu0 }
 0x1d7   : > { %1225 = vst.msk [vmem:[#allocation4 + $0x10] sm:$0xff] %vm477_vm0, %v3232_v22 }
 0x1d8   : > { %v1192_v11 = vpop.f32.mrf.mxu0 }
 0x1d9   : > { %1223 = vst.msk [vmem:[#allocation4] sm:$0xff] %vm477_vm0, %v1192_v11 }
 0x1da   : > { %v3233_v12 = vpop.f32.mrf.mxu0 }
 0x1db   : > { %1226 = vst.msk [vmem:[#allocation4 + $0x18] sm:$0xff] %vm477_vm0, %v3233_v12 }
 0x1dc   : > { %v1195_v13 = vpop.f32.mrf.mxu0 }
 0x1dd   : > { %1224 = vst.msk [vmem:[#allocation4 + $0x8] sm:$0xff] %vm477_vm0, %v1195_v13 }
 0x1e2   : > { %v1233_v14 = vld [vmem:[#allocation4 + $0x10] ss:$2 sm:$0xff]  ;;  %v1241_v16 = vld [vmem:[#allocation4 + $0x11] ss:$2 sm:$0xff] }
 0x1e3   : > { %v1247_v18 = vmax.f32 %v1233_v14, %v1241_v16 }
 0x1e4   : > { %v1231_v19 = vld [vmem:[#allocation4] ss:$2 sm:$0xff]  ;;  %v1239_v23 = vld [vmem:[#allocation4 + $0x1] ss:$2 sm:$0xff] }
 0x1e5   : > { %v4092_v24 = vadd.f32 %v4089_v17, %v1247_v18  ;;  %v1246_v27 = vmax.f32 %v1231_v19, %v1239_v23 }
 0x1e7   : > { %v1262_v26 = vmax.f32 %v4092_v24, 0.0  ;;  %v4096_v28 = vadd.f32 %v4089_v17, %v1246_v27 }
 0x1e9   : > { %1276 = vst.msk [vmem:[#allocation2 + $0x10] sm:$0xff] %vm477_vm0, %v1262_v26  ;;  %v1261_v29 = vmax.f32 %v4096_v28, 0.0  ;;  %v3380_v28 = vld [vmem:[%s4693_s9 + $0x40] sm:$0xff]  }
 0x1eb   : > { %1275 = vst.msk [vmem:[#allocation2 + $0x8] sm:$0xff] %vm477_vm0, %v1261_v29 }
 0x1f0   : > { %v1313_v34 = vld [vmem:[#allocation2 + $0x10] sm:$0xff] }
 0x1f1   : > { %1317 = vst.msk [vmem:[#allocation3 + $0x20] sm:$0xff] %vm477_vm0, %v1313_v34 }
 0x1f2   : > { %v1320_v36 = vld [vmem:[#allocation2 + $0x9] sm:$0xff] }
 0x1f3   : > { %v1287_v37 = vld [vmem:[#allocation2 + $0x7] sm:$0xff]  ;;  %1328 = vrot.lane.b32.xlu0 %v1320_v36, %s3434_s19  ;;  %v4128_v42 = vld [vmem:[#allocation2 + $0xf] sm:$0xff] }
 0x1f4   : > { %v1344_v39 = vld [vmem:[#allocation2 + $0xa] sm:$0xff] }
 0x1f5   : > { %v1312_v40 = vld [vmem:[#allocation2 + $0x8] sm:$0xff]  ;;  %1348 = vst.msk [vmem:[#allocation3 + $0x10] sm:$0xff] %vm477_vm0, %v1344_v39 }
 0x1f6   : > { %v1279_v41 = vld [vmem:[#allocation2 + $0x6] sm:$0xff]  ;;  %1316 = vst.msk [vmem:[#allocation3 + $0x8] sm:$0xff] %vm477_vm0, %v1312_v40  ;;  %v1280_v51 = vld [vmem:[#allocation2 + $0xe] sm:$0xff] }
 0x1f7   : > { %1283 = vst.msk [vmem:[#allocation3] sm:$0xff] %vm477_vm0, %v1279_v41  ;;  %1655 = vst.msk [vmem:[#allocation2] sm:$0xff] %vm477_vm0, %v3421_v0  ;;  %1295 = vrot.lane.b32.xlu0 %v1287_v37, %s3434_s19 }
 0x1f8   : > { %1284 = vst.msk [vmem:[#allocation3 + $0x18] sm:$0xff] %vm477_vm0, %v1280_v51  ;;  %1656 = vst.msk [vmem:[#allocation2 + $0x8] sm:$0xff] %vm477_vm0, %v3421_v0 }
 0x212   : > { %v3236_v54 = vpop.f32.mrf.mxu0 }
 0x213   : > { %1229 = vst.msk [vmem:[#allocation4 + $0x30] sm:$0xff] %vm477_vm0, %v3236_v54 }
 0x214   : > { %v1208_v55 = vpop.f32.mrf.mxu0 }
 0x215   : > { %1227 = vst.msk [vmem:[#allocation4 + $0x20] sm:$0xff] %vm477_vm0, %v1208_v55 }
 0x216   : > { %v3237_v44 = vpop.f32.mrf.mxu0 }
 0x217   : > { %1230 = vst.msk [vmem:[#allocation4 + $0x38] sm:$0xff] %vm477_vm0, %v3237_v44 }
 0x218   : > { %v1211_v45 = vpop.f32.mrf.mxu0 }
 0x219   : > { %1228 = vst.msk [vmem:[#allocation4 + $0x28] sm:$0xff] %vm477_vm0, %v1211_v45  ;;  %v3333_v45 = vld [vmem:[%s4689_s5 + $0x38] sm:$0xff]  }
 0x21e   : > { %v1237_v56 = vld [vmem:[#allocation4 + $0x30] ss:$2 sm:$0xff]  ;;  %v1245_v57 = vld [vmem:[#allocation4 + $0x31] ss:$2 sm:$0xff] }
 0x21f   : > { %v1249_v46 = vmax.f32 %v1237_v56, %v1245_v57  ;;  %v3435_v56 = vmov 0   ;;  %v3334_v57 = vld [vmem:[%s4689_s5 + $0x30] sm:$0xff]  }
 0x220   : > { %v1235_v47 = vld [vmem:[#allocation4 + $0x20] ss:$2 sm:$0xff]  ;;  %v1243_v58 = vld [vmem:[#allocation4 + $0x21] ss:$2 sm:$0xff]  ;;  %1792 = vmatprep.subr.bf16.mxu0 %v3435_v56  ;;  %1982 = vmatprep.subr.bf16.mxu1 %v3435_v56 }
 0x221   : > { %v4153_v59 = vadd.f32 %v4089_v17, %v1249_v46  ;;  %v1248_v48 = vmax.f32 %v1235_v47, %v1243_v58  ;;  %v3335_v46 = vld [vmem:[%s4689_s5 + $0x28] sm:$0xff]   ;;  %v3336_v47 = vld [vmem:[%s4689_s5 + $0x20] sm:$0xff]   ;;  %v3337_v58 = vld [vmem:[%s4689_s5 + $0x18] sm:$0xff]  }
 0x223   : > { %v1264_v61 = vmax.f32 %v4153_v59, 0.0  ;;  %v4163_v62 = vadd.f32 %v4089_v17, %v1248_v48  ;;  %v1354_v17 = vld [vmem:[#allocation3 + $0x10] sm:$0xff]  ;;  %v3338_v48 = vld [vmem:[%s4689_s5 + $0x10] sm:$0xff]  }
 0x225   : > { %1278 = vst.msk [vmem:[#allocation2 + $0x20] sm:$0xff] %vm477_vm0, %v1264_v61  ;;  %v1263_v50 = vmax.f32 %v4163_v62, 0.0 }
 0x227   : > { %1277 = vst.msk [vmem:[#allocation2 + $0x18] sm:$0xff] %vm477_vm0, %v1263_v50 }
 0x22c   : > { %v1323_v7 = vld [vmem:[#allocation2 + $0x21] sm:$0xff] }
 0x22d   : > { %v1347_v8 = vld [vmem:[#allocation2 + $0x22] sm:$0xff] }
 0x22e   : > { %v1315_v9 = vld [vmem:[#allocation2 + $0x20] sm:$0xff]  ;;  %1351 = vst.msk [vmem:[#allocation3 + $0x58] sm:$0xff] %vm477_vm0, %v1347_v8  ;;  %1660 = vst.msk [vmem:[#allocation2 + $0x28] sm:$0xff] %vm477_vm0, %v3421_v0  ;;  %v1321_v20 = vld [vmem:[#allocation2 + $0x11] sm:$0xff] }
 0x22f   : > { %1319 = vst.msk [vmem:[#allocation3 + $0x50] sm:$0xff] %vm477_vm0, %v1315_v9  ;;  %v1322_v15 = vld [vmem:[#allocation2 + $0x19] sm:$0xff]  ;;  %1863 = vst.msk [vmem:[#allocation2 + $0x28] sm:$0xff] %vm477_vm0, %v3421_v0  ;;  %1330 = vrot.lane.b32.xlu1 %v1321_v20, %s3434_s19 }
 0x230   : > { %v1289_v21 = vld [vmem:[#allocation2 + $0x17] sm:$0xff]  ;;  %1332 = vrot.lane.b32.xlu0 %v1322_v15, %s3434_s19  ;;  %2113 = vst.msk [vmem:[#allocation2 + $0x28] sm:$0xff] %vm477_vm0, %v3421_v0  ;;  %v1290_v12 = vld [vmem:[#allocation2 + $0x1f] sm:$0xff] }
 0x231   : > { %v1345_v22 = vld [vmem:[#allocation2 + $0x12] sm:$0xff]  ;;  %v1346_v11 = vld [vmem:[#allocation2 + $0x1a] sm:$0xff]  ;;  %2397 = vst.msk [vmem:[#allocation2 + $0x28] sm:$0xff] %vm477_vm0, %v3421_v0 }
 0x232   : > { %1349 = vst.msk [vmem:[#allocation3 + $0x28] sm:$0xff] %vm477_vm0, %v1345_v22  ;;  %1350 = vst.msk [vmem:[#allocation3 + $0x40] sm:$0xff] %vm477_vm0, %v1346_v11  ;;  %v1314_v13 = vld [vmem:[#allocation2 + $0x18] sm:$0xff] }
 0x233   : > { %v1281_v14 = vld [vmem:[#allocation2 + $0x16] sm:$0xff]  ;;  %v1282_v16 = vld [vmem:[#allocation2 + $0x1e] sm:$0xff]  ;;  %1318 = vst.msk [vmem:[#allocation3 + $0x38] sm:$0xff] %vm477_vm0, %v1314_v13  ;;  %1297 = vrot.lane.b32.xlu1 %v4128_v42, %s3434_s19 }
 0x234   : > { %1285 = vst.msk [vmem:[#allocation3 + $0x30] sm:$0xff] %vm477_vm0, %v1281_v14  ;;  %1657 = vst.msk [vmem:[#allocation2 + $0x10] sm:$0xff] %vm477_vm0, %v3421_v0  ;;  %1299 = vrot.lane.b32.xlu0 %v1289_v21, %s3434_s19 }
 0x235   : > { %1286 = vst.msk [vmem:[#allocation3 + $0x48] sm:$0xff] %vm477_vm0, %v1282_v16  ;;  %1659 = vst.msk [vmem:[#allocation2 + $0x20] sm:$0xff] %vm477_vm0, %v3421_v0  ;;  %v1363_v23 = vld [vmem:[#allocation3 + $0x58] sm:$0xff] }
 0x236   : > { %1658 = vst.msk [vmem:[#allocation2 + $0x18] sm:$0xff] %vm477_vm0, %v3421_v0  ;;  %1862 = vst.msk [vmem:[#allocation2 + $0x20] sm:$0xff] %vm477_vm0, %v3421_v0 }
 0x237   : > { %2112 = vst.msk [vmem:[#allocation2 + $0x20] sm:$0xff] %vm477_vm0, %v3421_v0  ;;  %1334 = vrot.lane.b32.xlu1 %v1323_v7, %s3434_s19 }
 0x238   : > { %2396 = vst.msk [vmem:[#allocation2 + $0x20] sm:$0xff] %vm477_vm0, %v3421_v0 }
 0x239   : > { %v1357_v18 = vld [vmem:[#allocation3 + $0x28] sm:$0xff]  ;;  %v1360_v19 = vld [vmem:[#allocation3 + $0x40] sm:$0xff] }
 0x23a   : > { %v1366_v27 = vpack.c.bf16 %v1357_v18, %v1354_v17  ;;  %v1369_v25 = vpack.c.bf16 %v1363_v23, %v1360_v19 }
 0x23b   : > { %1301 = vrot.lane.b32.xlu1 %v1290_v12, %s3434_s19 }
 0x23c   : > { %3246 = vmatprep.mubr.msk.bf16.mxu0 %vm477_vm0, %v1366_v27 }
 0x23d   : > { %3247 = vmatmul.mubr.msk.bf16.vlgmr.msra.gmra.mxu0 %vm477_vm0, %v1369_v25 }
 0x23e   : > { %1793 = vmatpush1.bf16.msra.mxu0 %v3333_v45 }
 0x23f   : > { %1794 = vmatprep.subr.bf16.mxu0 %v3435_v56 }
 0x242   : > { %1795 = vmatpush1.bf16.msra.mxu0 %v3334_v57 }
 0x243   : > { %1796 = vmatprep.subr.bf16.mxu0 %v3435_v56 }
 0x246   : > { %1797 = vmatpush1.bf16.msra.mxu0 %v3335_v46 }
 0x247   : > { %1798 = vmatprep.subr.bf16.mxu0 %v3435_v56 }
 0x24a   : > { %1799 = vmatpush1.bf16.msra.mxu0 %v3336_v47 }
 0x24b   : > { %1800 = vmatprep.subr.bf16.mxu0 %v3435_v56 }
 0x24e   : > { %1801 = vmatpush1.bf16.msra.mxu0 %v3337_v58 }
 0x24f   : > { %1802 = vmatprep.subr.bf16.mxu0 %v3435_v56 }
 0x252   : > { %1803 = vmatpush1.bf16.msra.mxu0 %v3338_v48 }
 0x253   : > { %1804 = vmatprep.subr.bf16.mxu0 %v3435_v56 }
 0x256   : > { %1805 = vmatpush1.bf16.msra.mxu0 %v3339_v49 }
 0x257   : > { %1806 = vmatprep.subr.bf16.mxu0 %v3435_v56 }
 0x25a   : > { %1807 = vmatpush1.bf16.msra.mxu0 %v3340_v60  ;;  %v3345_v60 = vld [vmem:[%s4691_s7 + $0x38] sm:$0xff]  }
 0x25b   : > { %1816 = vmatprep.subr.bf16.mxu0 %v3435_v56 }
 0x265   : > { %v1329_v30 = vpop.permute.xlu0 %1328 }
 0x266   : > { %1340 = vst.msk [vmem:[#allocation3 + $0x8] sm:$0xff] %vm1307_vm3, %v1329_v30  ;;  %v3085_v30 = vld [vmem:[%s4688_s4] ss:$0 sm:$0xff] }
 0x269   : > { %v1296_v31 = vpop.permute.xlu0 %1295 }
 0x26a   : > { %1308 = vst.msk [vmem:[#allocation3] sm:$0xff] %vm1307_vm3, %v1296_v31 }
 0x26d   : > { %v1353_v37 = vld [vmem:[#allocation3 + $0x8] sm:$0xff] }
 0x271   : > { %v1352_v41 = vld [vmem:[#allocation3] sm:$0xff] }
 0x2a1   : > { %v1331_v33 = vpop.permute.xlu1 %1330 }
 0x2a2   : > { %v1333_v32 = vpop.permute.xlu0 %1332  ;;  %1341 = vst.msk [vmem:[#allocation3 + $0x20] sm:$0xff] %vm1307_vm3, %v1331_v33 }
 0x2a3   : > { %1342 = vst.msk [vmem:[#allocation3 + $0x38] sm:$0xff] %vm1307_vm3, %v1333_v32  ;;  %v3341_v32 = vld [vmem:[%s4689_s5 + $0x58] sm:$0xff]  }
 0x2a4   : > { %1817 = vmatpush2.bf16.msra.mxu0 %v3341_v32 }
 0x2a5   : > { %v1298_v34 = vpop.permute.xlu1 %1297  ;;  %1818 = vmatprep.subr.bf16.mxu0 %v3435_v56 }
 0x2a6   : > { %v1300_v35 = vpop.permute.xlu0 %1299  ;;  %1309 = vst.msk [vmem:[#allocation3 + $0x18] sm:$0xff] %vm1307_vm3, %v1298_v34  ;;  %v3342_v34 = vld [vmem:[%s4689_s5 + $0x50] sm:$0xff]  }
 0x2a7   : > { %1310 = vst.msk [vmem:[#allocation3 + $0x30] sm:$0xff] %vm1307_vm3, %v1300_v35 }
 0x2a8   : > { %1819 = vmatpush2.bf16.msra.mxu0 %v3342_v34 }
 0x2a9   : > { %v1335_v36 = vpop.permute.xlu1 %1334  ;;  %v1356_v38 = vld [vmem:[#allocation3 + $0x20] sm:$0xff]  ;;  %1820 = vmatprep.subr.bf16.mxu0 %v3435_v56 }
 0x2aa   : > { %1343 = vst.msk [vmem:[#allocation3 + $0x50] sm:$0xff] %vm1307_vm3, %v1335_v36  ;;  %v1365_v39 = vpack.c.bf16 %v1356_v38, %v1353_v37  ;;  %v1359_v52 = vld [vmem:[#allocation3 + $0x38] sm:$0xff] }
 0x2ac   : > { %1568 = vmatprep.mubr.bf16.mxu1 %v1365_v39  ;;  %v3343_v39 = vld [vmem:[%s4689_s5 + $0x48] sm:$0xff]  }
 0x2ad   : > { %v1302_v40 = vpop.permute.xlu1 %1301  ;;  %v1355_v42 = vld [vmem:[#allocation3 + $0x18] sm:$0xff]  ;;  %1821 = vmatpush2.bf16.msra.mxu0 %v3343_v39  ;;  %v3356_v39 = vld [vmem:[%s4691_s7 + $0x40] sm:$0xff]  }
 0x2ae   : > { %1311 = vst.msk [vmem:[#allocation3 + $0x48] sm:$0xff] %vm1307_vm3, %v1302_v40  ;;  %v1364_v51 = vpack.c.bf16 %v1355_v42, %v1352_v41  ;;  %v1358_v54 = vld [vmem:[#allocation3 + $0x30] sm:$0xff]  ;;  %1822 = vmatprep.subr.bf16.mxu0 %v3435_v56 }
 0x2af   : > { %v3344_v41 = vld [vmem:[%s4689_s5 + $0x40] sm:$0xff]  }
 0x2b0   : > { %1569 = vmatmul.mubr.bf16.vlgmr.msra.gmra.mxu1 %v1364_v51 }
 0x2b1   : > { %v1362_v53 = vld [vmem:[#allocation3 + $0x50] sm:$0xff]  ;;  %1823 = vmatpush2.bf16.msra.mxu0 %v3344_v41  ;;  %1983 = vmatpush1.bf16.msra.mxu1 %v3345_v60  ;;  %v3357_v60 = vld [vmem:[%s4692_s8 + $0x38] sm:$0xff]  }
 0x2b2   : > { %v1368_v43 = vpack.c.bf16 %v1362_v53, %v1359_v52  ;;  %1984 = vmatprep.subr.bf16.mxu1 %v3435_v56 }
 0x2b4   : > { %1576 = vmatprep.mubr.bf16.mxu1 %v1368_v43 }
 0x2b5   : > { %v1361_v55 = vld [vmem:[#allocation3 + $0x48] sm:$0xff] }
 0x2b6   : > { %v1367_v44 = vpack.c.bf16 %v1361_v55, %v1358_v54 }
 0x2b8   : > { %1577 = vmatmul.mubr.bf16.gmra.mxu1 %v1367_v44 }
 0x2fd   : > { %v3248_v63 = vpop.f32.mrf.mxu0 }
 0x2ff   : > { %v1619_v5 = vpop.f32.mrf.mxu0 }
 0x301   : > { %v3249_v9 = vpop.f32.mrf.mxu0 }
 0x303   : > { %v1622_v22 = vpop.f32.mrf.mxu0 }
 0x370   : > { %v3183_v6 = vpop.f32.mrf.mxu1 }
 0x372   : > { %v3184_v7 = vpop.f32.mrf.mxu1 }
 0x373   : > { %v3185_v8 = vadd.f32 %v3184_v7, %v3183_v6  ;;  %v3348_v6 = vld [vmem:[%s4691_s7 + $0x20] sm:$0xff]   ;;  %v3349_v7 = vld [vmem:[%s4691_s7 + $0x18] sm:$0xff]  }
 0x374   : > { %v3186_v10 = vpop.f32.mrf.mxu1 }
 0x375   : > { %v1620_v15 = vadd.f32 %v3185_v8, %v1619_v5  ;;  %v3347_v5 = vld [vmem:[%s4691_s7 + $0x28] sm:$0xff]   ;;  %v3350_v8 = vld [vmem:[%s4691_s7 + $0x10] sm:$0xff]  }
 0x376   : > { %v3187_v20 = vpop.f32.mrf.mxu1 }
 0x377   : > { %1634 = vst.msk [vmem:[#allocation4] sm:$0xff] %vm477_vm0, %v1620_v15  ;;  %v3188_v21 = vadd.f32 %v3187_v20, %v3186_v10  ;;  %v3352_v10 = vld [vmem:[%s4691_s7] sm:$0xff]   ;;  %v3353_v15 = vld [vmem:[%s4691_s7 + $0x58] sm:$0xff]   ;;  %v3354_v20 = vld [vmem:[%s4691_s7 + $0x50] sm:$0xff]  }
 0x378   : > { %v3189_v11 = vpop.f32.mrf.mxu1 }
 0x379   : > { %v1623_v12 = vadd.f32 %v3188_v21, %v1622_v22 }
 0x37a   : > { %v3190_v13 = vpop.f32.mrf.mxu1 }
 0x37b   : > { %1635 = vst.msk [vmem:[#allocation4 + $0x8] sm:$0xff] %vm477_vm0, %v1623_v12  ;;  %v3191_v14 = vadd.f32 %v3190_v13, %v3189_v11 }
 0x37c   : > { %v3192_v16 = vpop.f32.mrf.mxu1 }
 0x37d   : > { %v1628_v17 = vadd.f32 %v3248_v63, %v3191_v14  ;;  %v3346_v63 = vld [vmem:[%s4691_s7 + $0x30] sm:$0xff]  }
 0x37e   : > { %v3193_v18 = vpop.f32.mrf.mxu1  ;;  %1985 = vmatpush1.bf16.msra.mxu1 %v3346_v63  ;;  %v3358_v63 = vld [vmem:[%s4692_s8 + $0x30] sm:$0xff]  }
 0x37f   : > { %1636 = vst.msk [vmem:[#allocation4 + $0x10] sm:$0xff] %vm477_vm0, %v1628_v17  ;;  %v3194_v19 = vadd.f32 %v3193_v18, %v3192_v16  ;;  %1986 = vmatprep.subr.bf16.mxu1 %v3435_v56  ;;  %v3099_v16 = vld [vmem:[%s4690_s6] ss:$0 sm:$0xff] }
 0x381   : > { %v1631_v23 = vadd.f32 %v3249_v9, %v3194_v19  ;;  %v3351_v9 = vld [vmem:[%s4691_s7 + $0x8] sm:$0xff]  }
 0x382   : > { %v1638_v27 = vld [vmem:[#allocation4] ss:$2 sm:$0xff]  ;;  %v1640_v25 = vld [vmem:[#allocation4 + $0x1] ss:$2 sm:$0xff]  ;;  %1987 = vmatpush1.bf16.msra.mxu1 %v3347_v5  ;;  %v3359_v5 = vld [vmem:[%s4692_s8 + $0x28] sm:$0xff]  }
 0x383   : > { %v1642_v31 = vmax.f32 %v1638_v27, %v1640_v25  ;;  %1637 = vst.msk [vmem:[#allocation4 + $0x18] sm:$0xff] %vm477_vm0, %v1631_v23  ;;  %1988 = vmatprep.subr.bf16.mxu1 %v3435_v56 }
 0x385   : > { %v4272_v33 = vadd.f32 %v3085_v30, %v1642_v31 }
 0x386   : > { %1989 = vmatpush1.bf16.msra.mxu1 %v3348_v6  ;;  %v3360_v6 = vld [vmem:[%s4692_s8 + $0x20] sm:$0xff]  }
 0x387   : > { %v1653_v35 = vmax.f32 %v4272_v33, 0.0  ;;  %1990 = vmatprep.subr.bf16.mxu1 %v3435_v56 }
 0x389   : > { %1665 = vst.msk [vmem:[#allocation2 + $0x8] sm:$0xff] %vm477_vm0, %v1653_v35 }
 0x38a   : > { %v1639_v36 = vld [vmem:[#allocation4 + $0x10] ss:$2 sm:$0xff]  ;;  %v1641_v37 = vld [vmem:[#allocation4 + $0x11] ss:$2 sm:$0xff]  ;;  %1991 = vmatpush1.bf16.msra.mxu1 %v3349_v7  ;;  %v3361_v7 = vld [vmem:[%s4692_s8 + $0x18] sm:$0xff]  }
 0x38b   : > { %v1643_v38 = vmax.f32 %v1639_v36, %v1641_v37  ;;  %1992 = vmatprep.subr.bf16.mxu1 %v3435_v56  ;;  %v3355_v37 = vld [vmem:[%s4691_s7 + $0x48] sm:$0xff]  }
 0x38d   : > { %v4286_v40 = vadd.f32 %v3085_v30, %v1643_v38 }
 0x38e   : > { %1993 = vmatpush1.bf16.msra.mxu1 %v3350_v8  ;;  %v3362_v8 = vld [vmem:[%s4692_s8 + $0x10] sm:$0xff]  }
 0x38f   : > { %v1654_v42 = vmax.f32 %v4286_v40, 0.0  ;;  %1994 = vmatprep.subr.bf16.mxu1 %v3435_v56  ;;  %v3368_v40 = vld [vmem:[%s4692_s8 + $0x40] sm:$0xff]  }
 0x390   : > { %v1671_v51 = vld [vmem:[#allocation2 + $0x8] sm:$0xff] }
 0x391   : > { %v1667_v52 = vld [vmem:[#allocation2 + $0x7] sm:$0xff]  ;;  %1666 = vst.msk [vmem:[#allocation2 + $0x10] sm:$0xff] %vm477_vm0, %v1654_v42  ;;  %1675 = vrot.lane.b32.xlu0 %v1671_v51, %s3434_s19 }
 0x392   : > { %1669 = vst.msk [vmem:[#allocation3] sm:$0xff] %vm477_vm0, %v1667_v52  ;;  %1858 = vst.msk [vmem:[#allocation2] sm:$0xff] %vm477_vm0, %v3421_v0  ;;  %1995 = vmatpush1.bf16.msra.mxu1 %v3351_v9  ;;  %v3363_v9 = vld [vmem:[%s4692_s8 + $0x8] sm:$0xff]  }
 0x393   : > { %1996 = vmatprep.subr.bf16.mxu1 %v3435_v56 }
 0x396   : > { %1997 = vmatpush1.bf16.msra.mxu1 %v3352_v10  ;;  %v3364_v10 = vld [vmem:[%s4692_s8] sm:$0xff]  }
 0x397   : > { %2006 = vmatprep.subr.bf16.mxu1 %v3435_v56 }
 0x398   : > { %v1672_v53 = vld [vmem:[#allocation2 + $0x10] sm:$0xff] }
 0x399   : > { %v1683_v43 = vld [vmem:[#allocation2 + $0x9] sm:$0xff]  ;;  %v1684_v54 = vld [vmem:[#allocation2 + $0x11] sm:$0xff]  ;;  %1677 = vrot.lane.b32.xlu1 %v1672_v53, %s3434_s19 }
 0x39a   : > { %1861 = vst.msk [vmem:[#allocation2 + $0x18] sm:$0xff] %vm477_vm0, %v3421_v0  ;;  %v1668_v55 = vld [vmem:[#allocation2 + $0xf] sm:$0xff]  ;;  %1685 = vst.msk [vmem:[#allocation3 + $0x8] sm:$0xff] %vm477_vm0, %v1683_v43  ;;  %2007 = vmatpush2.bf16.msra.mxu1 %v3353_v15  ;;  %v3365_v15 = vld [vmem:[%s4692_s8 + $0x58] sm:$0xff]  }
 0x39b   : > { %1686 = vst.msk [vmem:[#allocation3 + $0x20] sm:$0xff] %vm477_vm0, %v1684_v54  ;;  %1670 = vst.msk [vmem:[#allocation3 + $0x18] sm:$0xff] %vm477_vm0, %v1668_v55  ;;  %2008 = vmatprep.subr.bf16.mxu1 %v3435_v56 }
 0x39c   : > { %1860 = vst.msk [vmem:[#allocation2 + $0x10] sm:$0xff] %vm477_vm0, %v3421_v0  ;;  %2111 = vst.msk [vmem:[#allocation2 + $0x18] sm:$0xff] %vm477_vm0, %v3421_v0 }
 0x39d   : > { %1859 = vst.msk [vmem:[#allocation2 + $0x8] sm:$0xff] %vm477_vm0, %v3421_v0 }
 0x39e   : > { %2009 = vmatpush2.bf16.msra.mxu1 %v3354_v20 }
 0x39f   : > { %2010 = vmatprep.subr.bf16.mxu1 %v3435_v56 }
 0x3a1   : > { %v1688_v44 = vld [vmem:[#allocation3 + $0x8] sm:$0xff] }
 0x3a2   : > { %v1690_v45 = vld [vmem:[#allocation3 + $0x20] sm:$0xff]  ;;  %2011 = vmatpush2.bf16.msra.mxu1 %v3355_v37  ;;  %v2286_v37 = vld [vmem:[%s4696_s12] sm:$0xff] }
 0x3a3   : > { %v1692_v57 = vpack.c.bf16 %v1690_v45, %v1688_v44  ;;  %2012 = vmatprep.subr.bf16.mxu1 %v3435_v56 }
 0x3a5   : > { %3098 = vmatprep.mubr.msk.bf16.mxu0 %vm477_vm0, %v1692_v57  ;;  %v2022_v57 = vld [vmem:[%s4695_s11] sm:$0xff] }
 0x3a6   : > { %2013 = vmatpush2.bf16.msra.mxu1 %v3356_v39 }
 0x3a7   : > { %2245 = vmatprep.subr.bf16.mxu1 %v3435_v56 }
 0x403   : > { %v1676_v46 = vpop.permute.xlu0 %1675 }
 0x404   : > { %1681 = vst.msk [vmem:[#allocation3] sm:$0xff] %vm1307_vm3, %v1676_v46 }
 0x40b   : > { %v1678_v47 = vpop.permute.xlu1 %1677  ;;  %v1687_v58 = vld [vmem:[#allocation3] sm:$0xff] }
 0x40c   : > { %1682 = vst.msk [vmem:[#allocation3 + $0x18] sm:$0xff] %vm1307_vm3, %v1678_v47  ;;  %v2023_v47 = vld [vmem:[%s4695_s11 + $0x8] sm:$0xff] }
 0x413   : > { %v1689_v48 = vld [vmem:[#allocation3 + $0x18] sm:$0xff] }
 0x414   : > { %v1691_v49 = vpack.c.bf16 %v1689_v48, %v1687_v58 }
 0x416   : > { %1825 = vmatmul.mubr.bf16.vlgmr.msra.gmra.mxu0 %v1691_v49 }
 0x417   : > { %3252 = vmatprep.mubr.msk.f32.mxu0 %vm2024_vm5, %v2022_v57  ;;  %v3373_v57 = vld [vmem:[%s4693_s9 + $0x18] sm:$0xff]  }
 0x4d6   : > { %v1826_v21 = vpop.f32.mrf.mxu0 }
 0x4d7   : > { %1833 = vst.msk [vmem:[#allocation4] sm:$0xff] %vm477_vm0, %v1826_v21  ;;  %v3366_v21 = vld [vmem:[%s4692_s8 + $0x50] sm:$0xff]  }
 0x4d8   : > { %v1828_v22 = vpop.f32.mrf.mxu0 }
 0x4da   : > { %v1829_v11 = vpop.f32.mrf.mxu0 }
 0x4db   : > { %1834 = vst.msk [vmem:[#allocation4 + $0x8] sm:$0xff] %vm477_vm0, %v1829_v11 }
 0x4dc   : > { %v1831_v12 = vpop.f32.mrf.mxu0 }
 0x4dd   : > { %v3367_v12 = vld [vmem:[%s4692_s8 + $0x48] sm:$0xff]  }
 0x4e2   : > { %v1835_v13 = vld [vmem:[#allocation4] ss:$2 sm:$0xff]  ;;  %v1836_v14 = vld [vmem:[#allocation4 + $0x1] ss:$2 sm:$0xff] }
 0x4e3   : > { %v1837_v17 = vmax.f32 %v1835_v13, %v1836_v14 }
 0x4e5   : > { %v1845_v18 = vadd.f32 %v3099_v16, %v1837_v17 }
 0x4e7   : > { %v1846_v19 = vmax.f32 %v1845_v18, 0.0 }
 0x4e9   : > { %v1847_v23 = vsel %vm477_vm0, %v1846_v19, 0.0 }
 0x4ea   : > { %v1848_v27 = vrot.slane %v1847_v23, 4 }
 0x4ec   : > { %v1849_v25 = vadd.f32 %v1848_v27, %v1847_v23 }
 0x4ee   : > { %v1850_v30 = vrot.slane %v1849_v25, 2 }
 0x4f0   : > { %v1851_v31 = vadd.f32 %v1850_v30, %v1849_v25 }
 0x4f2   : > { %v1852_v32 = vrot.slane %v1851_v31, 1 }
 0x4f4   : > { %v1853_v34 = vadd.f32 %v1852_v32, %v1851_v31 }
 0x4f6   : > { %v1855_v36 = vmul.f32 0.125, %v1853_v34 }
 0x4f8   : > { %v1856_v38 = vadd.f32 %v1855_v36, %v1846_v19 }
 0x4fa   : > { %v1857_v41 = vmax.f32 %v1856_v38, 0.0 }
 0x4fc   : > { %1868 = vst.msk [vmem:[#allocation2 + $0x8] sm:$0xff] %vm477_vm0, %v1857_v41 }
 0x503   : > { %v1871_v51 = vld [vmem:[#allocation2 + $0x8] sm:$0xff] }
 0x504   : > { %v1877_v52 = vld [vmem:[#allocation2 + $0x9] sm:$0xff]  ;;  %1873 = vrot.lane.b32.xlu0 %v1871_v51, %s3434_s19 }
 0x505   : > { %v1869_v53 = vld [vmem:[#allocation2 + $0x7] sm:$0xff]  ;;  %1878 = vst.msk [vmem:[#allocation3 + $0x8] sm:$0xff] %vm477_vm0, %v1877_v52  ;;  %2110 = vst.msk [vmem:[#allocation2 + $0x10] sm:$0xff] %vm477_vm0, %v3421_v0 }
 0x506   : > { %1870 = vst.msk [vmem:[#allocation3] sm:$0xff] %vm477_vm0, %v1869_v53  ;;  %2108 = vst.msk [vmem:[#allocation2] sm:$0xff] %vm477_vm0, %v3421_v0  ;;  %v2287_v52 = vld [vmem:[%s4696_s12 + $0x8] sm:$0xff]  ;;  %v2288_v53 = vld [vmem:[%s4696_s12 + $0x10] sm:$0xff] }
 0x507   : > { %2109 = vst.msk [vmem:[#allocation2 + $0x8] sm:$0xff] %vm477_vm0, %v3421_v0 }
 0x50c   : > { %v1880_v43 = vld [vmem:[#allocation3 + $0x8] sm:$0xff] }
 0x50d   : > { %v1882_v54 = vpack.c.bf16 %v1880_v43, %v1880_v43  ;;  %v2289_v43 = vld [vmem:[%s4696_s12 + $0x18] sm:$0xff] }
 0x50f   : > { %3112 = vmatprep.mubr.msk.bf16.mxu1 %vm477_vm0, %v1882_v54  ;;  %v3369_v54 = vld [vmem:[%s4693_s9 + $0x38] sm:$0xff]  }
 0x576   : > { %v1874_v55 = vpop.permute.xlu0 %1873 }
 0x577   : > { %1876 = vst.msk [vmem:[#allocation3] sm:$0xff] %vm1307_vm3, %v1874_v55  ;;  %v3370_v55 = vld [vmem:[%s4693_s9 + $0x30] sm:$0xff]  }
 0x57e   : > { %v1879_v44 = vld [vmem:[#allocation3] sm:$0xff] }
 0x57f   : > { %v1881_v45 = vpack.c.bf16 %v1879_v44, %v1879_v44  ;;  %v3371_v44 = vld [vmem:[%s4693_s9 + $0x28] sm:$0xff]  }
 0x581   : > { %2015 = vmatmul.mubr.bf16.vlgmr.msra.gmra.mxu1 %v1881_v45  ;;  %v3372_v45 = vld [vmem:[%s4693_s9 + $0x20] sm:$0xff]  }
 0x582   : > { %2246 = vmatpush1.bf16.msra.mxu1 %v3357_v60  ;;  %v3378_v60 = vld [vmem:[%s4693_s9 + $0x50] sm:$0xff]  }
 0x583   : > { %2247 = vmatprep.subr.bf16.mxu1 %v3435_v56 }
 0x586   : > { %2248 = vmatpush1.bf16.msra.mxu1 %v3358_v63 }
 0x587   : > { %2249 = vmatprep.subr.bf16.mxu1 %v3435_v56 }
 0x58a   : > { %2250 = vmatpush1.bf16.msra.mxu1 %v3359_v5 }
 0x58b   : > { %2251 = vmatprep.subr.bf16.mxu1 %v3435_v56 }
 0x58e   : > { %2252 = vmatpush1.bf16.msra.mxu1 %v3360_v6 }
 0x58f   : > { %2253 = vmatprep.subr.bf16.mxu1 %v3435_v56 }
 0x592   : > { %2254 = vmatpush1.bf16.msra.mxu1 %v3361_v7 }
 0x593   : > { %2255 = vmatprep.subr.bf16.mxu1 %v3435_v56 }
 0x596   : > { %2256 = vmatpush1.bf16.msra.mxu1 %v3362_v8 }
 0x597   : > { %2257 = vmatprep.subr.bf16.mxu1 %v3435_v56 }
 0x59a   : > { %2258 = vmatpush1.bf16.msra.mxu1 %v3363_v9  ;;  %v3379_v9 = vld [vmem:[%s4693_s9 + $0x48] sm:$0xff]  }
 0x59b   : > { %2259 = vmatprep.subr.bf16.mxu1 %v3435_v56 }
 0x59e   : > { %2260 = vmatpush1.bf16.msra.mxu1 %v3364_v10 }
 0x59f   : > { %2269 = vmatprep.subr.bf16.mxu1 %v3435_v56 }
 0x5a2   : > { %2270 = vmatpush2.bf16.msra.mxu1 %v3365_v15 }
 0x5a3   : > { %2271 = vmatprep.subr.bf16.mxu1 %v3435_v56 }
 0x5a6   : > { %2272 = vmatpush2.bf16.msra.mxu1 %v3366_v21 }
 0x5a7   : > { %2273 = vmatprep.subr.bf16.mxu1 %v3435_v56 }
 0x5aa   : > { %2274 = vmatpush2.bf16.msra.mxu1 %v3367_v12 }
 0x5ab   : > { %2275 = vmatprep.subr.bf16.mxu1 %v3435_v56 }
 0x5ae   : > { %2276 = vmatpush2.bf16.msra.mxu1 %v3368_v40 }
 0x641   : > { %v2016_v46 = vpop.f32.mrf.mxu1 }
 0x642   : > { %3250 = vmatprep.subr.mxu0 %v2016_v46 }
 0x643   : > { %v2018_v58 = vpop.f32.mrf.mxu1  ;;  %3251 = vmatpush3.msra.mxu0 %v2016_v46  ;;  %v3374_v46 = vld [vmem:[%s4693_s9 + $0x10] sm:$0xff]  }
 0x644   : > { %3253 = vmatmul.mubr.msk.f32.vlgmr.msra.gmra.mxu0 %vm2024_vm5, %v2023_v47  ;;  %v3375_v47 = vld [vmem:[%s4693_s9 + $0x8] sm:$0xff]   ;;  %v3376_v58 = vld [vmem:[%s4693_s9] sm:$0xff]  }
 0x645   : > { %v2019_v48 = vpop.f32.mrf.mxu1  ;;  %3259 = vmatprep.mubr.msk.f32.mxu0 %vm2290_vm6, %v2286_v37 }
 0x646   : > { %v3377_v48 = vld [vmem:[%s4693_s9 + $0x58] sm:$0xff]  }
 0x647   : > { %v2020_v49 = vpop.f32.mrf.mxu1 }
 0x704   : > { %v3254_v20 = vpop.f32.mrf.mxu0 }
 0x705   : > { %v2103_v22 = vadd.f32 %v3254_v20, %v1654_v42 }
 0x706   : > { %v2097_v11 = vpop.f32.mrf.mxu0 }
 0x707   : > { %v2107_v13 = vmax.f32 %v2103_v22, 0.0  ;;  %v2098_v14 = vadd.f32 %v2097_v11, %v1653_v35 }
 0x709   : > { %2119 = vst.msk [vmem:[#allocation2 + $0x10] sm:$0xff] %vm477_vm0, %v2107_v13  ;;  %v2106_v16 = vmax.f32 %v2098_v14, 0.0 }
 0x70b   : > { %2118 = vst.msk [vmem:[#allocation2 + $0x8] sm:$0xff] %vm477_vm0, %v2106_v16 }
 0x710   : > { %v2125_v42 = vld [vmem:[#allocation2 + $0x10] sm:$0xff] }
 0x711   : > { %v2137_v17 = vld [vmem:[#allocation2 + $0x11] sm:$0xff]  ;;  %2130 = vrot.lane.b32.xlu0 %v2125_v42, %s3434_s19 }
 0x712   : > { %2139 = vst.msk [vmem:[#allocation3 + $0x20] sm:$0xff] %vm477_vm0, %v2137_v17  ;;  %2395 = vst.msk [vmem:[#allocation2 + $0x18] sm:$0xff] %vm477_vm0, %v3421_v0  ;;  %v2124_v33 = vld [vmem:[#allocation2 + $0x8] sm:$0xff] }
 0x713   : > { %v2136_v35 = vld [vmem:[#allocation2 + $0x9] sm:$0xff]  ;;  %2128 = vrot.lane.b32.xlu1 %v2124_v33, %s3434_s19 }
 0x714   : > { %v2121_v18 = vld [vmem:[#allocation2 + $0xf] sm:$0xff]  ;;  %2138 = vst.msk [vmem:[#allocation3 + $0x8] sm:$0xff] %vm477_vm0, %v2136_v35  ;;  %v2120_v19 = vld [vmem:[#allocation2 + $0x7] sm:$0xff] }
 0x715   : > { %2123 = vst.msk [vmem:[#allocation3 + $0x18] sm:$0xff] %vm477_vm0, %v2121_v18  ;;  %2394 = vst.msk [vmem:[#allocation2 + $0x10] sm:$0xff] %vm477_vm0, %v3421_v0 }
 0x716   : > { %2122 = vst.msk [vmem:[#allocation3] sm:$0xff] %vm477_vm0, %v2120_v19  ;;  %2392 = vst.msk [vmem:[#allocation2] sm:$0xff] %vm477_vm0, %v3421_v0 }
 0x717   : > { %2393 = vst.msk [vmem:[#allocation2 + $0x8] sm:$0xff] %vm477_vm0, %v3421_v0 }
 0x719   : > { %v2143_v27 = vld [vmem:[#allocation3 + $0x20] sm:$0xff] }
 0x71b   : > { %v2141_v23 = vld [vmem:[#allocation3 + $0x8] sm:$0xff] }
 0x71c   : > { %v2145_v25 = vpack.c.bf16 %v2143_v27, %v2141_v23 }
 0x71e   : > { %3127 = vmatprep.mubr.msk.bf16.mxu1 %vm477_vm0, %v2145_v25 }
 0x783   : > { %v2131_v30 = vpop.permute.xlu0 %2130 }
 0x784   : > { %2135 = vst.msk [vmem:[#allocation3 + $0x18] sm:$0xff] %vm1307_vm3, %v2131_v30 }
 0x785   : > { %v2129_v31 = vpop.permute.xlu1 %2128 }
 0x786   : > { %2134 = vst.msk [vmem:[#allocation3] sm:$0xff] %vm1307_vm3, %v2129_v31 }
 0x78b   : > { %v2142_v34 = vld [vmem:[#allocation3 + $0x18] sm:$0xff] }
 0x78d   : > { %v2140_v32 = vld [vmem:[#allocation3] sm:$0xff] }
 0x78e   : > { %v2144_v36 = vpack.c.bf16 %v2142_v34, %v2140_v32 }
 0x790   : > { %2278 = vmatmul.mubr.bf16.vlgmr.msra.gmra.mxu1 %v2144_v36 }
 0x850   : > { %v2279_v38 = vpop.f32.mrf.mxu1 }
 0x852   : > { %v2281_v39 = vpop.f32.mrf.mxu1 }
 0x854   : > { %v2282_v41 = vpop.f32.mrf.mxu1 }
 0x855   : > { %3255 = vmatprep.subr.mxu0 %v2282_v41 }
 0x856   : > { %v2284_v51 = vpop.f32.mrf.mxu1  ;;  %3256 = vmatpush3.msra.mxu0 %v2282_v41 }
 0x857   : > { %3257 = vmatprep.subr.mxu0 %v2279_v38 }
 0x858   : > { %3258 = vmatpush3.msra.mxu0 %v2279_v38  ;;  %v2609_v38 = vld [vmem:[%s4697_s13] sm:$0xff] }
 0x859   : > { %3260 = vmatmul.mubr.msk.f32.vlgmr.msra.gmra.mxu0 %vm2290_vm6, %v2287_v52  ;;  %2560 = vmatprep.subr.bf16.mxu0 %v3435_v56 }
 0x85a   : > { %3262 = vmatprep.mubr.msk.f32.mxu0 %vm2290_vm6, %v2288_v53  ;;  %2561 = vmatpush1.bf16.msra.mxu0 %v3369_v54 }
 0x85b   : > { %2562 = vmatprep.subr.bf16.mxu0 %v3435_v56  ;;  %3273 = vmatprep.mubr.msk.f32.mxu1 %vm2617_vm7, %v2609_v38 }
 0x85d   : > { %3263 = vmatmul.mubr.msk.f32.gmra.mxu0 %vm2290_vm6, %v2289_v43 }
 0x85e   : > { %2563 = vmatpush1.bf16.msra.mxu0 %v3370_v55 }
 0x85f   : > { %2564 = vmatprep.subr.bf16.mxu0 %v3435_v56 }
 0x862   : > { %2565 = vmatpush1.bf16.msra.mxu0 %v3371_v44  ;;  %v2610_v44 = vld [vmem:[%s4697_s13 + $0x8] sm:$0xff] }
 0x863   : > { %2566 = vmatprep.subr.bf16.mxu0 %v3435_v56 }
 0x866   : > { %2567 = vmatpush1.bf16.msra.mxu0 %v3372_v45  ;;  %v2611_v45 = vld [vmem:[%s4697_s13 + $0x10] sm:$0xff] }
 0x867   : > { %2568 = vmatprep.subr.bf16.mxu0 %v3435_v56 }
 0x86a   : > { %2569 = vmatpush1.bf16.msra.mxu0 %v3373_v57  ;;  %v2612_v57 = vld [vmem:[%s4697_s13 + $0x18] sm:$0xff] }
 0x86b   : > { %2570 = vmatprep.subr.bf16.mxu0 %v3435_v56 }
 0x86e   : > { %2571 = vmatpush1.bf16.msra.mxu0 %v3374_v46  ;;  %v2613_v46 = vld [vmem:[%s4697_s13 + $0x20] sm:$0xff] }
 0x86f   : > { %2572 = vmatprep.subr.bf16.mxu0 %v3435_v56 }
 0x872   : > { %2573 = vmatpush1.bf16.msra.mxu0 %v3375_v47  ;;  %v2614_v47 = vld [vmem:[%s4697_s13 + $0x28] sm:$0xff] }
 0x873   : > { %2574 = vmatprep.subr.bf16.mxu0 %v3435_v56 }
 0x876   : > { %2575 = vmatpush1.bf16.msra.mxu0 %v3376_v58  ;;  %v2615_v58 = vld [vmem:[%s4697_s13 + $0x30] sm:$0xff] }
 0x877   : > { %2584 = vmatprep.subr.bf16.mxu0 %v3435_v56 }
 0x87a   : > { %2585 = vmatpush2.bf16.msra.mxu0 %v3377_v48  ;;  %v2616_v48 = vld [vmem:[%s4697_s13 + $0x38] sm:$0xff] }
 0x87b   : > { %2586 = vmatprep.subr.bf16.mxu0 %v3435_v56 }
 0x87e   : > { %2587 = vmatpush2.bf16.msra.mxu0 %v3378_v60  ;;  %v471_v60 = vld [vmem:[%s3547_s18 + $0x10] sm:$0xff] }
 0x87f   : > { %2588 = vmatprep.subr.bf16.mxu0 %v3435_v56 }
 0x882   : > { %2589 = vmatpush2.bf16.msra.mxu0 %v3379_v9 }
 0x883   : > { %2590 = vmatprep.subr.bf16.mxu0 %v3435_v56 }
 0x886   : > { %2591 = vmatpush2.bf16.msra.mxu0 %v3380_v28 }
 0x919   : > { %v3261_v49 = vpop.f32.mrf.mxu0 }
 0x91a   : > { %v2375_v63 = vadd.f32 %v3261_v49, %v1262_v26  ;;  %v469_v49 = vld [vmem:[%s3547_s18] sm:$0xff] }
 0x91b   : > { %v2369_v5 = vpop.f32.mrf.mxu0 }
 0x91c   : > { %v2389_v6 = vmax.f32 %v2375_v63, 0.0  ;;  %v2370_v7 = vadd.f32 %v2369_v5, %v1261_v29  ;;  %v473_v63 = vld [vmem:[%s3547_s18 + $0x20] sm:$0xff]  ;;  %v475_v5 = vld [vmem:[%s3547_s18 + $0x30] sm:$0xff]  ;;  %s4704_s18 = smov 4  }
 0x91d   : > { %v3264_v8 = vpop.f32.mrf.mxu0  ;;  %495 = vst.msk [vmem:[#allocation2 + $0x38] sm:$0xff] %vm488_vm1, %v475_v5 }
 0x91e   : > { %2403 = vst.msk [vmem:[#allocation2 + $0x10] sm:$0xff] %vm477_vm0, %v2389_v6  ;;  %v2388_v10 = vmax.f32 %v2370_v7, 0.0  ;;  %v2385_v24 = vadd.f32 %v3264_v8, %v1264_v61  ;;  %2762 = vst.msk [vmem:[#allocation2 + $0x38] sm:$0xff] %vm477_vm0, %v3421_v0 }
 0x91f   : > { %v2379_v26 = vpop.f32.mrf.mxu0 }
 0x920   : > { %2402 = vst.msk [vmem:[#allocation2 + $0x8] sm:$0xff] %vm477_vm0, %v2388_v10  ;;  %v2391_v29 = vmax.f32 %v2385_v24, 0.0  ;;  %v2380_v15 = vadd.f32 %v2379_v26, %v1263_v50 }
 0x922   : > { %2405 = vst.msk [vmem:[#allocation2 + $0x20] sm:$0xff] %vm477_vm0, %v2391_v29  ;;  %v2390_v20 = vmax.f32 %v2380_v15, 0.0 }
 0x924   : > { %2404 = vst.msk [vmem:[#allocation2 + $0x18] sm:$0xff] %vm477_vm0, %v2390_v20 }
 0x925   : > { %v2415_v59 = vld [vmem:[#allocation2 + $0x10] sm:$0xff] }
 0x926   : > { %2424 = vrot.lane.b32.xlu0 %v2415_v59, %s3434_s19 }
 0x927   : > { %v2414_v61 = vld [vmem:[#allocation2 + $0x8] sm:$0xff] }
 0x928   : > { %v2438_v21 = vld [vmem:[#allocation2 + $0x9] sm:$0xff]  ;;  %2422 = vrot.lane.b32.xlu1 %v2414_v61, %s3434_s19 }
 0x929   : > { %v2407_v22 = vld [vmem:[#allocation2 + $0xf] sm:$0xff]  ;;  %2442 = vst.msk [vmem:[#allocation3 + $0x8] sm:$0xff] %vm477_vm0, %v2438_v21  ;;  %v2406_v62 = vld [vmem:[#allocation2 + $0x7] sm:$0xff] }
 0x92a   : > { %2411 = vst.msk [vmem:[#allocation3 + $0x18] sm:$0xff] %vm477_vm0, %v2407_v22  ;;  %v2417_v50 = vld [vmem:[#allocation2 + $0x20] sm:$0xff]  ;;  %2410 = vst.msk [vmem:[#allocation3] sm:$0xff] %vm477_vm0, %v2406_v62 }
 0x92b   : > { %2755 = vst.msk [vmem:[#allocation2] sm:$0xff] %vm477_vm0, %v3421_v0  ;;  %v2441_v56 = vld [vmem:[#allocation2 + $0x21] sm:$0xff]  ;;  %2428 = vrot.lane.b32.xlu0 %v2417_v50, %s3434_s19  ;;  %v2416_v11 = vld [vmem:[#allocation2 + $0x18] sm:$0xff] }
 0x92c   : > { %2445 = vst.msk [vmem:[#allocation3 + $0x50] sm:$0xff] %vm477_vm0, %v2441_v56  ;;  %v2439_v12 = vld [vmem:[#allocation2 + $0x11] sm:$0xff]  ;;  %v2409_v13 = vld [vmem:[#allocation2 + $0x1f] sm:$0xff]  ;;  %2426 = vrot.lane.b32.xlu1 %v2416_v11, %s3434_s19 }
 0x92d   : > { %2443 = vst.msk [vmem:[#allocation3 + $0x20] sm:$0xff] %vm477_vm0, %v2439_v12  ;;  %2413 = vst.msk [vmem:[#allocation3 + $0x48] sm:$0xff] %vm477_vm0, %v2409_v13  ;;  %v2408_v14 = vld [vmem:[#allocation2 + $0x17] sm:$0xff] }
 0x92e   : > { %v2440_v16 = vld [vmem:[#allocation2 + $0x19] sm:$0xff]  ;;  %2412 = vst.msk [vmem:[#allocation3 + $0x30] sm:$0xff] %vm477_vm0, %v2408_v14  ;;  %2757 = vst.msk [vmem:[#allocation2 + $0x10] sm:$0xff] %vm477_vm0, %v3421_v0 }
 0x92f   : > { %2444 = vst.msk [vmem:[#allocation3 + $0x38] sm:$0xff] %vm477_vm0, %v2440_v16  ;;  %2759 = vst.msk [vmem:[#allocation2 + $0x20] sm:$0xff] %vm477_vm0, %v3421_v0 }
 0x930   : > { %v2447_v40 = vld [vmem:[#allocation3 + $0x8] sm:$0xff]  ;;  %489 = vst.msk [vmem:[#allocation2 + $0x8] sm:$0xff] %vm488_vm1, %v469_v49  ;;  %491 = vst.msk [vmem:[#allocation2 + $0x18] sm:$0xff] %vm488_vm1, %v471_v60 }
 0x931   : > { %2756 = vst.msk [vmem:[#allocation2 + $0x8] sm:$0xff] %vm477_vm0, %v3421_v0  ;;  %2758 = vst.msk [vmem:[#allocation2 + $0x18] sm:$0xff] %vm477_vm0, %v3421_v0 }
 0x932   : > { %493 = vst.msk [vmem:[#allocation2 + $0x28] sm:$0xff] %vm488_vm1, %v473_v63 }
 0x933   : > { %v2453_v31 = vld [vmem:[#allocation3 + $0x50] sm:$0xff]  ;;  %2760 = vst.msk [vmem:[#allocation2 + $0x28] sm:$0xff] %vm477_vm0, %v3421_v0 }
 0x934   : > { %v2449_v42 = vld [vmem:[#allocation3 + $0x20] sm:$0xff] }
 0x935   : > { %v2455_v17 = vpack.c.bf16 %v2449_v42, %v2447_v40 }
 0x936   : > { %v2451_v23 = vld [vmem:[#allocation3 + $0x38] sm:$0xff] }
 0x937   : > { %3144 = vmatprep.mubr.msk.bf16.mxu0 %vm477_vm0, %v2455_v17  ;;  %v2457_v32 = vpack.c.bf16 %v2453_v31, %v2451_v23 }
 0x998   : > { %v2425_v33 = vpop.permute.xlu0 %2424 }
 0x999   : > { %2435 = vst.msk [vmem:[#allocation3 + $0x18] sm:$0xff] %vm1307_vm3, %v2425_v33 }
 0x99a   : > { %v2423_v35 = vpop.permute.xlu1 %2422 }
 0x99b   : > { %2434 = vst.msk [vmem:[#allocation3] sm:$0xff] %vm1307_vm3, %v2423_v35 }
 0x99d   : > { %v2429_v18 = vpop.permute.xlu0 %2428 }
 0x99e   : > { %2437 = vst.msk [vmem:[#allocation3 + $0x48] sm:$0xff] %vm1307_vm3, %v2429_v18  ;;  %v2427_v19 = vpop.permute.xlu1 %2426 }
 0x99f   : > { %2436 = vst.msk [vmem:[#allocation3 + $0x30] sm:$0xff] %vm1307_vm3, %v2427_v19 }
 0x9a0   : > { %v2448_v25 = vld [vmem:[#allocation3 + $0x18] sm:$0xff] }
 0x9a2   : > { %v2446_v27 = vld [vmem:[#allocation3] sm:$0xff] }
 0x9a3   : > { %v2454_v30 = vpack.c.bf16 %v2448_v25, %v2446_v27 }
 0x9a5   : > { %2593 = vmatmul.mubr.bf16.vlgmr.msra.gmra.mxu0 %v2454_v30  ;;  %v2452_v36 = vld [vmem:[#allocation3 + $0x48] sm:$0xff] }
 0x9a6   : > { %3145 = vmatprep.mubr.msk.bf16.mxu0 %vm477_vm0, %v2457_v32  ;;  %v2450_v34 = vld [vmem:[#allocation3 + $0x30] sm:$0xff]  ;;  %vm2908_vm0 = vcmask 97280  }
 0x9a7   : > { %v2456_v37 = vpack.c.bf16 %v2452_v36, %v2450_v34 }
 0x9ad   : > { %2601 = vmatmul.mubr.bf16.gmra.mxu0 %v2456_v37 }
 0xa65   : > { %v2594_v39 = vpop.f32.mrf.mxu0 }
 0xa67   : > { %v2596_v41 = vpop.f32.mrf.mxu0 }
 0xa69   : > { %v2597_v51 = vpop.f32.mrf.mxu0 }
 0xa6b   : > { %v2599_v52 = vpop.f32.mrf.mxu0 }
 0xa6d   : > { %v2602_v53 = vpop.f32.mrf.mxu0 }
 0xa6f   : > { %v2604_v43 = vpop.f32.mrf.mxu0 }
 0xa71   : > { %v2605_v54 = vpop.f32.mrf.mxu0 }
 0xa72   : > { %3265 = vmatprep.subr.mxu1 %v2605_v54 }
 0xa73   : > { %v2607_v55 = vpop.f32.mrf.mxu0  ;;  %3266 = vmatpush3.msra.mxu1 %v2605_v54 }
 0xa74   : > { %3267 = vmatprep.subr.mxu1 %v2602_v53 }
 0xa75   : > { %3268 = vmatpush3.msra.mxu1 %v2602_v53 }
 0xa76   : > { %3269 = vmatprep.subr.mxu1 %v2597_v51 }
 0xa77   : > { %3270 = vmatpush3.msra.mxu1 %v2597_v51 }
 0xa78   : > { %3271 = vmatprep.subr.mxu1 %v2594_v39 }
 0xa79   : > { %3272 = vmatpush3.msra.mxu1 %v2594_v39 }
 0xa7a   : > { %3274 = vmatmul.mubr.msk.f32.vlgmr.msra.gmra.mxu1 %vm2617_vm7, %v2610_v44 }
 0xa7b   : > { %3276 = vmatprep.mubr.msk.f32.mxu1 %vm2617_vm7, %v2611_v45 }
 0xa7e   : > { %3277 = vmatmul.mubr.msk.f32.gmra.mxu1 %vm2617_vm7, %v2612_v57  ;;  %v3154_v57 = vld [vmem:[%s4694_s10] ss:$0 sm:$0xff] }
 0xa7f   : > { %3279 = vmatprep.mubr.msk.f32.mxu1 %vm2617_vm7, %v2613_v46 }
 0xa82   : > { %3280 = vmatmul.mubr.msk.f32.gmra.mxu1 %vm2617_vm7, %v2614_v47 }
 0xa83   : > { %3282 = vmatprep.mubr.msk.f32.mxu1 %vm2617_vm7, %v2615_v58 }
 0xa86   : > { %3283 = vmatmul.mubr.msk.f32.gmra.mxu1 %vm2617_vm7, %v2616_v48 }
 0xb3a   : > { %v3275_v6 = vpop.f32.mrf.mxu1 }
 0xb3b   : > { %v2714_v7 = vadd.f32 %v3275_v6, %v3550_v1 }
 0xb3c   : > { %v2708_v8 = vpop.f32.mrf.mxu1 }
 0xb3d   : > { %v2748_v9 = vmax.f32 %v2714_v7, 0.0  ;;  %v2709_v10 = vadd.f32 %v2708_v8, %v469_v49 }
 0xb3e   : > { %v3278_v24 = vpop.f32.mrf.mxu1 }
 0xb3f   : > { %2766 = vst.msk [vmem:[#allocation2 + $0x10] sm:$0xff] %vm488_vm1, %v2748_v9  ;;  %v2747_v26 = vmax.f32 %v2709_v10, 0.0  ;;  %v2724_v28 = vadd.f32 %v3278_v24, %v3553_v2 }
 0xb40   : > { %v2718_v29 = vpop.f32.mrf.mxu1 }
 0xb41   : > { %v2750_v15 = vmax.f32 %v2724_v28, 0.0  ;;  %2765 = vst.msk [vmem:[#allocation2 + $0x8] sm:$0xff] %vm488_vm1, %v2747_v26  ;;  %v2719_v20 = vadd.f32 %v2718_v29, %v471_v60 }
 0xb42   : > { %v3281_v59 = vpop.f32.mrf.mxu1 }
 0xb43   : > { %2768 = vst.msk [vmem:[#allocation2 + $0x20] sm:$0xff] %vm488_vm1, %v2750_v15  ;;  %v2749_v0 = vmax.f32 %v2719_v20, 0.0  ;;  %v2734_v1 = vadd.f32 %v3281_v59, %v3556_v3 }
 0xb44   : > { %v2728_v61 = vpop.f32.mrf.mxu1 }
 0xb45   : > { %v2752_v21 = vmax.f32 %v2734_v1, 0.0  ;;  %2767 = vst.msk [vmem:[#allocation2 + $0x18] sm:$0xff] %vm488_vm1, %v2749_v0  ;;  %v2729_v22 = vadd.f32 %v2728_v61, %v473_v63 }
 0xb46   : > { %v2790_v62 = vld [vmem:[#allocation2 + $0x10] sm:$0xff]  ;;  %v3284_v50 = vpop.f32.mrf.mxu1 }
 0xb47   : > { %2770 = vst.msk [vmem:[#allocation2 + $0x30] sm:$0xff] %vm488_vm1, %v2752_v21  ;;  %2807 = vrot.lane.b32.xlu0 %v2790_v62, %s4704_s18  ;;  %v2751_v2 = vmax.f32 %v2729_v22, 0.0  ;;  %v2744_v56 = vadd.f32 %v3284_v50, %v3565_v4 }
 0xb48   : > { %v2789_v11 = vld [vmem:[#allocation2 + $0x8] sm:$0xff]  ;;  %v2738_v12 = vpop.f32.mrf.mxu1 }
 0xb49   : > { %v2774_v13 = vld [vmem:[#allocation2 + $0xf] sm:$0xff]  ;;  %2805 = vrot.lane.b32.xlu1 %v2789_v11, %s4704_s18  ;;  %2769 = vst.msk [vmem:[#allocation2 + $0x28] sm:$0xff] %vm488_vm1, %v2751_v2  ;;  %v2754_v3 = vmax.f32 %v2744_v56, 0.0  ;;  %v2739_v14 = vadd.f32 %v2738_v12, %v475_v5  ;;  %v2773_v16 = vld [vmem:[#allocation2 + $0x7] sm:$0xff] }
 0xb4a   : > { %2782 = vst.msk [vmem:[#allocation3 + $0x18] sm:$0xff] %vm488_vm1, %v2774_v13  ;;  %v2792_v40 = vld [vmem:[#allocation2 + $0x20] sm:$0xff]  ;;  %2781 = vst.msk [vmem:[#allocation3] sm:$0xff] %vm488_vm1, %v2773_v16  ;;  %v2837_v42 = vld [vmem:[#allocation2 + $0x9] sm:$0xff] }
 0xb4b   : > { %2811 = vrot.lane.b32.xlu0 %v2792_v40, %s4704_s18  ;;  %2772 = vst.msk [vmem:[#allocation2 + $0x40] sm:$0xff] %vm488_vm1, %v2754_v3  ;;  %v2753_v4 = vmax.f32 %v2739_v14, 0.0 }
 0xb4c   : > { %v2776_v17 = vld [vmem:[#allocation2 + $0x1f] sm:$0xff]  ;;  %v2775_v33 = vld [vmem:[#allocation2 + $0x17] sm:$0xff] }
 0xb4d   : > { %2853 = vrot.lane.b32.xlu1 %v2837_v42, %s4705_s21  ;;  %2771 = vst.msk [vmem:[#allocation2 + $0x38] sm:$0xff] %vm488_vm1, %v2753_v4  ;;  %v2838_v35 = vld [vmem:[#allocation2 + $0x11] sm:$0xff]  ;;  %2784 = vst.msk [vmem:[#allocation3 + $0x48] sm:$0xff] %vm488_vm1, %v2776_v17  ;;  %v2839_v25 = vld [vmem:[#allocation2 + $0x19] sm:$0xff] }
 0xb4e   : > { %2783 = vst.msk [vmem:[#allocation3 + $0x30] sm:$0xff] %vm488_vm1, %v2775_v33  ;;  %v2791_v18 = vld [vmem:[#allocation2 + $0x18] sm:$0xff]  ;;  %v2794_v19 = vld [vmem:[#allocation2 + $0x30] sm:$0xff] }
 0xb4f   : > { %2855 = vrot.lane.b32.xlu0 %v2838_v35, %s4705_s21 }
 0xb50   : > { %v2778_v23 = vld [vmem:[#allocation2 + $0x2f] sm:$0xff]  ;;  %v2777_v27 = vld [vmem:[#allocation2 + $0x27] sm:$0xff] }
 0xb51   : > { %2809 = vrot.lane.b32.xlu1 %v2791_v18, %s4704_s18  ;;  %2786 = vst.msk [vmem:[#allocation3 + $0x78] sm:$0xff] %vm488_vm1, %v2778_v23  ;;  %2785 = vst.msk [vmem:[#allocation3 + $0x60] sm:$0xff] %vm488_vm1, %v2777_v27  ;;  %v2840_v32 = vld [vmem:[#allocation2 + $0x21] sm:$0xff]  ;;  %v2841_v37 = vld [vmem:[#allocation2 + $0x29] sm:$0xff] }
 0xb52   : > { %v2793_v34 = vld [vmem:[#allocation2 + $0x28] sm:$0xff]  ;;  %v2796_v36 = vld [vmem:[#allocation2 + $0x40] sm:$0xff] }
 0xb53   : > { %2815 = vrot.lane.b32.xlu0 %v2794_v19, %s4704_s18  ;;  %v2844_v41 = vld [vmem:[#allocation2 + $0x41] sm:$0xff] }
 0xb54   : > { %v2780_v30 = vld [vmem:[#allocation2 + $0x3f] sm:$0xff]  ;;  %v2779_v31 = vld [vmem:[#allocation2 + $0x37] sm:$0xff] }
 0xb55   : > { %2857 = vrot.lane.b32.xlu1 %v2839_v25, %s4705_s21  ;;  %2788 = vst.msk [vmem:[#allocation3 + $0xa8] sm:$0xff] %vm488_vm1, %v2780_v30  ;;  %2787 = vst.msk [vmem:[#allocation3 + $0x90] sm:$0xff] %vm488_vm1, %v2779_v31  ;;  %v2842_v38 = vld [vmem:[#allocation2 + $0x31] sm:$0xff]  ;;  %v2843_v51 = vld [vmem:[#allocation2 + $0x39] sm:$0xff]  ;;  %vm2981_vm1 = vcmask 7168  }
 0xb56   : > { %v2795_v39 = vld [vmem:[#allocation2 + $0x38] sm:$0xff] }
 0xb57   : > { %2859 = vrot.lane.b32.xlu0 %v2840_v32, %s4705_s21 }
 0xb59   : > { %2813 = vrot.lane.b32.xlu1 %v2793_v34, %s4704_s18 }
 0xb5b   : > { %2819 = vrot.lane.b32.xlu0 %v2796_v36, %s4704_s18 }
 0xb5d   : > { %2861 = vrot.lane.b32.xlu1 %v2841_v37, %s4705_s21 }
 0xb5f   : > { %2863 = vrot.lane.b32.xlu0 %v2842_v38, %s4705_s21 }
 0xb61   : > { %2817 = vrot.lane.b32.xlu1 %v2795_v39, %s4704_s18 }
 0xb63   : > { %2867 = vrot.lane.b32.xlu0 %v2844_v41, %s4705_s21 }
 0xb65   : > { %2865 = vrot.lane.b32.xlu1 %v2843_v51, %s4705_s21 }
 0xbb9   : > { %v2808_v52 = vpop.permute.xlu0 %2807 }
 0xbba   : > { %2830 = vst.msk [vmem:[#allocation3 + $0x18] sm:$0xff] %vm553_vm2, %v2808_v52 }
 0xbbb   : > { %v2806_v53 = vpop.permute.xlu1 %2805 }
 0xbbc   : > { %2829 = vst.msk [vmem:[#allocation3] sm:$0xff] %vm553_vm2, %v2806_v53 }
 0xbbd   : > { %v2812_v43 = vpop.permute.xlu0 %2811 }
 0xbbe   : > { %2832 = vst.msk [vmem:[#allocation3 + $0x48] sm:$0xff] %vm553_vm2, %v2812_v43 }
 0xbbf   : > { %v2854_v54 = vpop.permute.xlu1 %2853 }
 0xbc0   : > { %2877 = vst.msk [vmem:[#allocation3] sm:$0xff] %vm602_vm4, %v2854_v54 }
 0xbc1   : > { %v2856_v55 = vpop.permute.xlu0 %2855 }
 0xbc2   : > { %2878 = vst.msk [vmem:[#allocation3 + $0x18] sm:$0xff] %vm602_vm4, %v2856_v55 }
 0xbc3   : > { %v2810_v44 = vpop.permute.xlu1 %2809 }
 0xbc4   : > { %2831 = vst.msk [vmem:[#allocation3 + $0x30] sm:$0xff] %vm553_vm2, %v2810_v44 }
 0xbc5   : > { %v2816_v45 = vpop.permute.xlu0 %2815 }
 0xbc6   : > { %2834 = vst.msk [vmem:[#allocation3 + $0x78] sm:$0xff] %vm553_vm2, %v2816_v45 }
 0xbc7   : > { %v2858_v46 = vpop.permute.xlu1 %2857  ;;  %v2885_v47 = vld [vmem:[#allocation3] sm:$0xff] }
 0xbc8   : > { %2879 = vst.msk [vmem:[#allocation3 + $0x30] sm:$0xff] %vm602_vm4, %v2858_v46  ;;  %v2900_v58 = vmul.f32 %v3154_v57, %v2885_v47 }
 0xbc9   : > { %v2860_v48 = vpop.permute.xlu0 %2859  ;;  %v2886_v49 = vld [vmem:[#allocation3 + $0x18] sm:$0xff] }
 0xbca   : > { %2880 = vst.msk [vmem:[#allocation3 + $0x48] sm:$0xff] %vm602_vm4, %v2860_v48  ;;  %v2909_v60 = vsel %vm2908_vm0, %v2900_v58, 0.0  ;;  %v2901_v63 = vmul.f32 %v3154_v57, %v2886_v49 }
 0xbcb   : > { %v2814_v5 = vpop.permute.xlu1 %2813  ;;  %2910 = vadd.xlane.f32.xlu1 %v2909_v60 }
 0xbcc   : > { %2833 = vst.msk [vmem:[#allocation3 + $0x60] sm:$0xff] %vm553_vm2, %v2814_v5  ;;  %v2912_v6 = vsel %vm2908_vm0, %v2901_v63, 0.0 }
 0xbcd   : > { %v2820_v7 = vpop.permute.xlu0 %2819  ;;  %2913 = vadd.xlane.f32.xlu0 %v2912_v6 }
 0xbce   : > { %2836 = vst.msk [vmem:[#allocation3 + $0xa8] sm:$0xff] %vm553_vm2, %v2820_v7 }
 0xbcf   : > { %v2862_v8 = vpop.permute.xlu1 %2861  ;;  %v2887_v9 = vld [vmem:[#allocation3 + $0x30] sm:$0xff] }
 0xbd0   : > { %2881 = vst.msk [vmem:[#allocation3 + $0x60] sm:$0xff] %vm602_vm4, %v2862_v8  ;;  %v2902_v10 = vmul.f32 %v3154_v57, %v2887_v9 }
 0xbd1   : > { %v2864_v24 = vpop.permute.xlu0 %2863  ;;  %v2888_v26 = vld [vmem:[#allocation3 + $0x48] sm:$0xff] }
 0xbd2   : > { %2882 = vst.msk [vmem:[#allocation3 + $0x78] sm:$0xff] %vm602_vm4, %v2864_v24  ;;  %v2915_v28 = vsel %vm2908_vm0, %v2902_v10, 0.0  ;;  %v2903_v29 = vmul.f32 %v3154_v57, %v2888_v26 }
 0xbd3   : > { %v2818_v15 = vpop.permute.xlu1 %2817  ;;  %2916 = vadd.xlane.f32.xlu0 %v2915_v28 }
 0xbd4   : > { %2835 = vst.msk [vmem:[#allocation3 + $0x90] sm:$0xff] %vm553_vm2, %v2818_v15  ;;  %v2918_v20 = vsel %vm2908_vm0, %v2903_v29, 0.0 }
 0xbd5   : > { %2919 = vadd.xlane.f32.xlu1 %v2918_v20  ;;  %v2868_v59 = vpop.permute.xlu0 %2867 }
 0xbd6   : > { %2884 = vst.msk [vmem:[#allocation3 + $0xa8] sm:$0xff] %vm602_vm4, %v2868_v59 }
 0xbd7   : > { %v2866_v0 = vpop.permute.xlu1 %2865  ;;  %v2889_v1 = vld [vmem:[#allocation3 + $0x60] sm:$0xff] }
 0xbd8   : > { %2883 = vst.msk [vmem:[#allocation3 + $0x90] sm:$0xff] %vm602_vm4, %v2866_v0  ;;  %v2904_v61 = vmul.f32 %v3154_v57, %v2889_v1 }
 0xbd9   : > { %v2890_v21 = vld [vmem:[#allocation3 + $0x78] sm:$0xff] }
 0xbda   : > { %v2921_v22 = vsel %vm2908_vm0, %v2904_v61, 0.0  ;;  %v2905_v62 = vmul.f32 %v3154_v57, %v2890_v21 }
 0xbdb   : > { %2922 = vadd.xlane.f32.xlu0 %v2921_v22 }
 0xbdc   : > { %v2924_v50 = vsel %vm2908_vm0, %v2905_v62, 0.0 }
 0xbdd   : > { %2925 = vadd.xlane.f32.xlu1 %v2924_v50  ;;  %v2892_v2 = vld [vmem:[#allocation3 + $0xa8] sm:$0xff] }
 0xbde   : > { %v2907_v56 = vmul.f32 %v3154_v57, %v2892_v2 }
 0xbdf   : > { %v2891_v11 = vld [vmem:[#allocation3 + $0x90] sm:$0xff] }
 0xbe0   : > { %v2930_v12 = vsel %vm2908_vm0, %v2907_v56, 0.0  ;;  %v2906_v13 = vmul.f32 %v3154_v57, %v2891_v11 }
 0xbe1   : > { %2931 = vadd.xlane.f32.xlu1 %v2930_v12 }
 0xbe2   : > { %v2927_v3 = vsel %vm2908_vm0, %v2906_v13, 0.0 }
 0xbe3   : > { %2928 = vadd.xlane.f32.xlu0 %v2927_v3 }
 0xc54   : > { %v2911_v14 = vpop.xlane.xlu1 %2910 }
 0xc55   : > { %v2933_v16 = vsub.f32 0.0, %v2911_v14 }
 0xc56   : > { %v2914_v40 = vpop.xlane.xlu0 %2913 }
 0xc57   : > { %v2941_v4 = vmul.f32 1.442695, %v2933_v16  ;;  %v2934_v42 = vsub.f32 0.0, %v2914_v40 }
 0xc59   : > { %3381 = vpow2.f32 %v2941_v4  ;;  %v2943_v17 = vmul.f32 1.442695, %v2934_v42 }
 0xc5b   : > { %3383 = vpow2.f32 %v2943_v17 }
 0xc5c   : > { %v2917_v33 = vpop.xlane.xlu0 %2916 }
 0xc5d   : > { %v2935_v35 = vsub.f32 0.0, %v2917_v33 }
 0xc5e   : > { %v2920_v18 = vpop.xlane.xlu1 %2919 }
 0xc5f   : > { %v2945_v19 = vmul.f32 1.442695, %v2935_v35  ;;  %v2936_v23 = vsub.f32 0.0, %v2920_v18 }
 0xc61   : > { %3385 = vpow2.f32 %v2945_v19  ;;  %v2947_v27 = vmul.f32 1.442695, %v2936_v23 }
 0xc63   : > { %3387 = vpow2.f32 %v2947_v27 }
 0xc64   : > { %v2923_v25 = vpop.xlane.xlu0 %2922 }
 0xc65   : > { %v2937_v30 = vsub.f32 0.0, %v2923_v25 }
 0xc66   : > { %v3382_v31 = vpop.eup %3381  ;;  %v2926_v32 = vpop.xlane.xlu1 %2925 }
 0xc67   : > { %v2957_v34 = vadd.f32 1.0, %v3382_v31  ;;  %v2949_v36 = vmul.f32 1.442695, %v2937_v30  ;;  %v2938_v37 = vsub.f32 0.0, %v2926_v32 }
 0xc68   : > { %v3384_v38 = vpop.eup %3383 }
 0xc69   : > { %3389 = vrcp.f32 %v2957_v34  ;;  %v2958_v39 = vadd.f32 1.0, %v3384_v38  ;;  %v2951_v41 = vmul.f32 1.442695, %v2938_v37 }
 0xc6a   : > { %3391 = vpow2.f32 %v2949_v36  ;;  %v2932_v51 = vpop.xlane.xlu1 %2931 }
 0xc6b   : > { %3393 = vrcp.f32 %v2958_v39  ;;  %v2940_v52 = vsub.f32 0.0, %v2932_v51 }
 0xc6c   : > { %3395 = vpow2.f32 %v2951_v41  ;;  %v2929_v53 = vpop.xlane.xlu0 %2928 }
 0xc6d   : > { %v2955_v43 = vmul.f32 1.442695, %v2940_v52  ;;  %v2939_v54 = vsub.f32 0.0, %v2929_v53 }
 0xc6e   : > { %v3386_v55 = vpop.eup %3385 }
 0xc6f   : > { %v2959_v44 = vadd.f32 1.0, %v3386_v55  ;;  %3397 = vpow2.f32 %v2955_v43  ;;  %v2953_v45 = vmul.f32 1.442695, %v2939_v54 }
 0xc70   : > { %v3388_v57 = vpop.eup %3387 }
 0xc71   : > { %3399 = vrcp.f32 %v2959_v44  ;;  %v2960_v46 = vadd.f32 1.0, %v3388_v57 }
 0xc72   : > { %3401 = vpow2.f32 %v2953_v45 }
 0xc73   : > { %3403 = vrcp.f32 %v2960_v46 }
 0xc76   : > { %v3390_v47 = vpop.eup %3389 }
 0xc77   : > { %v3392_v58 = vpop.eup %3391  ;;  %2982 = vst.msk [vmem:[%s467_s26] sm:$0xff] %vm2981_vm1, %v3390_v47 }
 0xc78   : > { %v3394_v48 = vpop.eup %3393  ;;  %v2961_v49 = vadd.f32 1.0, %v3392_v58 }
 0xc79   : > { %v3396_v60 = vpop.eup %3395  ;;  %2983 = vst.msk [vmem:[%s467_s26 + $0x8] sm:$0xff] %vm2981_vm1, %v3394_v48 }
 0xc7a   : > { %3405 = vrcp.f32 %v2961_v49  ;;  %v2962_v63 = vadd.f32 1.0, %v3396_v60 }
 0xc7c   : > { %v3398_v5 = vpop.eup %3397  ;;  %3407 = vrcp.f32 %v2962_v63 }
 0xc7d   : > { %v2964_v6 = vadd.f32 1.0, %v3398_v5 }
 0xc7e   : > { %v3400_v7 = vpop.eup %3399 }
 0xc7f   : > { %v3402_v8 = vpop.eup %3401  ;;  %2984 = vst.msk [vmem:[%s467_s26 + $0x10] sm:$0xff] %vm2981_vm1, %v3400_v7  ;;  %3409 = vrcp.f32 %v2964_v6 }
 0xc80   : > { %v3404_v9 = vpop.eup %3403  ;;  %v2963_v10 = vadd.f32 1.0, %v3402_v8 }
 0xc81   : > { %2985 = vst.msk [vmem:[%s467_s26 + $0x18] sm:$0xff] %vm2981_vm1, %v3404_v9 }
 0xc82   : > { %3411 = vrcp.f32 %v2963_v10 }
 0xc87   : > { %v3406_v24 = vpop.eup %3405 }
 0xc88   : > { %2986 = vst.msk [vmem:[%s467_s26 + $0x20] sm:$0xff] %vm2981_vm1, %v3406_v24 }
 0xc89   : > { %v3408_v26 = vpop.eup %3407 }
 0xc8a   : > { %2987 = vst.msk [vmem:[%s467_s26 + $0x28] sm:$0xff] %vm2981_vm1, %v3408_v26 }
 0xc8c   : > { %v3410_v28 = vpop.eup %3409 }
 0xc8d   : > { %2989 = vst.msk [vmem:[%s467_s26 + $0x38] sm:$0xff] %vm2981_vm1, %v3410_v28 }
 0xc8f   : > { %v3412_v29 = vpop.eup %3411 }
 0xc90   : > { %2988 = vst.msk [vmem:[%s467_s26 + $0x30] sm:$0xff] %vm2981_vm1, %v3412_v29 }
 0xc91 PF: > { %s24_s29 = sadd.s32 1, %s3419_s29  }
 0xc92   : > { %p21_p4 = scmp.ge.s32.totalorder %s24_s29, 4  }
 0xc94   :  { %23 = sbr.rel (!%p21_p4) target bundleno = 1 (0x1), region = 113 }

</bundles_post_ra>
